<compile_context>
chip_gen: v6e
topology: v6e:2x2x1
jax: 0.10.0
libtpu: 0.0.40
codegen_flags: <defaults>
</compile_context>

<pallas_src>
import jax
import jax.numpy as jnp
from jax.experimental import pallas as pl
from jax.experimental.pallas import tpu as pltpu

BN_EPS = 1e-5
LANE = 128


def _round_up(n, m):
    return (n + m - 1) // m * m


def _make_kernel(H, W, tq, Cip):
    n_kv = (H // 2) * (W // 2)
    inv_nkv = 1.0 / n_kv

    def kernel(x_ref, wpg_ref, bpg_ref, wth_ref, bth_ref, wwf_ref, bwf_ref,
               out_ref, m_ref, bias_ref):
        q = pl.program_id(1)

        # ---- KV / fold phase: once per image (q == 0); results live in scratch.
        @pl.when(q == 0)
        def _():
            xk = x_ref[0].astype(jnp.bfloat16)                          # (N, Cp)
            # phi & g 1x1 convs fused into one matmul (concatenated weights).
            pg = jnp.dot(xk, wpg_ref[...],
                         preferred_element_type=jnp.float32) + bpg_ref[...]
            c2 = pg.shape[-1]

            # sub_sample=True -> MaxPool2d(2, 2): elementwise maxima (VPU only).
            a = pg.reshape(H // 2, 2, W // 2, 2, c2)
            pooled = jnp.maximum(
                jnp.maximum(a[:, 0, :, 0, :], a[:, 0, :, 1, :]),
                jnp.maximum(a[:, 1, :, 0, :], a[:, 1, :, 1, :]),
            ).reshape(n_kv, c2).astype(jnp.bfloat16)

            phi_p = pooled[:, :Cip]                                     # (Nkv, Cip)
            g_p = pooled[:, Cip:]                                       # (Nkv, Cip)

            # Reassociated attention (no softmax -> exact):
            #   att = phi_p^T @ g_p / Nkv                               (Cip, Cip)
            att = jax.lax.dot_general(
                phi_p, g_p, (((0,), (0,)), ((), ())),
                preferred_element_type=jnp.float32) * inv_nkv
            # Fold W (BN pre-fused) and theta into one per-image matrix so each
            # query tile needs a single matmul.  Tiny matmuls kept in f32.
            #   P = att @ W'                                            (Cip, Cp)
            #   M = W_theta @ P                                         (Cp,  Cp)
            p = jnp.dot(att, wwf_ref[...], preferred_element_type=jnp.float32)
            m = jnp.dot(wth_ref[...], p, preferred_element_type=jnp.float32)
            m_ref[...] = m.astype(jnp.bfloat16)
            bias_ref[...] = jnp.dot(bth_ref[...], p,
                                    preferred_element_type=jnp.float32) + bwf_ref[...]

        # ---- query tile: sliced from the resident image block (no extra HBM
        # stream), one matmul, fused bias, f32 residual.
        start = q * tq
        if tq % 8 == 0:
            start = pl.multiple_of(start, 8)
        xq = x_ref[0, pl.ds(start, tq), :]                              # (tq, Cp) f32
        y = jnp.dot(xq.astype(jnp.bfloat16), m_ref[...],
                    preferred_element_type=jnp.float32)
        out_ref[0] = (y + bias_ref[...] + xq).astype(out_ref.dtype)

    return kernel


def nonlocal_block_2d_nhwc(x_nhwc, params, *, q_tile=1024):
    B, H, W, C = x_nhwc.shape
    assert H % 2 == 0 and W % 2 == 0, "MaxPool2d(2,2) path assumes even H, W"
    Ci = params["w_theta"].shape[1]
    N = H * W

    # Fold eval-mode BatchNorm into the W 1x1 conv (affine in eval mode).
    scale = params["bn_gamma"] * jax.lax.rsqrt(params["bn_var"] + BN_EPS)   # (1, C)
    w_wf = params["w_w"] * scale
    b_wf = (params["b_w"] - params["bn_mean"]) * scale + params["bn_beta"]

    # Pad channel dims to the lane width (no-op when already 128-aligned).
    Cp, Cip = _round_up(C, LANE), _round_up(Ci, LANE)

    def pad2(a, r, c):
        return jnp.pad(a, ((0, r - a.shape[0]), (0, c - a.shape[1])))

    # phi & g weights concatenated -> one (N, Cp) x (Cp, 2*Cip) matmul in-kernel.
    w_pg = jnp.concatenate([pad2(params["w_phi"], Cp, Cip),
                            pad2(params["w_g"], Cp, Cip)],
                           axis=1).astype(jnp.bfloat16)
    b_pg = jnp.concatenate([pad2(params["b_phi"], 1, Cip),
                            pad2(params["b_g"], 1, Cip)], axis=1)
    w_theta = pad2(params["w_theta"], Cp, Cip)        # f32: used once per image
    b_theta = pad2(params["b_theta"], 1, Cip)
    w_wf = pad2(w_wf, Cip, Cp)                        # f32: used once per image
    b_wf = pad2(b_wf, 1, Cp)

    x = x_nhwc.reshape(B, N, C)
    if Cp != C:
        x = jnp.pad(x, ((0, 0), (0, 0), (0, Cp - C)))

    # Query-tile size: multiple of 8 rows dividing N (fall back to whole image).
    tq = q_tile if (q_tile <= N and N % q_tile == 0 and q_tile % 8 == 0) else N

    plist = [w_pg, b_pg, w_theta, b_theta, w_wf, b_wf]
    param_specs = [pl.BlockSpec(p.shape, lambda b, q: (0, 0)) for p in plist]

    out = pl.pallas_call(
        _make_kernel(H, W, tq, Cip),
        out_shape=jax.ShapeDtypeStruct((B, N, Cp), x_nhwc.dtype),
        grid=(B, N // tq),
        in_specs=[
            # Full-image block: index map is constant over q, so it is DMA'd
            # once per image; query tiles are sliced out of this resident block.
            pl.BlockSpec((1, N, Cp), lambda b, q: (b, 0, 0)),
            *param_specs,
        ],
        out_specs=pl.BlockSpec((1, tq, Cp), lambda b, q: (b, q, 0)),
        scratch_shapes=[pltpu.VMEM((Cp, Cp), jnp.bfloat16),   # M = W_theta @ P
                        pltpu.VMEM((1, Cp), jnp.float32)],    # fused bias row
        compiler_params=pltpu.CompilerParams(
            dimension_semantics=("parallel", "arbitrary")),
    )(x, *plist)

    if Cp != C:
        out = out[..., :C]
    return out.reshape(B, H, W, C)


def nonlocal_block_2d(x_nchw, params, *, q_tile=1024):
    # NCHW entry point matching the PyTorch module.  The two transposes cost an
    # extra HBM round trip of the activations; callers already keeping
    # activations channels-last should use nonlocal_block_2d_nhwc directly.
    x_nhwc = jnp.transpose(x_nchw, (0, 2, 3, 1))
    z = nonlocal_block_2d_nhwc(x_nhwc, params, q_tile=q_tile)
    return jnp.transpose(z, (0, 3, 1, 2))


def init_params(key, C, Ci):
    ks = jax.random.split(key, 8)

    def u(k, shape, fan_in):
        bound = 1.0 / (fan_in ** 0.5)
        return jax.random.uniform(k, shape, jnp.float32, -bound, bound)

    return {
        "w_theta": u(ks[0], (C, Ci), C),
        "b_theta": u(ks[1], (1, Ci), C),
        "w_phi":   u(ks[2], (C, Ci), C),
        "b_phi":   u(ks[3], (1, Ci), C),
        "w_g":     u(ks[4], (C, Ci), C),
        "b_g":     u(ks[5], (1, Ci), C),
        "w_w":     u(ks[6], (Ci, C), Ci),
        "b_w":     u(ks[7], (1, C), Ci),
        # NOTE: the PyTorch __init__ zero-inits BN gamma/beta (making z == x at
        # init); nonzero deterministic values are used so the whole compute
        # path is actually exercised.
        "bn_gamma": jnp.linspace(0.5, 1.5, C, dtype=jnp.float32).reshape(1, C),
        "bn_beta":  jnp.linspace(-0.1, 0.1, C, dtype=jnp.float32).reshape(1, C),
        "bn_mean":  jnp.zeros((1, C), jnp.float32),   # BatchNorm2d running_mean default
        "bn_var":   jnp.ones((1, C), jnp.float32),    # BatchNorm2d running_var default
    }


def reference(x_nchw, params):
    # Pure-JAX f32 reference mirroring the PyTorch forward (eval-mode BN),
    # original (non-reassociated) formulation as an independent check.
    B, C, H, W = x_nchw.shape
    x = jnp.transpose(x_nchw, (0, 2, 3, 1)).reshape(B, H * W, C).astype(jnp.float32)
    theta = x @ params["w_theta"] + params["b_theta"]
    phi = x @ params["w_phi"] + params["b_phi"]
    g = x @ params["w_g"] + params["b_g"]

    def pool(a):
        ci = a.shape[-1]
        a = a.reshape(B, H, W // 2, 2, ci).max(axis=3)
        a = a.reshape(B, H // 2, 2, W // 2, ci).max(axis=2)
        return a.reshape(B, (H // 2) * (W // 2), ci)

    phi_p, g_p = pool(phi), pool(g)
    f = jnp.einsum("bqc,bkc->bqk", theta, phi_p) / phi_p.shape[1]
    y = jnp.einsum("bqk,bkc->bqc", f, g_p)
    wy = y @ params["w_w"] + params["b_w"]
    bn = (wy - params["bn_mean"]) / jnp.sqrt(params["bn_var"] + BN_EPS) \
        * params["bn_gamma"] + params["bn_beta"]
    z = bn + x
    return jnp.transpose(z.reshape(B, H, W, C), (0, 3, 1, 2))


if __name__ == "__main__":
    B, C, H, W = 2, 4, 16, 16          # in_channels=4 -> inter_channels=2
    Ci = C // 2

    key = jax.random.PRNGKey(0)
    kx, kp = jax.random.split(key)
    x = jax.random.normal(kx, (B, C, H, W), dtype=jnp.float32)
    params = init_params(kp, C, Ci)

    z_ref = jax.block_until_ready(reference(x, params))

    # Single query tile (tq == N) and multi-tile (tq == 64 -> grid (B, 4),
    # exercising the once-per-image scratch reuse path).
    z1 = jax.block_until_ready(nonlocal_block_2d(x, params))
    z2 = jax.block_until_ready(nonlocal_block_2d(x, params, q_tile=64))

    assert z1.shape == (B, C, H, W) and z2.shape == (B, C, H, W)
    assert jnp.allclose(z1, z_ref, rtol=2e-2, atol=2e-2), "mismatch (single tile)"
    assert jnp.allclose(z2, z_ref, rtol=2e-2, atol=2e-2), "mismatch (multi tile)"
    print("KERNEL_OK")
</pallas_src>

<mosaic_0001>
module attributes {stable_mosaic.version = 11 : i64} {
  func.func @kernel(%arg0: i32, %arg1: i32, %arg2: memref<1x256x128xf32, #tpu.memory_space<vmem>>, %arg3: memref<128x256xbf16, #tpu.memory_space<vmem>>, %arg4: memref<1x256xf32, #tpu.memory_space<vmem>>, %arg5: memref<128x128xf32, #tpu.memory_space<vmem>>, %arg6: memref<1x128xf32, #tpu.memory_space<vmem>>, %arg7: memref<128x128xf32, #tpu.memory_space<vmem>>, %arg8: memref<1x128xf32, #tpu.memory_space<vmem>>, %arg9: memref<1x256x128xf32, #tpu.memory_space<vmem>>, %arg10: memref<128x128xbf16, #tpu.memory_space<vmem>>, %arg11: memref<1x128xf32, #tpu.memory_space<vmem>>) attributes {dimension_semantics = [#tpu.dimension_semantics<parallel>, #tpu.dimension_semantics<arbitrary>], iteration_bounds = array<i64: 2, 1>, scalar_prefetch = 0 : i64, scratch_operands = 2 : i64, tpu.core_type = #tpu.core_type<tc>, window_params = [{transform_indices = @transform_0, window_bounds = array<i64: 1, 256, 128>}, {pipeline_mode = #tpu.pipeline_mode<synchronous>, transform_indices = @transform_1, window_bounds = array<i64: 128, 256>}, {pipeline_mode = #tpu.pipeline_mode<synchronous>, transform_indices = @transform_2, window_bounds = array<i64: 1, 256>}, {pipeline_mode = #tpu.pipeline_mode<synchronous>, transform_indices = @transform_3, window_bounds = array<i64: 128, 128>}, {pipeline_mode = #tpu.pipeline_mode<synchronous>, transform_indices = @transform_4, window_bounds = array<i64: 1, 128>}, {pipeline_mode = #tpu.pipeline_mode<synchronous>, transform_indices = @transform_5, window_bounds = array<i64: 128, 128>}, {pipeline_mode = #tpu.pipeline_mode<synchronous>, transform_indices = @transform_6, window_bounds = array<i64: 1, 128>}, {transform_indices = @transform_7, window_bounds = array<i64: 1, 256, 128>}]} {
    %c0_i32 = arith.constant 0 : i32
    %0 = arith.cmpi eq, %arg1, %c0_i32 : i32
    %1 = arith.extui %0 : i1 to i32
    %c0_i32_0 = arith.constant 0 : i32
    %2 = arith.cmpi ne, %1, %c0_i32_0 : i32
    scf.if %2 {
      %c0_9 = arith.constant 0 : index
      %c0_10 = arith.constant 0 : index
      %c0_11 = arith.constant 0 : index
      %18 = vector.load %arg2[%c0_9, %c0_10, %c0_11] : memref<1x256x128xf32, #tpu.memory_space<vmem>>, vector<1x256x128xf32>
      %19 = vector.shape_cast %18 : vector<1x256x128xf32> to vector<256x128xf32>
      %20 = arith.truncf %19 : vector<256x128xf32> to vector<256x128xbf16>
      %c0_12 = arith.constant 0 : index
      %c0_13 = arith.constant 0 : index
      %21 = vector.load %arg3[%c0_12, %c0_13] : memref<128x256xbf16, #tpu.memory_space<vmem>>, vector<128x256xbf16>
      %cst_14 = arith.constant dense<0.000000e+00> : vector<256x256xf32>
      %22 = tpu.matmul %20, %21, %cst_14 {dimension_numbers = #tpu.dot_dimension_numbers<[1], [0], [0], [1], [0, 0, 1, 1], [], []>} : vector<256x128xbf16>, vector<128x256xbf16>, vector<256x256xf32> -> vector<256x256xf32>
      %c0_15 = arith.constant 0 : index
      %c0_16 = arith.constant 0 : index
      %23 = vector.load %arg4[%c0_15, %c0_16] : memref<1x256xf32, #tpu.memory_space<vmem>>, vector<1x256xf32>
      %24 = vector.broadcast %23 : vector<1x256xf32> to vector<256x256xf32>
      %25 = arith.addf %22, %24 : vector<256x256xf32>
      %26 = vector.shape_cast %25 : vector<256x256xf32> to vector<8x2x8x2x256xf32>
      %27 = vector.extract_strided_slice %26 {offsets = [0, 0, 0, 0, 0], sizes = [8, 1, 8, 1, 256], strides = [1, 1, 1, 1, 1]} : vector<8x2x8x2x256xf32> to vector<8x1x8x1x256xf32>
      %28 = vector.shape_cast %27 : vector<8x1x8x1x256xf32> to vector<8x8x256xf32>
      %29 = vector.extract_strided_slice %26 {offsets = [0, 0, 0, 1, 0], sizes = [8, 1, 8, 1, 256], strides = [1, 1, 1, 1, 1]} : vector<8x2x8x2x256xf32> to vector<8x1x8x1x256xf32>
      %30 = vector.shape_cast %29 : vector<8x1x8x1x256xf32> to vector<8x8x256xf32>
      %31 = arith.maximumf %28, %30 : vector<8x8x256xf32>
      %32 = vector.extract_strided_slice %26 {offsets = [0, 1, 0, 0, 0], sizes = [8, 1, 8, 1, 256], strides = [1, 1, 1, 1, 1]} : vector<8x2x8x2x256xf32> to vector<8x1x8x1x256xf32>
      %33 = vector.shape_cast %32 : vector<8x1x8x1x256xf32> to vector<8x8x256xf32>
      %34 = vector.extract_strided_slice %26 {offsets = [0, 1, 0, 1, 0], sizes = [8, 1, 8, 1, 256], strides = [1, 1, 1, 1, 1]} : vector<8x2x8x2x256xf32> to vector<8x1x8x1x256xf32>
      %35 = vector.shape_cast %34 : vector<8x1x8x1x256xf32> to vector<8x8x256xf32>
      %36 = arith.maximumf %33, %35 : vector<8x8x256xf32>
      %37 = arith.maximumf %31, %36 : vector<8x8x256xf32>
      %38 = vector.shape_cast %37 : vector<8x8x256xf32> to vector<64x256xf32>
      %39 = arith.truncf %38 : vector<64x256xf32> to vector<64x256xbf16>
      %40 = vector.extract_strided_slice %39 {offsets = [0, 0], sizes = [64, 128], strides = [1, 1]} : vector<64x256xbf16> to vector<64x128xbf16>
      %41 = vector.extract_strided_slice %39 {offsets = [0, 128], sizes = [64, 128], strides = [1, 1]} : vector<64x256xbf16> to vector<64x128xbf16>
      %cst_17 = arith.constant dense<0.000000e+00> : vector<128x128xf32>
      %42 = tpu.matmul %40, %41, %cst_17 {dimension_numbers = #tpu.dot_dimension_numbers<[0], [0], [1], [1], [0, 1, 1, 1], [], []>} : vector<64x128xbf16>, vector<64x128xbf16>, vector<128x128xf32> -> vector<128x128xf32>
      %cst_18 = arith.constant 1.562500e-02 : f32
      %43 = vector.broadcast %cst_18 : f32 to vector<128x128xf32>
      %44 = arith.mulf %42, %43 : vector<128x128xf32>
      %c0_19 = arith.constant 0 : index
      %c0_20 = arith.constant 0 : index
      %45 = vector.load %arg7[%c0_19, %c0_20] : memref<128x128xf32, #tpu.memory_space<vmem>>, vector<128x128xf32>
      %cst_21 = arith.constant dense<0.000000e+00> : vector<128x128xf32>
      %46 = tpu.matmul %44, %45, %cst_21 {dimension_numbers = #tpu.dot_dimension_numbers<[1], [0], [0], [1], [0, 0, 1, 1], [], []>} : vector<128x128xf32>, vector<128x128xf32>, vector<128x128xf32> -> vector<128x128xf32>
      %c0_22 = arith.constant 0 : index
      %c0_23 = arith.constant 0 : index
      %47 = vector.load %arg5[%c0_22, %c0_23] : memref<128x128xf32, #tpu.memory_space<vmem>>, vector<128x128xf32>
      %cst_24 = arith.constant dense<0.000000e+00> : vector<128x128xf32>
      %48 = tpu.matmul %47, %46, %cst_24 {dimension_numbers = #tpu.dot_dimension_numbers<[1], [0], [0], [1], [0, 0, 1, 1], [], []>} : vector<128x128xf32>, vector<128x128xf32>, vector<128x128xf32> -> vector<128x128xf32>
      %49 = arith.truncf %48 : vector<128x128xf32> to vector<128x128xbf16>
      %c0_25 = arith.constant 0 : index
      %c0_26 = arith.constant 0 : index
      %50 = vector.load %arg10[%c0_25, %c0_26] : memref<128x128xbf16, #tpu.memory_space<vmem>>, vector<128x128xbf16>
      tpu.vector_store %arg10[%c0_25, %c0_26], %49 {strides = array<i32>} : memref<128x128xbf16, #tpu.memory_space<vmem>>, vector<128x128xbf16>,
      %c0_27 = arith.constant 0 : index
      %c0_28 = arith.constant 0 : index
      %51 = vector.load %arg6[%c0_27, %c0_28] : memref<1x128xf32, #tpu.memory_space<vmem>>, vector<1x128xf32>
      %cst_29 = arith.constant dense<0.000000e+00> : vector<1x128xf32>
      %52 = tpu.matmul %51, %46, %cst_29 {dimension_numbers = #tpu.dot_dimension_numbers<[1], [0], [0], [1], [0, 0, 1, 1], [], []>} : vector<1x128xf32>, vector<128x128xf32>, vector<1x128xf32> -> vector<1x128xf32>
      %c0_30 = arith.constant 0 : index
      %c0_31 = arith.constant 0 : index
      %53 = vector.load %arg8[%c0_30, %c0_31] : memref<1x128xf32, #tpu.memory_space<vmem>>, vector<1x128xf32>
      %54 = arith.addf %52, %53 : vector<1x128xf32>
      %c0_32 = arith.constant 0 : index
      %c0_33 = arith.constant 0 : index
      %55 = vector.load %arg11[%c0_32, %c0_33] : memref<1x128xf32, #tpu.memory_space<vmem>>, vector<1x128xf32>
      tpu.vector_store %arg11[%c0_32, %c0_33], %54 {strides = array<i32>} : memref<1x128xf32, #tpu.memory_space<vmem>>, vector<1x128xf32>,
    } else {
    }
    %c256_i32 = arith.constant 256 : i32
    %3 = arith.muli %arg1, %c256_i32 : i32
    %4 = tpu.assume_multiple %3, 8 : i32
    %c0 = arith.constant 0 : index
    %5 = arith.index_cast %4 : i32 to index
    %c0_1 = arith.constant 0 : index
    %6 = vector.load %arg2[%c0, %5, %c0_1] : memref<1x256x128xf32, #tpu.memory_space<vmem>>, vector<1x256x128xf32>
    %7 = vector.shape_cast %6 : vector<1x256x128xf32> to vector<256x128xf32>
    %8 = arith.truncf %7 : vector<256x128xf32> to vector<256x128xbf16>
    %c0_2 = arith.constant 0 : index
    %c0_3 = arith.constant 0 : index
    %9 = vector.load %arg10[%c0_2, %c0_3] : memref<128x128xbf16, #tpu.memory_space<vmem>>, vector<128x128xbf16>
    %cst = arith.constant dense<0.000000e+00> : vector<256x128xf32>
    %10 = tpu.matmul %8, %9, %cst {dimension_numbers = #tpu.dot_dimension_numbers<[1], [0], [0], [1], [0, 0, 1, 1], [], []>} : vector<256x128xbf16>, vector<128x128xbf16>, vector<256x128xf32> -> vector<256x128xf32>
    %c0_4 = arith.constant 0 : index
    %c0_5 = arith.constant 0 : index
    %11 = vector.load %arg11[%c0_4, %c0_5] : memref<1x128xf32, #tpu.memory_space<vmem>>, vector<1x128xf32>
    %12 = vector.broadcast %11 : vector<1x128xf32> to vector<256x128xf32>
    %13 = arith.addf %10, %12 : vector<256x128xf32>
    %14 = arith.addf %13, %7 : vector<256x128xf32>
    %c0_6 = arith.constant 0 : index
    %c0_7 = arith.constant 0 : index
    %c0_8 = arith.constant 0 : index
    %15 = vector.load %arg9[%c0_6, %c0_7, %c0_8] : memref<1x256x128xf32, #tpu.memory_space<vmem>>, vector<1x256x128xf32>
    %16 = vector.shape_cast %15 : vector<1x256x128xf32> to vector<256x128xf32>
    %17 = vector.shape_cast %14 : vector<256x128xf32> to vector<1x256x128xf32>
    tpu.vector_store %arg9[%c0_6, %c0_7, %c0_8], %17 {strides = array<i32>} : memref<1x256x128xf32, #tpu.memory_space<vmem>>, vector<1x256x128xf32>,
    return
  }
  func.func @transform_0(%arg0: i32, %arg1: i32) -> (i32, i32, i32) {
    %c0_i32 = arith.constant 0 : i32
    %c0_i32_0 = arith.constant 0 : i32
    %c0_i32_1 = arith.constant 0 : i32
    return %arg0, %c0_i32, %c0_i32_0 : i32, i32, i32
  }
  func.func @transform_1(%arg0: i32, %arg1: i32) -> (i32, i32) {
    %c0_i32 = arith.constant 0 : i32
    %c0_i32_0 = arith.constant 0 : i32
    %c0_i32_1 = arith.constant 0 : i32
    return %c0_i32, %c0_i32_0 : i32, i32
  }
  func.func @transform_2(%arg0: i32, %arg1: i32) -> (i32, i32) {
    %c0_i32 = arith.constant 0 : i32
    %c0_i32_0 = arith.constant 0 : i32
    %c0_i32_1 = arith.constant 0 : i32
    return %c0_i32, %c0_i32_0 : i32, i32
  }
  func.func @transform_3(%arg0: i32, %arg1: i32) -> (i32, i32) {
    %c0_i32 = arith.constant 0 : i32
    %c0_i32_0 = arith.constant 0 : i32
    %c0_i32_1 = arith.constant 0 : i32
    return %c0_i32, %c0_i32_0 : i32, i32
  }
  func.func @transform_4(%arg0: i32, %arg1: i32) -> (i32, i32) {
    %c0_i32 = arith.constant 0 : i32
    %c0_i32_0 = arith.constant 0 : i32
    %c0_i32_1 = arith.constant 0 : i32
    return %c0_i32, %c0_i32_0 : i32, i32
  }
  func.func @transform_5(%arg0: i32, %arg1: i32) -> (i32, i32) {
    %c0_i32 = arith.constant 0 : i32
    %c0_i32_0 = arith.constant 0 : i32
    %c0_i32_1 = arith.constant 0 : i32
    return %c0_i32, %c0_i32_0 : i32, i32
  }
  func.func @transform_6(%arg0: i32, %arg1: i32) -> (i32, i32) {
    %c0_i32 = arith.constant 0 : i32
    %c0_i32_0 = arith.constant 0 : i32
    %c0_i32_1 = arith.constant 0 : i32
    return %c0_i32, %c0_i32_0 : i32, i32
  }
  func.func @transform_7(%arg0: i32, %arg1: i32) -> (i32, i32, i32) {
    %c0_i32 = arith.constant 0 : i32
    %c0_i32_0 = arith.constant 0 : i32
    return %arg0, %arg1, %c0_i32 : i32, i32, i32
  }
}

</mosaic_0001>

<bundles_post_ra>
// kernel: tpu_custom_call.1
= control target key start
LH: loop header
LB: loop body
LE: loop exit
PB: predicated region body
PF: predicated region fallthrough
CT: control target
= control target key end

     0   :  { %s7077_s0 = inlined_call_operand.hbm [shape: f32[2,256,128], index: 0, kind: input, shape index: {}]   ;;  %s7078_s1 = inlined_call_operand.hbm [shape: bf16[128,256], index: 1, kind: input, shape index: {}]   ;;  %s7079_s2 = inlined_call_operand.vmem [shape: f32[1,256], index: 2, kind: input, shape index: {}]   ;;  %s7080_s3 = inlined_call_operand.hbm [shape: f32[128,128], index: 3, kind: input, shape index: {}]   ;;  %s7081_s4 = inlined_call_operand.vmem [shape: f32[1,128], index: 4, kind: input, shape index: {}]   ;;  %s7082_s5 = inlined_call_operand.hbm [shape: f32[128,128], index: 5, kind: input, shape index: {}]   ;;  %s7083_s6 = inlined_call_operand.vmem [shape: f32[1,128], index: 6, kind: input, shape index: {}]   ;;  %s7084_s7 = inlined_call_operand.hbm [shape: f32[2,256,128], index: 7, kind: output, shape index: {}]  }
   0x1   :  { %7116 = sst [smem:[#allocation69_spill]] %s7078_s1 }
   0x2   :  { %7117 = sst [smem:[#allocation70_spill]] %s7080_s3 }
   0x3   :  { %7118 = sst [smem:[#allocation71_spill]] %s7082_s5 }
   0x4   :  { %12 = vsyncpa [#allocation5], 0 }
   0x5   :  { %14 = vsyncpa [#allocation5 + $0x1], 0 }
   0x6   :  { %15 = vsyncpa [#allocation8], 0 }
   0x7   :  { %16 = vsyncpa [#allocation11], 0 }
   0x8   :  { %17 = vsyncpa [#allocation6], 0 }
   0x9   :  { %19 = vsyncpa [#allocation6 + $0x1], 0  ;;  %s5476_s24 = smov 0   ;;  %s5478_s25 = smov 0  }
   0xa   :  { %s5480_s26 = smov 0   ;;  %s5482_s27 = smov 0  }
   0xb   :  { %s5484_s28 = smov 0   ;;  %s5486_s29 = smov 0  }
   0xc LB: > { %s4495_s30 = sadd.s32 4294967295, %s5421_s29   ;;  %s4496_s8 = sadd.s32 4294967294, %s5421_s29   ;;  %s5421_s29 = sphi %s5486_s29, %s25_s29   ;;  %s5417_s28 = sphi %s5484_s28, %s7286_s28   ;;  %s5413_s27 = sphi %s5482_s27, %s7285_s27   ;;  %s5409_s26 = sphi %s5480_s26, %s7284_s26   ;;  %s5405_s25 = sphi %s5478_s25, %s7283_s25   ;;  %s5401_s24 = sphi %s5476_s24, %s7282_s24  }
   0xd   : > { %p57_p0 = scmp.ne.s32.totalorder %s5405_s25, %s5401_s24  ;;  %p5510_p1 = scmp.eq.s32.totalorder %s4495_s30, 0 }
   0xe   : > { %p5514_p2 = scmp.eq.s32.totalorder %s4495_s30, 1  ;;  %p215_p3 = scmp.eq.s32.totalorder %s4496_s8, 1 }
   0xf   : > { %p5520_p4 = por %p5510_p1, %p57_p0  ;;  %p4497_p5 = scmp.ge.s32.totalorder %s5421_s29, 1 }
  0x10   : > { %p5525_p6 = por %p215_p3, %p57_p0  ;;  %p222_p7 = scmp.lt.s32.totalorder %s5421_s29, 3 }
  0x11   : > { %s5423_s14 = smov [#allocation7]   ;;  %s5424_s17 = smov [#allocation9]  }
  0x12   : > { %s7122_s12 = scalar_select %p5525_p6, 1, 0 }
  0x13   : > { %p5530_p8 = pnand %p4497_p5, %p222_p7  ;;  %s234_s15 = sshll.u32 %s5423_s14, 4  ;;  %s235_s15 = int_to_ptr.vmem [resolvable:$true] %s234_s15 }
  0x14   : > { %s250_s18 = sshll.u32 %s5424_s17, 4  ;;  %s5425_s19 = smov [#allocation10]   ;;  %s251_s18 = int_to_ptr.vmem [resolvable:$true] %s250_s18 }
  0x15   : > { %p5110_p9 = pneg %p5530_p8  ;;  %s266_s20 = sshll.u32 %s5425_s19, 4  ;;  %s267_s20 = int_to_ptr.vmem [resolvable:$true] %s266_s20 }
  0x16   : > { %s5238_s21 = scalar_lea.vmem %s235_s15, 2048  ;;  %p5246_p5 = scmp.lt.s32.totalorder %s235_s15, %s235_s15 }
  0x17   : > { %p5539_p11 = pnand %p5110_p9, %p5510_p1  ;;  %p5239_p13 = scmp.ne.s32.totalorder %s235_s15, %s5238_s21 }
  0x18   : > { %p5247_p7 = scmp.lt.s32.totalorder %s5238_s21, %s5238_s21 }
  0x19   : > { %p5229_p12 = pneg %p5539_p11 }
  0x1a   : > { %p5248_p9 = por %p5247_p7, %p5246_p5 }
  0x1b   : > { %p5241_p0 = pnand %p5239_p13, %p5229_p12 }
  0x1d   : > { %p5242_p3 = pneg %p5241_p0 }
  0x1f   : > { %p5249_p10 = pnand %p5248_p9, %p5242_p3 }
  0x21   : > { %5252 = shalt.err (!%p5249_p10)
}
  0x22   : > { %s7085_s22 = smov 128   ;;  %s7086_s23 = smov 8  }
  0x23   : > { %s7125_s1 = sld [smem:[#allocation69_spill]]  ;;  %s5264_s14 = scalar_lea.vmem %s251_s18, 2048 }
  0x24   : > { %p5265_p13 = scmp.ne.s32.totalorder %s251_s18, %s5264_s14  ;;  %p5272_p3 = scmp.lt.s32.totalorder %s251_s18, %s251_s18 }
  0x25   : > { %p5273_p10 = scmp.lt.s32.totalorder %s5264_s14, %s5264_s14 }
  0x26   : > { %p5267_p0 = pnand %p5265_p13, %p5229_p12 }
  0x27   : > { %p5274_p7 = por %p5273_p10, %p5272_p3 }
  0x28   : > { %p5268_p5 = pneg %p5267_p0 }
  0x29   : > { %5113 = dma.hbm_to_vmem [thread:$0]  (!%p5539_p11), %s7125_s1, 2048, %s235_s15, [#allocation8], %s7085_s22, %s7085_s22, %s7086_s23  }
  0x2a   : > { %p5275_p9 = pnand %p5274_p7, %p5268_p5 }
  0x2c   : > { %5278 = shalt.err (!%p5275_p9)
}
  0x2d   : > { %s7126_s3 = sld [smem:[#allocation70_spill]]  ;;  %s5290_s15 = scalar_lea.vmem %s267_s20, 2048 }
  0x2e   : > { %p5291_p6 = scmp.ne.s32.totalorder %s267_s20, %s5290_s15  ;;  %p5298_p3 = scmp.lt.s32.totalorder %s267_s20, %s267_s20 }
  0x2f   : > { %p5299_p5 = scmp.lt.s32.totalorder %s5290_s15, %s5290_s15 }
  0x30   : > { %p5293_p13 = pnand %p5291_p6, %p5229_p12 }
  0x31   : > { %p5300_p10 = por %p5299_p5, %p5298_p3 }
  0x32   : > { %p5294_p0 = pneg %p5293_p13 }
  0x33   : > { %5116 = dma.hbm_to_vmem [thread:$0]  (!%p5539_p11), %s7126_s3, 2048, %s251_s18, [#allocation8], %s7085_s22, %s7085_s22, %s7086_s23  }
  0x34   : > { %p5301_p7 = pnand %p5300_p10, %p5294_p0 }
  0x36   : > { %5304 = shalt.err (!%p5301_p7)
}
  0x37   : > { %s7127_s5 = sld [smem:[#allocation71_spill]]  ;;  %s44_s18 = sadd.s32 1, %s5409_s26 }
  0x38   : > { %s37_s16 = sadd.s32 1, %s5417_s28  ;;  %p51_p6 = scmp.ne.s32.totalorder %s5409_s26, %s5405_s25 }
  0x39   : > { %p39_p12 = scmp.ge.s32.totalorder %s37_s16, 2  ;;  %p52_p9 = scmp.eq.s32.totalorder %s5421_s29, 0 }
  0x3a   : > { %p5585_p13 = por %p5514_p2, %p51_p6  ;;  %p5131_p0 = scmp.lt.s32.totalorder %s5421_s29, 2 }
  0x3b   : > { %s7288_s16 = smov (%p39_p12, %s37_s16), 0  ;;  %p53_p3 = por %p52_p9, %p51_p6 }
  0x3c   : > { %s7128_s8 = scalar_select %p5585_p13, 1, 0 }
  0x3d   : > { %5119 = dma.hbm_to_vmem [thread:$0]  (!%p5539_p11), %s7127_s5, 2048, %s267_s20, [#allocation11], %s7085_s22, %s7085_s22, %s7086_s23  }
  0x3e   : > { %s283_s14 = sand.u32 1, %s5409_s26   ;;  %s41_s17 = ssub.s32 %s5417_s28, %s7288_s16 }
  0x3f   : > { %p42_p5 = scmp.eq.s32.totalorder %s41_s17, 0  ;;  %s4502_s20 = sshll.u32 %s283_s14, 8 }
  0x40   : > { %s4693_s19 = sshll.u32 %s5417_s28, 12  ;;  %s287_s22 = scalar_lea.vmem [#allocation4], %s4502_s20 }
  0x41   : > { %s5597_s15 = scalar_select %p42_p5, %s5409_s26, %s44_s18  }
  0x42   : > { %s293_s10 = scalar_lea.hbm %s7077_s0, %s4693_s19  ;;  %s294_s23 = sshll.u32 %s287_s22, 4  ;;  %s295_s23 = int_to_ptr.vmem [resolvable:$true] %s294_s23 }
  0x43   : > { %p5604_p2 = pnand %p5131_p0, %p53_p3  ;;  %s284_s3 = scalar_lea.sflag [#allocation5], %s283_s14 }
  0x44   : > { %s5318_s17 = scalar_lea.vmem %s295_s23, 4096  ;;  %s5428_s18 = smov [#allocation4]  }
  0x45   : > { %p5307_p11 = pneg %p5604_p2  ;;  %p5319_p10 = scmp.ne.s32.totalorder %s295_s23, %s5318_s17 }
  0x46   : > { %s5323_s5 = sshll.u32 %s5428_s18, 4  ;;  %s5324_s5 = int_to_ptr.vmem [resolvable:$false] %s5323_s5 }
  0x47   : > { %p5321_p7 = pnand %p5319_p10, %p5307_p11  ;;  %s5325_s19 = scalar_lea.vmem %s5324_s5, 8192 }
  0x48   : > { %p5326_p12 = scmp.lt.s32.totalorder %s295_s23, %s5324_s5  ;;  %p5327_p9 = scmp.lt.s32.totalorder %s5325_s19, %s5318_s17 }
  0x49   : > { %p5322_p6 = pneg %p5321_p7 }
  0x4a   : > { %p5328_p5 = por %p5327_p9, %p5326_p12 }
  0x4c   : > { %p5329_p13 = pnand %p5328_p5, %p5322_p6 }
  0x4e   : > { %5332 = shalt.err (!%p5329_p13)
}
  0x4f   : > { %s7130_s22 = smov 8   ;;  %s7131_s20 = smov 128  }
  0x50   : > { %5123 = dma.hbm_to_vmem [thread:$0]  (!%p5604_p2), %s293_s10, 4096, %s295_s23, %s284_s3, %s7131_s20, %s7131_s20, %s7130_s22  }
  0x51   : > { %306 = sbr.rel (%p5530_p8) target bundleno = 1683 (0x693), region = 48 }
  0x56   : > { %s5618_s14 = sand.u32 1, %s5405_s25  }
  0x57   : > { %s4506_s5 = sshll.u32 %s5618_s14, 8  ;;  %s309_s21 = scalar_lea.sflag [#allocation5], %s5618_s14 }
  0x58   : > { %s5624_s30 = scalar_lea.vmem [#allocation4], %s4506_s5 }
  0x59   : > { %5384 = dma.done.wait (%p5520_p4), %s309_s21, 4096  }
  0x5a   : > { %5386 = vsyncadd (%p5520_p4), %s309_s21, 4294963200 }
  0x5b   : > { %5388 = dma.done.wait (%p5510_p1), [#allocation8], 4096  }
  0x5c   : > { %5390 = vsyncadd (%p5510_p1), [#allocation8], 4294963200 }
  0x5d   : > { %5392 = dma.done.wait (%p5510_p1), [#allocation11], 2048  }
  0x5e   : > { %5394 = vsyncadd (%p5510_p1), [#allocation11], 4294965248  ;;  %v5429_v0 = vmov 0   ;;  %v5195_v1 = vld [vmem:[#allocation7 + $0x74] ss:$8 sps:$4 sm:$0xff]   ;;  %v361_v17 = vld [vmem:[%s5624_s30] sm:$0xff] }
  0x5f   : > { %549 = vmatprep.mubr.bf16.mxu0 %v5429_v0  ;;  %v5197_v2 = vld [vmem:[#allocation7 + $0x70] ss:$8 sps:$4 sm:$0xff]   ;;  %517 = vmatprep.subr.bf16.mxu0 %v5195_v1  ;;  %v5198_v3 = vld [vmem:[#allocation7 + $0x64] ss:$8 sps:$4 sm:$0xff]   ;;  %v5200_v4 = vld [vmem:[#allocation7 + $0x60] ss:$8 sps:$4 sm:$0xff]  }
  0x60   : > { %518 = vmatpush1.bf16.msra.mxu0 %v5197_v2  ;;  %v5201_v5 = vld [vmem:[#allocation7 + $0x54] ss:$8 sps:$4 sm:$0xff]   ;;  %v5203_v6 = vld [vmem:[#allocation7 + $0x50] ss:$8 sps:$4 sm:$0xff]   ;;  %v5204_v7 = vld [vmem:[#allocation7 + $0x44] ss:$8 sps:$4 sm:$0xff]   ;;  %v427_v2 = vlaneseq }
  0x61   : > { %519 = vmatprep.subr.bf16.mxu0 %v5198_v3  ;;  %v5206_v8 = vld [vmem:[#allocation7 + $0x40] ss:$8 sps:$4 sm:$0xff]   ;;  %v5207_v9 = vld [vmem:[#allocation7 + $0x34] ss:$8 sps:$4 sm:$0xff]   ;;  %v5209_v10 = vld [vmem:[#allocation7 + $0x30] ss:$8 sps:$4 sm:$0xff]  }
  0x62   : > { %v5210_v11 = vld [vmem:[#allocation7 + $0x24] ss:$8 sps:$4 sm:$0xff]   ;;  %v5212_v12 = vld [vmem:[#allocation7 + $0x20] ss:$8 sps:$4 sm:$0xff]   ;;  %v5213_v13 = vld [vmem:[#allocation7 + $0x14] ss:$8 sps:$4 sm:$0xff]  }
  0x63   : > { %v5215_v14 = vld [vmem:[#allocation7 + $0x10] ss:$8 sps:$4 sm:$0xff]   ;;  %v5216_v15 = vld [vmem:[#allocation7 + $0x4] ss:$8 sps:$4 sm:$0xff]   ;;  %v5218_v16 = vld [vmem:[#allocation7] ss:$8 sps:$4 sm:$0xff]  }
  0x64   : > { %520 = vmatpush1.bf16.msra.mxu0 %v5200_v4  ;;  %v362_v18 = vld [vmem:[%s5624_s30 + $0x8] sm:$0xff]  ;;  %v363_v20 = vld [vmem:[%s5624_s30 + $0x10] sm:$0xff]  ;;  %v364_v21 = vld [vmem:[%s5624_s30 + $0x18] sm:$0xff]  ;;  %v428_v3 = vshrl.u32 %v427_v2, 7  ;;  %vm3015_vm0 = vcmask 1041409   ;;  %vm3018_vm1 = vcmask 1042434  }
  0x65   : > { %521 = vmatprep.subr.bf16.mxu0 %v5201_v5  ;;  %v393_v19 = vpack.c.bf16 %v362_v18, %v361_v17  ;;  %v394_v22 = vpack.c.bf16 %v364_v21, %v363_v20  ;;  %v365_v23 = vld [vmem:[%s5624_s30 + $0x20] sm:$0xff]  ;;  %v366_v24 = vld [vmem:[%s5624_s30 + $0x28] sm:$0xff]  ;;  %v367_v26 = vld [vmem:[%s5624_s30 + $0x30] sm:$0xff]  ;;  %vm3021_vm2 = vcmask 1043459   ;;  %vm3024_vm3 = vcmask 1044484   ;;  %s6927_s10 = scalar_lea.vmem [#allocation12], %s4506_s5 }
  0x66   : > { %v395_v25 = vpack.c.bf16 %v366_v24, %v365_v23  ;;  %v368_v27 = vld [vmem:[%s5624_s30 + $0x38] sm:$0xff]  ;;  %v369_v29 = vld [vmem:[%s5624_s30 + $0x40] sm:$0xff]  ;;  %v370_v30 = vld [vmem:[%s5624_s30 + $0x48] sm:$0xff]  ;;  %v5686_v4 = vsub.s32 0, %v428_v3  ;;  %v433_v5 = vsub.s32 1, %v428_v3  ;;  %vm3027_vm4 = vcmask 1045509  }
  0x67   : > { %v396_v28 = vpack.c.bf16 %v368_v27, %v367_v26  ;;  %v397_v31 = vpack.c.bf16 %v370_v30, %v369_v29  ;;  %v371_v32 = vld [vmem:[%s5624_s30 + $0x50] sm:$0xff]  ;;  %v372_v33 = vld [vmem:[%s5624_s30 + $0x58] sm:$0xff]  ;;  %v373_v35 = vld [vmem:[%s5624_s30 + $0x60] sm:$0xff]  ;;  %vm3030_vm5 = vcmask 1046534   ;;  %vm3033_vm6 = vcmask 1047559   ;;  %s4710_s17 = sshll.u32 %s5413_s27, 12 }
  0x68   : > { %522 = vmatpush1.bf16.msra.mxu0 %v5203_v6  ;;  %v398_v34 = vpack.c.bf16 %v372_v33, %v371_v32  ;;  %v374_v36 = vld [vmem:[%s5624_s30 + $0x68] sm:$0xff]  ;;  %v375_v38 = vld [vmem:[%s5624_s30 + $0x70] sm:$0xff]  ;;  %v376_v39 = vld [vmem:[%s5624_s30 + $0x78] sm:$0xff]  ;;  %v5430_v6 = vmov 1983009808   ;;  %vm3405_vm7 = vcmask 523264   ;;  %s7024_s20 = scalar_lea.hbm %s7084_s7, %s4710_s17 }
  0x69   : > { %523 = vmatprep.subr.bf16.mxu0 %v5204_v7  ;;  %v399_v37 = vpack.c.bf16 %v374_v36, %v373_v35  ;;  %v400_v40 = vpack.c.bf16 %v376_v39, %v375_v38  ;;  %v377_v41 = vld [vmem:[%s5624_s30 + $0x80] sm:$0xff]  ;;  %v378_v42 = vld [vmem:[%s5624_s30 + $0x88] sm:$0xff]  ;;  %v379_v44 = vld [vmem:[%s5624_s30 + $0x90] sm:$0xff]  ;;  %v777_v7 = vunpack.c.l.s4 %v5430_v6  ;;  %v5708_v39 = vsub.s32 2, %v428_v3  ;;  %s4380_s18 = sshll.u32 %s6927_s10, 4  ;;  %s4365_s27 = scalar_lea.sflag [#allocation6], %s5618_s14  ;;  %s7026_s18 = int_to_ptr.vmem [resolvable:$true] %s4380_s18 }
  0x6a   : > { %v401_v43 = vpack.c.bf16 %v378_v42, %v377_v41  ;;  %v380_v45 = vld [vmem:[%s5624_s30 + $0x98] sm:$0xff]  ;;  %v381_v47 = vld [vmem:[%s5624_s30 + $0xa0] sm:$0xff]  ;;  %v382_v48 = vld [vmem:[%s5624_s30 + $0xa8] sm:$0xff]  ;;  %vm5432_vm8 = vmmov 0   ;;  %s5333_s5 = scalar_lea.vmem %s7026_s18, 4096  ;;  %p7279_p4 = scmp.ne.s32.totalorder %s7128_s8, 0 }
  0x6b   : > { %v402_v46 = vpack.c.bf16 %v380_v45, %v379_v44  ;;  %v403_v49 = vpack.c.bf16 %v382_v48, %v381_v47  ;;  %v383_v50 = vld [vmem:[%s5624_s30 + $0xb0] sm:$0xff]  ;;  %v384_v51 = vld [vmem:[%s5624_s30 + $0xb8] sm:$0xff]  ;;  %v385_v53 = vld [vmem:[%s5624_s30 + $0xc0] sm:$0xff]  ;;  %p5334_p1 = scmp.ne.s32.totalorder %s7026_s18, %s5333_s5  ;;  %s5433_s21 = smov [#allocation12]  }
  0x6c   : > { %524 = vmatpush1.bf16.msra.mxu0 %v5206_v8  ;;  %v404_v52 = vpack.c.bf16 %v384_v51, %v383_v50  ;;  %v386_v54 = vld [vmem:[%s5624_s30 + $0xc8] sm:$0xff]  ;;  %v387_v56 = vld [vmem:[%s5624_s30 + $0xd0] sm:$0xff]  ;;  %v388_v57 = vld [vmem:[%s5624_s30 + $0xd8] sm:$0xff] }
  0x6d   : > { %525 = vmatprep.subr.bf16.mxu0 %v5207_v9  ;;  %v405_v55 = vpack.c.bf16 %v386_v54, %v385_v53  ;;  %v406_v58 = vpack.c.bf16 %v388_v57, %v387_v56  ;;  %v389_v59 = vld [vmem:[%s5624_s30 + $0xe0] sm:$0xff]  ;;  %v390_v60 = vld [vmem:[%s5624_s30 + $0xe8] sm:$0xff]  ;;  %v391_v62 = vld [vmem:[%s5624_s30 + $0xf0] sm:$0xff]  ;;  %p5335_p8 = pnand %p5334_p1, %p7279_p4 }
  0x6e   : > { %v407_v61 = vpack.c.bf16 %v390_v60, %v389_v59  ;;  %v392_v63 = vld [vmem:[%s5624_s30 + $0xf8] sm:$0xff] }
  0x6f   : > { %v408_v1 = vpack.c.bf16 %v392_v63, %v391_v62  ;;  %v425_v8 = vld [vmem:[%s7079_s2] sm:$0x3]  ;;  %p5336_p13 = pneg %p5335_p8 }
  0x70   : > { %526 = vmatpush1.bf16.msra.mxu0 %v5209_v10  ;;  %v5692_v9 = vrot.slane %v425_v8, %v5686_v4  ;;  %v5694_v10 = vrot.slane %v425_v8, %v433_v5 }
  0x71   : > { %527 = vmatprep.subr.bf16.mxu0 %v5210_v11 }
  0x74   : > { %528 = vmatpush1.bf16.msra.mxu0 %v5212_v12 }
  0x75   : > { %529 = vmatprep.subr.bf16.mxu0 %v5213_v13 }
  0x78   : > { %530 = vmatpush1.bf16.msra.mxu0 %v5215_v14 }
  0x79   : > { %531 = vmatprep.subr.bf16.mxu0 %v5216_v15 }
  0x7c   : > { %532 = vmatpush1.bf16.msra.mxu0 %v5218_v16 }
  0x7f   : > { %550 = vmatmul.mubr.bf16.vlgmr.msra.gmra.mxu0 %v393_v19 }
  0x80   : > { %559 = vmatprep.mubr.bf16.mxu0 %v5429_v0 }
  0x87   : > { %560 = vmatmul.mubr.bf16.gmra.mxu0 %v394_v22 }
  0x88   : > { %569 = vmatprep.mubr.bf16.mxu0 %v5429_v0 }
  0x8f   : > { %570 = vmatmul.mubr.bf16.gmra.mxu0 %v395_v25 }
  0x90   : > { %579 = vmatprep.mubr.bf16.mxu0 %v5429_v0 }
  0x97   : > { %580 = vmatmul.mubr.bf16.gmra.mxu0 %v396_v28 }
  0x98   : > { %589 = vmatprep.mubr.bf16.mxu0 %v5429_v0 }
  0x9f   : > { %590 = vmatmul.mubr.bf16.gmra.mxu0 %v397_v31 }
  0xa0   : > { %599 = vmatprep.mubr.bf16.mxu0 %v5429_v0 }
  0xa7   : > { %600 = vmatmul.mubr.bf16.gmra.mxu0 %v398_v34 }
  0xa8   : > { %609 = vmatprep.mubr.bf16.mxu0 %v5429_v0 }
  0xaf   : > { %610 = vmatmul.mubr.bf16.gmra.mxu0 %v399_v37 }
  0xb0   : > { %619 = vmatprep.mubr.bf16.mxu0 %v5429_v0 }
  0xb7   : > { %620 = vmatmul.mubr.bf16.gmra.mxu0 %v400_v40 }
  0xb8   : > { %629 = vmatprep.mubr.bf16.mxu0 %v5429_v0 }
  0xbf   : > { %630 = vmatmul.mubr.bf16.gmra.mxu0 %v401_v43 }
  0xc0   : > { %639 = vmatprep.mubr.bf16.mxu0 %v5429_v0 }
  0xc7   : > { %640 = vmatmul.mubr.bf16.gmra.mxu0 %v402_v46 }
  0xc8   : > { %649 = vmatprep.mubr.bf16.mxu0 %v5429_v0 }
  0xcf   : > { %650 = vmatmul.mubr.bf16.gmra.mxu0 %v403_v49 }
  0xd0   : > { %659 = vmatprep.mubr.bf16.mxu0 %v5429_v0 }
  0xd7   : > { %660 = vmatmul.mubr.bf16.gmra.mxu0 %v404_v52 }
  0xd8   : > { %669 = vmatprep.mubr.bf16.mxu0 %v5429_v0 }
  0xdf   : > { %670 = vmatmul.mubr.bf16.gmra.mxu0 %v405_v55 }
  0xe0   : > { %679 = vmatprep.mubr.bf16.mxu0 %v5429_v0 }
  0xe7   : > { %680 = vmatmul.mubr.bf16.gmra.mxu0 %v406_v58 }
  0xe8   : > { %689 = vmatprep.mubr.bf16.mxu0 %v5429_v0 }
  0xef   : > { %690 = vmatmul.mubr.bf16.gmra.mxu0 %v407_v61 }
  0xf0   : > { %699 = vmatprep.mubr.bf16.mxu0 %v5429_v0  ;;  %v778_v0 = vunpack.c.0.s8 %v777_v7 }
  0xf2   : > { %v5698_v15 = vsub.s32 %v778_v0, %v428_v3 }
  0xf7   : > { %700 = vmatmul.mubr.bf16.gmra.mxu0 %v408_v1 }
 0x13f   : > { %v551_v11 = vpop.f32.mrf.mxu0 }
 0x140   : > { %v552_v13 = vadd.f32 %v551_v11, %v5692_v9 }
 0x141   : > { %v553_v12 = vpop.f32.mrf.mxu0 }
 0x142   : > { %v554_v14 = vadd.f32 %v553_v12, %v5694_v10 }
 0x143   : > { %v555_v16 = vpop.f32.mrf.mxu0 }
 0x144   : > { %v774_v17 = vcombine.low %v552_v13, %v554_v14  ;;  %v775_v18 = vcombine.high %v552_v13, %v554_v14  ;;  %v556_v23 = vadd.f32 %v555_v16, %v5692_v9 }
 0x145   : > { %v557_v19 = vpop.f32.mrf.mxu0 }
 0x146   : > { %v782_v20 = vrot.slane %v774_v17, %v5698_v15  ;;  %v789_v21 = vrot.slane %v775_v18, %v5698_v15  ;;  %v558_v22 = vadd.f32 %v557_v19, %v5694_v10 }
 0x147   : > { %v561_v24 = vpop.f32.mrf.mxu0 }
 0x148   : > { %v790_v25 = vcombine.high %v782_v20, %v782_v20  ;;  %v791_v26 = vcombine.high %v789_v21, %v789_v21  ;;  %v792_v27 = vcombine.low %v556_v23, %v558_v22  ;;  %v793_v28 = vcombine.high %v556_v23, %v558_v22 }
 0x149   : > { %v563_v29 = vpop.f32.mrf.mxu0  ;;  %v4527_v30 = vrot.slane %v782_v20, 9  ;;  %v4529_v31 = vrot.slane %v789_v21, 9  ;;  %v562_v38 = vadd.f32 %v561_v24, %v5692_v9 }
 0x14a   : > { %v4528_v32 = vrot.slane %v790_v25, 9  ;;  %v800_v33 = vrot.slane %v792_v27, %v5698_v15  ;;  %v807_v34 = vrot.slane %v793_v28, %v5698_v15  ;;  %v564_v35 = vadd.f32 %v563_v29, %v5694_v10 }
 0x14b   : > { %v565_v36 = vpop.f32.mrf.mxu0  ;;  %v4530_v37 = vrot.slane %v791_v26, 9  ;;  %v1670_v49 = vmax.f32 %v782_v20, %v4527_v30  ;;  %v1672_v51 = vmax.f32 %v789_v21, %v4529_v31 }
 0x14c   : > { %v808_v40 = vcombine.high %v800_v33, %v800_v33  ;;  %v809_v41 = vcombine.high %v807_v34, %v807_v34  ;;  %v4531_v42 = vrot.slane %v800_v33, 9  ;;  %v4533_v43 = vrot.slane %v807_v34, 9 }
 0x14d   : > { %v567_v44 = vpop.f32.mrf.mxu0  ;;  %v810_v45 = vcombine.low %v562_v38, %v564_v35  ;;  %v811_v46 = vcombine.high %v562_v38, %v564_v35  ;;  %v566_v47 = vadd.f32 %v565_v36, %v5692_v9  ;;  %v1671_v50 = vmax.f32 %v790_v25, %v4528_v32 }
 0x14e   : > { %v568_v48 = vadd.f32 %v567_v44, %v5694_v10  ;;  %v4532_v52 = vrot.slane %v808_v40, 9  ;;  %v1673_v58 = vmax.f32 %v791_v26, %v4530_v37  ;;  %v4534_v59 = vrot.slane %v809_v41, 9 }
 0x14f   : > { %v571_v53 = vpop.f32.mrf.mxu0  ;;  %v818_v54 = vrot.slane %v810_v45, %v5698_v15  ;;  %v825_v55 = vrot.slane %v811_v46, %v5698_v15  ;;  %v1674_v60 = vmax.f32 %v800_v33, %v4531_v42  ;;  %v1676_v61 = vmax.f32 %v807_v34, %v4533_v43 }
 0x150   : > { %v828_v56 = vcombine.low %v566_v47, %v568_v48  ;;  %v829_v57 = vcombine.high %v566_v47, %v568_v48  ;;  %v1675_v5 = vmax.f32 %v808_v40, %v4532_v52  ;;  %v5717_v8 = vadd.f32 %v571_v53, %v5692_v9 }
 0x151   : > { %v573_v62 = vpop.f32.mrf.mxu0  ;;  %v826_v63 = vcombine.high %v818_v54, %v818_v54  ;;  %v827_v1 = vcombine.high %v825_v55, %v825_v55  ;;  %v4591_v2 = vrot.slane %v818_v54, 9  ;;  %v4593_v3 = vrot.slane %v825_v55, 9 }
 0x152   : > { %v836_v6 = vrot.slane %v828_v56, %v5698_v15  ;;  %v843_v7 = vrot.slane %v829_v57, %v5698_v15  ;;  %v5721_v20 = vmax.f32 %v809_v41, %v4534_v59  ;;  %v574_v28 = vadd.f32 %v573_v62, %v5694_v10 }
 0x153   : > { %v5719_v0 = vpop.f32.mrf.mxu0  ;;  %v4592_v11 = vrot.slane %v826_v63, 9  ;;  %v4594_v12 = vrot.slane %v827_v1, 9  ;;  %v1926_v13 = vmax.f32 %v818_v54, %v4591_v2  ;;  %v1928_v14 = vmax.f32 %v825_v55, %v4593_v3 }
 0x154   : > { %v844_v16 = vcombine.high %v836_v6, %v836_v6  ;;  %v4595_v17 = vrot.slane %v836_v6, 9  ;;  %v4597_v18 = vrot.slane %v843_v7, 9  ;;  %v5723_v25 = vcombine.high %v843_v7, %v843_v7 }
 0x155   : > { %v577_v19 = vpop.f32.mrf.mxu0  ;;  %v1927_v21 = vmax.f32 %v826_v63, %v4592_v11  ;;  %v1929_v22 = vmax.f32 %v827_v1, %v4594_v12  ;;  %v1990_v23 = vmax.f32 %v1670_v49, %v1926_v13  ;;  %v1992_v24 = vmax.f32 %v1672_v51, %v1928_v14 }
 0x156   : > { %v4596_v26 = vrot.slane %v844_v16, 9  ;;  %v1930_v27 = vmax.f32 %v836_v6, %v4595_v17  ;;  %v1932_v37 = vmax.f32 %v843_v7, %v4597_v18  ;;  %v576_v17 = vadd.f32 %v5719_v0, %v5692_v9 }
 0x157   : > { %v581_v29 = vpop.f32.mrf.mxu0  ;;  %v1991_v30 = vmax.f32 %v1671_v50, %v1927_v21  ;;  %v1993_v31 = vmax.f32 %v1673_v58, %v1929_v22  ;;  %v2121_v32 = vrot.slane %v1990_v23, %v5686_v4  ;;  %v2125_v33 = vrot.slane %v1990_v23, %v5708_v39 }
 0x158   : > { %v2137_v34 = vrot.slane %v1992_v24, %v5686_v4  ;;  %v2141_v35 = vrot.slane %v1992_v24, %v5708_v39  ;;  %v1931_v36 = vmax.f32 %v844_v16, %v4596_v26  ;;  %v1994_v43 = vmax.f32 %v1674_v60, %v1930_v27 }
 0x159   : > { %v583_v38 = vpop.f32.mrf.mxu0  ;;  %v2129_v40 = vrot.slane %v1991_v30, %v5686_v4  ;;  %v2133_v41 = vrot.slane %v1991_v30, %v5708_v39  ;;  %v2149_v42 = vrot.slane %v1993_v31, %v5708_v39  ;;  %v2758_v44 = vpack.c.bf16 %v2121_v32, %v2121_v32 }
 0x15a   : > { %v2759_v45 = vpack.c.bf16 %v2125_v33, %v2125_v33  ;;  %v2762_v46 = vpack.c.bf16 %v2137_v34, %v2137_v34  ;;  %v2763_v47 = vpack.c.bf16 %v2141_v35, %v2141_v35  ;;  %v5735_v53 = vrot.slane %v1993_v31, %v5686_v4 }
 0x15b   : > { %v585_v48 = vpop.f32.mrf.mxu0  ;;  %v2760_v49 = vpack.c.bf16 %v2129_v40, %v2129_v40  ;;  %v2761_v50 = vpack.c.bf16 %v2133_v41, %v2133_v41  ;;  %v2765_v51 = vpack.c.bf16 %v2149_v42, %v2149_v42  ;;  %v5741_v56 = vmax.f32 %v1675_v5, %v1931_v36 }
 0x15c   : > { %v5737_v54 = vunpack.c.l.b16 %v2762_v46  ;;  %v5739_v55 = vunpack.c.l.b16 %v2763_v47  ;;  %v5745_v58 = vunpack.c.l.b16 %v2758_v44  ;;  %v5754_v1 = vunpack.c.l.b16 %v2759_v45 }
 0x15d   : > { %v5743_v57 = vpop.f32.mrf.mxu0  ;;  %v5747_v59 = vunpack.c.l.b16 %v2760_v49  ;;  %v5749_v60 = vunpack.c.l.b16 %v2761_v50  ;;  %v5751_v62 = vunpack.c.l.b16 %v2765_v51  ;;  %v5756_v2 = vmax.f32 %v1676_v61, %v1932_v37 }
 0x15e   : > { %7132 = vst [vmem:[#allocation17_spill] sm:$0xff] %v5739_v55  ;;  %7135 = vst [vmem:[#allocation20_spill] sm:$0xff] %v5754_v1  ;;  %v2157_v3 = vrot.slane %v1994_v43, %v5708_v39  ;;  %v5765_v12 = vrot.slane %v1994_v43, %v5686_v4  ;;  %v846_v16 = vcombine.low %v5717_v8, %v574_v28 }
 0x15f   : > { %7133 = vst [vmem:[#allocation18_spill] sm:$0xff] %v5749_v60  ;;  %7134 = vst [vmem:[#allocation19_spill] sm:$0xff] %v5751_v62  ;;  %v5759_v5 = vpop.f32.mrf.mxu0  ;;  %v847_v61 = vcombine.high %v5717_v8, %v574_v28  ;;  %v578_v18 = vadd.f32 %v577_v19, %v5694_v10  ;;  %v582_v21 = vadd.f32 %v581_v29, %v5692_v9 }
 0x160   : > { %v2767_v14 = vpack.c.bf16 %v2157_v3, %v2157_v3  ;;  %v584_v22 = vadd.f32 %v583_v38, %v5694_v10  ;;  %v5777_v23 = vrot.slane %v5741_v56, %v5708_v39  ;;  %v854_v26 = vrot.slane %v846_v16, %v5698_v15 }
 0x161   : > { %v861_v27 = vrot.slane %v847_v61, %v5698_v15  ;;  %v593_v8 = vpop.f32.mrf.mxu0  ;;  %v864_v28 = vcombine.low %v576_v17, %v578_v18  ;;  %v865_v30 = vcombine.high %v576_v17, %v578_v18  ;;  %v5785_v19 = vrot.slane %v5756_v2, %v5708_v39 }
 0x162   : > { %7136 = vst [vmem:[#allocation21_spill] sm:$0xff] %v5777_v23  ;;  %v5779_v24 = vunpack.c.l.b16 %v2767_v14  ;;  %v882_v0 = vcombine.low %v582_v21, %v584_v22  ;;  %v883_v31 = vcombine.high %v582_v21, %v584_v22  ;;  %v862_v29 = vcombine.high %v854_v26, %v854_v26 }
 0x163   : > { %7138 = vst [vmem:[#allocation23_spill] sm:$0xff] %v5785_v19  ;;  %v863_v32 = vcombine.high %v861_v27, %v861_v27  ;;  %v4535_v33 = vrot.slane %v854_v26, 9  ;;  %v4537_v34 = vrot.slane %v861_v27, 9  ;;  %v872_v35 = vrot.slane %v864_v28, %v5698_v15  ;;  %v595_v43 = vpop.f32.mrf.mxu0 }
 0x164   : > { %7137 = vst [vmem:[#allocation22_spill] sm:$0xff] %v5779_v24  ;;  %v879_v36 = vrot.slane %v865_v30, %v5698_v15  ;;  %v890_v37 = vrot.slane %v882_v0, %v5698_v15  ;;  %v4536_v38 = vrot.slane %v862_v29, 9  ;;  %v897_v41 = vrot.slane %v883_v31, %v5698_v15 }
 0x165   : > { %v4538_v40 = vrot.slane %v863_v32, 9  ;;  %v586_v42 = vadd.f32 %v585_v48, %v5692_v9  ;;  %v880_v45 = vcombine.high %v872_v35, %v872_v35  ;;  %v4539_v47 = vrot.slane %v872_v35, 9  ;;  %v5796_v28 = vpop.f32.mrf.mxu0 }
 0x166   : > { %v5793_v46 = vcombine.high %v879_v36, %v879_v36  ;;  %v1678_v49 = vmax.f32 %v854_v26, %v4535_v33  ;;  %v1680_v50 = vmax.f32 %v861_v27, %v4537_v34  ;;  %v4541_v51 = vrot.slane %v879_v36, 9 }
 0x167   : > { %v898_v3 = vcombine.high %v890_v37, %v890_v37  ;;  %v1679_v14 = vmax.f32 %v862_v29, %v4536_v38  ;;  %v1681_v16 = vmax.f32 %v863_v32, %v4538_v40  ;;  %v4540_v61 = vrot.slane %v880_v45, 9 }
 0x168   : > { %v899_v17 = vcombine.high %v897_v41, %v897_v41  ;;  %v4599_v21 = vrot.slane %v890_v37, 9  ;;  %v4601_v48 = vrot.slane %v897_v41, 9  ;;  %v5798_v30 = vmax.f32 %v872_v35, %v4539_v47 }
 0x169   : > { %v4600_v22 = vrot.slane %v898_v3, 9  ;;  %v5800_v0 = vmax.f32 %v879_v36, %v4541_v51  ;;  %v588_v26 = vadd.f32 %v5743_v57, %v5694_v10  ;;  %v594_v33 = vadd.f32 %v593_v8, %v5694_v10  ;;  %v601_v51 = vpop.f32.mrf.mxu0 }
 0x16a   : > { %v4602_v31 = vrot.slane %v899_v17, 9  ;;  %v1934_v27 = vmax.f32 %v890_v37, %v4599_v21  ;;  %v1936_v32 = vmax.f32 %v897_v41, %v4601_v48  ;;  %v592_v44 = vadd.f32 %v5759_v5, %v5692_v9 }
 0x16b   : > { %v1935_v29 = vmax.f32 %v898_v3, %v4600_v22  ;;  %v900_v38 = vcombine.low %v586_v42, %v588_v26  ;;  %v901_v40 = vcombine.high %v586_v42, %v588_v26  ;;  %v1683_v13 = vmax.f32 %v880_v45, %v4540_v61 }
 0x16c   : > { %v1937_v34 = vmax.f32 %v899_v17, %v4602_v31  ;;  %v1998_v35 = vmax.f32 %v1678_v49, %v1934_v27  ;;  %v2000_v36 = vmax.f32 %v1680_v50, %v1936_v32  ;;  %v918_v57 = vcombine.low %v592_v44, %v594_v33  ;;  %v603_v17 = vpop.f32.mrf.mxu0 }
 0x16d   : > { %v1999_v47 = vmax.f32 %v1679_v14, %v1935_v29  ;;  %v908_v7 = vrot.slane %v900_v38, %v5698_v15  ;;  %v5809_v37 = vadd.f32 %v595_v43, %v5692_v9  ;;  %v915_v3 = vrot.slane %v901_v40, %v5698_v15 }
 0x16e   : > { %v2001_v11 = vmax.f32 %v1681_v16, %v1937_v34  ;;  %v2185_v8 = vrot.slane %v1998_v35, %v5686_v4  ;;  %v2189_v41 = vrot.slane %v1998_v35, %v5708_v39  ;;  %v2201_v45 = vrot.slane %v2000_v36, %v5686_v4 }
 0x16f   : > { %v2193_v42 = vrot.slane %v1999_v47, %v5686_v4  ;;  %v2197_v5 = vrot.slane %v1999_v47, %v5708_v39  ;;  %v2205_v49 = vrot.slane %v2000_v36, %v5708_v39  ;;  %v916_v31 = vcombine.high %v908_v7, %v908_v7 }
 0x170   : > { %v2213_v50 = vrot.slane %v2001_v11, %v5708_v39  ;;  %v2774_v14 = vpack.c.bf16 %v2185_v8, %v2185_v8  ;;  %v2775_v16 = vpack.c.bf16 %v2189_v41, %v2189_v41  ;;  %v2778_v21 = vpack.c.bf16 %v2201_v45, %v2201_v45  ;;  %v605_v41 = vpop.f32.mrf.mxu0 }
 0x171   : > { %v2776_v43 = vpack.c.bf16 %v2193_v42, %v2193_v42  ;;  %v2777_v61 = vpack.c.bf16 %v2197_v5, %v2197_v5  ;;  %v2779_v22 = vpack.c.bf16 %v2205_v49, %v2205_v49  ;;  %v5820_v26 = vrot.slane %v2001_v11, %v5686_v4 }
 0x172   : > { %v2781_v48 = vpack.c.bf16 %v2213_v50, %v2213_v50  ;;  %v919_v32 = vcombine.high %v592_v44, %v594_v33  ;;  %v5826_v34 = vunpack.c.l.b16 %v2774_v14  ;;  %v5828_v38 = vunpack.c.l.b16 %v2778_v21  ;;  %v607_v42 = vpop.f32.mrf.mxu0 }
 0x173   : > { %v5822_v27 = vunpack.c.l.b16 %v2776_v43  ;;  %v5824_v29 = vunpack.c.l.b16 %v2777_v61  ;;  %v5830_v40 = vunpack.c.l.b16 %v2779_v22  ;;  %v5832_v35 = vcombine.high %v915_v3, %v915_v3 }
 0x174   : > { %v5834_v47 = vunpack.c.l.b16 %v2775_v16  ;;  %v5836_v36 = vunpack.c.l.b16 %v2781_v48  ;;  %v4603_v8 = vrot.slane %v908_v7, 9  ;;  %v4604_v11 = vrot.slane %v916_v31, 9 }
 0x175   : > { %7139 = vst [vmem:[#allocation24_spill] sm:$0xff] %v5824_v29  ;;  %7140 = vst [vmem:[#allocation25_spill] sm:$0xff] %v5830_v40  ;;  %v4605_v33 = vrot.slane %v915_v3, 9  ;;  %v926_v14 = vrot.slane %v918_v57, %v5698_v15  ;;  %v933_v61 = vrot.slane %v919_v32, %v5698_v15  ;;  %v598_v21 = vadd.f32 %v5796_v28, %v5694_v10 }
 0x176   : > { %7141 = vst [vmem:[#allocation26_spill] sm:$0xff] %v5834_v47  ;;  %7142 = vst [vmem:[#allocation27_spill] sm:$0xff] %v5836_v36  ;;  %v1938_v49 = vmax.f32 %v908_v7, %v4603_v8  ;;  %v1939_v50 = vmax.f32 %v916_v31, %v4604_v11  ;;  %v606_v6 = vadd.f32 %v605_v41, %v5692_v9 }
 0x177   : > { %v1940_v43 = vmax.f32 %v915_v3, %v4605_v33  ;;  %v934_v44 = vcombine.high %v926_v14, %v926_v14  ;;  %v4543_v5 = vrot.slane %v926_v14, 9  ;;  %v935_v31 = vcombine.high %v933_v61, %v933_v61 }
 0x178   : > { %v2002_v22 = vmax.f32 %v5798_v30, %v1938_v49  ;;  %v5848_v48 = vmax.f32 %v1683_v13, %v1939_v50  ;;  %v4545_v57 = vrot.slane %v933_v61, 9  ;;  %v936_v8 = vcombine.low %v5809_v37, %v598_v21 }
 0x179   : > { %v5851_v7 = vmax.f32 %v5800_v0, %v1940_v43  ;;  %v4544_v28 = vrot.slane %v934_v44, 9  ;;  %v602_v30 = vadd.f32 %v601_v51, %v5692_v9  ;;  %v4546_v11 = vrot.slane %v935_v31, 9 }
 0x17a   : > { %v5855_v3 = vrot.slane %v2002_v22, %v5686_v4  ;;  %v2221_v32 = vrot.slane %v2002_v22, %v5708_v39  ;;  %v5861_v13 = vrot.slane %v5848_v48, %v5708_v39  ;;  %v1686_v33 = vmax.f32 %v926_v14, %v4543_v5  ;;  %v5869_v22 = vpop.f32.mrf.mxu0 }
 0x17b   : > { %v5865_v0 = vrot.slane %v5851_v7, %v5708_v39  ;;  %v1688_v50 = vmax.f32 %v933_v61, %v4545_v57  ;;  %v937_v43 = vcombine.high %v5809_v37, %v598_v21  ;;  %v944_v45 = vrot.slane %v936_v8, %v5698_v15 }
 0x17c   : > { %7143 = vst [vmem:[#allocation28_spill] sm:$0xff] %v5861_v13  ;;  %v2783_v49 = vpack.c.bf16 %v2221_v32, %v2221_v32  ;;  %v1687_v63 = vmax.f32 %v934_v44, %v4544_v28  ;;  %v604_v51 = vadd.f32 %v603_v17, %v5694_v10  ;;  %v608_v16 = vadd.f32 %v607_v42, %v5694_v10  ;;  %v5877_v28 = vpop.f32.mrf.mxu0 }
 0x17d   : > { %7144 = vst [vmem:[#allocation29_spill] sm:$0xff] %v5865_v0  ;;  %v1689_v52 = vmax.f32 %v935_v31, %v4546_v11  ;;  %v951_v18 = vrot.slane %v937_v43, %v5698_v15  ;;  %v952_v24 = vcombine.high %v944_v45, %v944_v45  ;;  %v4547_v5 = vrot.slane %v944_v45, 9 }
 0x17e   : > { %v954_v14 = vcombine.low %v602_v30, %v604_v51  ;;  %v955_v61 = vcombine.high %v602_v30, %v604_v51  ;;  %v972_v57 = vcombine.low %v606_v6, %v608_v16  ;;  %v973_v37 = vcombine.high %v606_v6, %v608_v16 }
 0x17f   : > { %v5875_v21 = vunpack.c.l.b16 %v2783_v49  ;;  %v953_v8 = vcombine.high %v951_v18, %v951_v18  ;;  %v4548_v32 = vrot.slane %v952_v24, 9  ;;  %v4549_v44 = vrot.slane %v951_v18, 9 }
 0x180   : > { %v1690_v17 = vmax.f32 %v944_v45, %v4547_v5  ;;  %v962_v41 = vrot.slane %v954_v14, %v5698_v15  ;;  %v969_v42 = vrot.slane %v955_v61, %v5698_v15  ;;  %v980_v31 = vrot.slane %v972_v57, %v5698_v15  ;;  %v615_v5 = vpop.f32.mrf.mxu0 }
 0x181   : > { %7145 = vst [vmem:[#allocation30_spill] sm:$0xff] %v5875_v21  ;;  %v4550_v11 = vrot.slane %v953_v8, 9  ;;  %v1691_v43 = vmax.f32 %v952_v24, %v4548_v32  ;;  %v1692_v40 = vmax.f32 %v951_v18, %v4549_v44  ;;  %v987_v30 = vrot.slane %v973_v37, %v5698_v15 }
 0x182   : > { %v970_v6 = vcombine.high %v962_v41, %v962_v41  ;;  %v971_v16 = vcombine.high %v969_v42, %v969_v42  ;;  %v4607_v49 = vrot.slane %v962_v41, 9  ;;  %v4609_v51 = vrot.slane %v969_v42, 9  ;;  %v617_v36 = vpop.f32.mrf.mxu0 }
 0x183   : > { %v5883_v62 = vmax.f32 %v953_v8, %v4550_v11  ;;  %v988_v29 = vcombine.high %v980_v31, %v980_v31  ;;  %v989_v47 = vcombine.high %v987_v30, %v987_v30  ;;  %v4611_v45 = vrot.slane %v980_v31, 9 }
 0x184   : > { %v4608_v14 = vrot.slane %v970_v6, 9  ;;  %v4610_v55 = vrot.slane %v971_v16, 9  ;;  %v1942_v61 = vmax.f32 %v962_v41, %v4607_v49  ;;  %v1944_v60 = vmax.f32 %v969_v42, %v4609_v51 }
 0x185   : > { %7146 = vst [vmem:[#allocation31_spill] sm:$0xff] %v5883_v62  ;;  %v4612_v57 = vrot.slane %v988_v29, 9  ;;  %v4613_v1 = vrot.slane %v987_v30, 9  ;;  %v4614_v24 = vrot.slane %v989_v47, 9  ;;  %v1946_v18 = vmax.f32 %v980_v31, %v4611_v45 }
 0x186   : > { %v1943_v32 = vmax.f32 %v970_v6, %v4608_v14  ;;  %v1945_v37 = vmax.f32 %v971_v16, %v4610_v55  ;;  %v2006_v44 = vmax.f32 %v1686_v33, %v1942_v61  ;;  %v2008_v21 = vmax.f32 %v1688_v50, %v1944_v60 }
 0x187   : > { %v1947_v0 = vmax.f32 %v988_v29, %v4612_v57  ;;  %v1948_v13 = vmax.f32 %v987_v30, %v4613_v1  ;;  %v5885_v8 = vmax.f32 %v989_v47, %v4614_v24  ;;  %v2010_v11 = vmax.f32 %v1690_v17, %v1946_v18  ;;  %v621_v17 = vpop.f32.mrf.mxu0 }
 0x188   : > { %v2007_v19 = vmax.f32 %v1687_v63, %v1943_v32  ;;  %v2009_v23 = vmax.f32 %v1689_v52, %v1945_v37  ;;  %v2249_v62 = vrot.slane %v2006_v44, %v5686_v4  ;;  %v2253_v41 = vrot.slane %v2006_v44, %v5708_v39 }
 0x189   : > { %v2265_v42 = vrot.slane %v2008_v21, %v5686_v4  ;;  %v2269_v31 = vrot.slane %v2008_v21, %v5708_v39  ;;  %v5891_v6 = vmax.f32 %v1691_v43, %v1947_v0  ;;  %v5893_v55 = vmax.f32 %v1692_v40, %v1948_v13  ;;  %v623_v24 = vpop.f32.mrf.mxu0 }
 0x18a   : > { %v2257_v60 = vrot.slane %v2007_v19, %v5686_v4  ;;  %v2261_v1 = vrot.slane %v2007_v19, %v5708_v39  ;;  %v2273_v29 = vrot.slane %v2009_v23, %v5686_v4  ;;  %v2277_v52 = vrot.slane %v2009_v23, %v5708_v39 }
 0x18b   : > { %v2790_v63 = vpack.c.bf16 %v2249_v62, %v2249_v62  ;;  %v2791_v47 = vpack.c.bf16 %v2253_v41, %v2253_v41  ;;  %v2794_v33 = vpack.c.bf16 %v2265_v42, %v2265_v42  ;;  %v2795_v50 = vpack.c.bf16 %v2269_v31, %v2269_v31 }
 0x18c   : > { %v2792_v30 = vpack.c.bf16 %v2257_v60, %v2257_v60  ;;  %v2793_v16 = vpack.c.bf16 %v2261_v1, %v2261_v1  ;;  %v2796_v21 = vpack.c.bf16 %v2273_v29, %v2273_v29  ;;  %v2797_v0 = vpack.c.bf16 %v2277_v52, %v2277_v52 }
 0x18d   : > { %v5899_v43 = vunpack.c.l.b16 %v2790_v63  ;;  %v5901_v40 = vunpack.c.l.b16 %v2794_v33  ;;  %v5903_v13 = vunpack.c.l.b16 %v2791_v47  ;;  %v5905_v19 = vunpack.c.l.b16 %v2795_v50 }
 0x18e   : > { %v5907_v49 = vunpack.c.l.b16 %v2792_v30  ;;  %v5909_v23 = vunpack.c.l.b16 %v2796_v21  ;;  %v5911_v62 = vunpack.c.l.b16 %v2793_v16  ;;  %v5913_v51 = vunpack.c.l.b16 %v2797_v0 }
 0x18f   : > { %7147 = vst [vmem:[#allocation32_spill] sm:$0xff] %v5903_v13  ;;  %7148 = vst [vmem:[#allocation33_spill] sm:$0xff] %v5905_v19  ;;  %v2281_v61 = vrot.slane %v2010_v11, %v5686_v4  ;;  %v2285_v57 = vrot.slane %v2010_v11, %v5708_v39  ;;  %v5924_v44 = vrot.slane %v5891_v6, %v5708_v39  ;;  %v7154_v50 = vrot.slane %v5793_v46, 9 }
 0x190   : > { %7149 = vst [vmem:[#allocation34_spill] sm:$0xff] %v5911_v62  ;;  %7150 = vst [vmem:[#allocation35_spill] sm:$0xff] %v5913_v51  ;;  %v5928_v41 = vrot.slane %v5893_v55, %v5708_v39  ;;  %v612_v11 = vadd.f32 %v5869_v22, %v5692_v9  ;;  %v614_v60 = vadd.f32 %v5877_v28, %v5694_v10  ;;  %v5945_v22 = vpop.f32.mrf.mxu0 }
 0x191   : > { %7151 = vst [vmem:[#allocation36_spill] sm:$0xff] %v5924_v44  ;;  %v2798_v42 = vpack.c.bf16 %v2281_v61, %v2281_v61  ;;  %v2799_v31 = vpack.c.bf16 %v2285_v57, %v2285_v57  ;;  %v616_v1 = vadd.f32 %v615_v5, %v5692_v9  ;;  %v618_v29 = vadd.f32 %v617_v36, %v5694_v10 }
 0x192   : > { %7152 = vst [vmem:[#allocation37_spill] sm:$0xff] %v5928_v41  ;;  %v622_v52 = vadd.f32 %v621_v17, %v5692_v9  ;;  %v624_v33 = vadd.f32 %v623_v24, %v5694_v10  ;;  %v1685_v30 = vmax.f32 %v5793_v46, %v7154_v50  ;;  %v990_v16 = vcombine.low %v612_v11, %v614_v60 }
 0x193   : > { %v5937_v63 = vunpack.c.l.b16 %v2798_v42  ;;  %v5939_v47 = vunpack.c.l.b16 %v2799_v31  ;;  %v991_v28 = vcombine.high %v612_v11, %v614_v60  ;;  %v1008_v21 = vcombine.low %v616_v1, %v618_v29 }
 0x194   : > { %v1009_v5 = vcombine.high %v616_v1, %v618_v29  ;;  %v1026_v0 = vcombine.low %v622_v52, %v624_v33  ;;  %v1027_v17 = vcombine.high %v622_v52, %v624_v33  ;;  %v7155_v61 = vrot.slane %v5723_v25, 9 }
 0x195   : > { %7153 = vst [vmem:[#allocation38_spill] sm:$0xff] %v5939_v47  ;;  %v998_v24 = vrot.slane %v990_v16, %v5698_v15  ;;  %v1005_v42 = vrot.slane %v991_v28, %v5698_v15  ;;  %v1016_v46 = vrot.slane %v1008_v21, %v5698_v15  ;;  %v7156_v1 = vrot.slane %v5832_v35, 9 }
 0x196   : > { %v1933_v57 = vmax.f32 %v5723_v25, %v7155_v61  ;;  %v1023_v31 = vrot.slane %v1009_v5, %v5698_v15  ;;  %v1034_v11 = vrot.slane %v1026_v0, %v5698_v15  ;;  %v1041_v60 = vrot.slane %v1027_v17, %v5698_v15  ;;  %v5963_v25 = vpop.f32.mrf.mxu0 }
 0x197   : > { %v1941_v29 = vmax.f32 %v5832_v35, %v7156_v1  ;;  %v1006_v33 = vcombine.high %v998_v24, %v998_v24  ;;  %v1007_v50 = vcombine.high %v1005_v42, %v1005_v42  ;;  %v4551_v16 = vrot.slane %v998_v24, 9 }
 0x198   : > { %v5961_v52 = vmax.f32 %v5721_v20, %v1933_v57  ;;  %v4553_v28 = vrot.slane %v1005_v42, 9  ;;  %v1024_v21 = vcombine.high %v1016_v46, %v1016_v46  ;;  %v1025_v61 = vcombine.high %v1023_v31, %v1023_v31  ;;  %v5969_v57 = vpop.f32.mrf.mxu0 }
 0x199   : > { %v4555_v5 = vrot.slane %v1016_v46, 9  ;;  %v4557_v36 = vrot.slane %v1023_v31, 9  ;;  %v4552_v0 = vrot.slane %v1006_v33, 9  ;;  %v4554_v37 = vrot.slane %v1007_v50, 9 }
 0x19a   : > { %7157 = vst [vmem:[#allocation39_spill] sm:$0xff] %v5961_v52  ;;  %v1694_v17 = vmax.f32 %v998_v24, %v4551_v16  ;;  %v1696_v14 = vmax.f32 %v1005_v42, %v4553_v28  ;;  %v4556_v32 = vrot.slane %v1024_v21, 9  ;;  %v4558_v45 = vrot.slane %v1025_v61, 9 }
 0x19b   : > { %v5965_v35 = vmax.f32 %v1016_v46, %v4555_v5  ;;  %v5967_v20 = vmax.f32 %v1023_v31, %v4557_v36  ;;  %v1695_v1 = vmax.f32 %v1006_v33, %v4552_v0  ;;  %v1697_v18 = vmax.f32 %v1007_v50, %v4554_v37 }
 0x19c   : > { %v1042_v47 = vcombine.high %v1034_v11, %v1034_v11  ;;  %v1043_v51 = vcombine.high %v1041_v60, %v1041_v60  ;;  %v5971_v19 = vmax.f32 %v1024_v21, %v4556_v32  ;;  %v5973_v62 = vmax.f32 %v1025_v61, %v4558_v45  ;;  %v5989_v32 = vpop.f32.mrf.mxu0 }
 0x19d   : > { %v4615_v13 = vrot.slane %v1034_v11, 9  ;;  %v4617_v41 = vrot.slane %v1041_v60, 9  ;;  %v5975_v16 = vmax.f32 %v1685_v30, %v1941_v29  ;;  %v5979_v36 = vrot.slane %v5741_v56, %v5686_v4 }
 0x19e   : > { %v4616_v24 = vrot.slane %v1042_v47, 9  ;;  %v4618_v42 = vrot.slane %v1043_v51, 9  ;;  %v5983_v37 = vrot.slane %v5756_v2, %v5686_v4  ;;  %v5987_v45 = vrot.slane %v5961_v52, %v5686_v4  ;;  %v6011_v21 = vpop.f32.mrf.mxu0 }
 0x19f   : > { %7158 = vst [vmem:[#allocation40_spill] sm:$0xff] %v5975_v16  ;;  %v1950_v46 = vmax.f32 %v1034_v11, %v4615_v13  ;;  %v1952_v31 = vmax.f32 %v1041_v60, %v4617_v41  ;;  %v5993_v30 = vrot.slane %v5848_v48, %v5686_v4  ;;  %v5997_v56 = vrot.slane %v5851_v7, %v5686_v4 }
 0x1a0   : > { %v1951_v33 = vmax.f32 %v1042_v47, %v4616_v24  ;;  %v1953_v50 = vmax.f32 %v1043_v51, %v4618_v42  ;;  %v2241_v2 = vrot.slane %v5975_v16, %v5686_v4  ;;  %v2764_v11 = vpack.c.bf16 %v5735_v53, %v5735_v53 }
 0x1a1   : > { %v2014_v13 = vmax.f32 %v1694_v17, %v1950_v46  ;;  %v2016_v41 = vmax.f32 %v1696_v14, %v1952_v31  ;;  %v2766_v51 = vpack.c.bf16 %v5765_v12, %v5765_v12  ;;  %v2768_v48 = vpack.c.bf16 %v5979_v36, %v5979_v36 }
 0x1a2   : > { %v2015_v60 = vmax.f32 %v1695_v1, %v1951_v33  ;;  %v2017_v29 = vmax.f32 %v1697_v18, %v1953_v50 }
 0x1a3   : > { %v2313_v47 = vrot.slane %v2014_v13, %v5686_v4  ;;  %v2317_v7 = vrot.slane %v2014_v13, %v5708_v39  ;;  %v2329_v14 = vrot.slane %v2016_v41, %v5686_v4  ;;  %v2333_v28 = vrot.slane %v2016_v41, %v5708_v39  ;;  %v6025_v41 = vpop.f32.mrf.mxu0 }
 0x1a4   : > { %v2321_v53 = vrot.slane %v2015_v60, %v5686_v4  ;;  %v2325_v18 = vrot.slane %v2015_v60, %v5708_v39  ;;  %v2337_v12 = vrot.slane %v2017_v29, %v5686_v4  ;;  %v2341_v61 = vrot.slane %v2017_v29, %v5708_v39 }
 0x1a5   : > { %v2806_v5 = vpack.c.bf16 %v2313_v47, %v2313_v47  ;;  %v2807_v0 = vpack.c.bf16 %v2317_v7, %v2317_v7  ;;  %v2810_v17 = vpack.c.bf16 %v2329_v14, %v2329_v14  ;;  %v2811_v1 = vpack.c.bf16 %v2333_v28, %v2333_v28 }
 0x1a6   : > { %v2808_v24 = vpack.c.bf16 %v2321_v53, %v2321_v53  ;;  %v2809_v42 = vpack.c.bf16 %v2325_v18, %v2325_v18  ;;  %v2812_v36 = vpack.c.bf16 %v2337_v12, %v2337_v12  ;;  %v2813_v46 = vpack.c.bf16 %v2341_v61, %v2341_v61 }
 0x1a7   : > { %v6017_v31 = vunpack.c.l.b16 %v2806_v5  ;;  %v6019_v33 = vunpack.c.l.b16 %v2810_v17  ;;  %v6021_v50 = vunpack.c.l.b16 %v2807_v0  ;;  %v6023_v13 = vunpack.c.l.b16 %v2811_v1 }
 0x1a8   : > { %v6027_v60 = vunpack.c.l.b16 %v2808_v24  ;;  %v6029_v29 = vunpack.c.l.b16 %v2812_v36  ;;  %v6031_v47 = vunpack.c.l.b16 %v2809_v42  ;;  %v6033_v7 = vunpack.c.l.b16 %v2813_v46  ;;  %v641_v24 = vpop.f32.mrf.mxu0 }
 0x1a9   : > { %7159 = vst [vmem:[#allocation41_spill] sm:$0xff] %v6021_v50  ;;  %7160 = vst [vmem:[#allocation42_spill] sm:$0xff] %v6023_v13  ;;  %v2770_v53 = vpack.c.bf16 %v5983_v37, %v5983_v37  ;;  %v2772_v18 = vpack.c.bf16 %v5987_v45, %v5987_v45  ;;  %v2780_v0 = vpack.c.bf16 %v5820_v26, %v5820_v26  ;;  %v2953_v42 = vunpack.c.l.b16 %v2764_v11 }
 0x1aa   : > { %7161 = vst [vmem:[#allocation43_spill] sm:$0xff] %v6031_v47  ;;  %7162 = vst [vmem:[#allocation44_spill] sm:$0xff] %v6033_v7  ;;  %v2782_v17 = vpack.c.bf16 %v5855_v3, %v5855_v3  ;;  %v2784_v1 = vpack.c.bf16 %v5993_v30, %v5993_v30  ;;  %v2786_v37 = vpack.c.bf16 %v5997_v56, %v5997_v56  ;;  %v2954_v36 = vunpack.c.l.b16 %v2766_v51 }
 0x1ab   : > { %v2788_v45 = vpack.c.bf16 %v2241_v2, %v2241_v2  ;;  %v2955_v46 = vunpack.c.l.b16 %v2768_v48  ;;  %v2956_v28 = vunpack.c.l.b16 %v2770_v53  ;;  %v2957_v61 = vunpack.c.l.b16 %v2772_v18  ;;  %v6059_v53 = vpop.f32.mrf.mxu0 }
 0x1ac   : > { %v2961_v5 = vunpack.c.l.b16 %v2780_v0  ;;  %v2962_v14 = vunpack.c.l.b16 %v2782_v17  ;;  %v2963_v12 = vunpack.c.l.b16 %v2784_v1  ;;  %v2964_v26 = vunpack.c.l.b16 %v2786_v37 }
 0x1ad   : > { %v2965_v16 = vunpack.c.l.b16 %v2788_v45  ;;  %v7163_v3 = vrot.slane %v5747_v59, 7  ;;  %v3020_v52 = vrot.slane %v2953_v42, 5  ;;  %v7164_v56 = vrot.slane %v5737_v54, 6 }
 0x1ae   : > { %v3023_v11 = vrot.slane %v2954_v36, 4  ;;  %v3026_v51 = vrot.slane %v2955_v46, 3  ;;  %v3029_v48 = vrot.slane %v2956_v28, 2  ;;  %v3032_v0 = vrot.slane %v2957_v61, 1 }
 0x1af   : > { %v3016_v30 = vsel %vm3015_vm0, %v7163_v3, %v5745_v58  ;;  %v7165_v17 = vrot.slane %v5822_v27, 7  ;;  %v3039_v1 = vrot.slane %v2961_v5, 5  ;;  %v7166_v54 = vrot.slane %v5828_v38, 6  ;;  %v6078_v5 = vpop.f32.mrf.mxu0 }
 0x1b0   : > { %v3019_v2 = vsel %vm3018_vm1, %v7164_v56, %v3016_v30  ;;  %v3041_v45 = vrot.slane %v2962_v14, 4  ;;  %v3043_v42 = vrot.slane %v2963_v12, 3  ;;  %v3047_v61 = vrot.slane %v2965_v16, 1 }
 0x1b1   : > { %v3022_v18 = vsel %vm3021_vm2, %v3020_v52, %v3019_v2  ;;  %v3036_v59 = vsel %vm3015_vm0, %v7165_v17, %v5826_v34  ;;  %v3045_v52 = vrot.slane %v2964_v26, 2  ;;  %v626_v34 = vadd.f32 %v5945_v22, %v5692_v9 }
 0x1b2   : > { %v3025_v58 = vsel %vm3024_vm3, %v3023_v11, %v3022_v18  ;;  %v3038_v37 = vsel %vm3018_vm1, %v7166_v54, %v3036_v59  ;;  %v628_v38 = vadd.f32 %v5963_v25, %v5694_v10  ;;  %v632_v26 = vadd.f32 %v5969_v57, %v5692_v9 }
 0x1b3   : > { %v3028_v28 = vsel %vm3027_vm4, %v3026_v51, %v3025_v58  ;;  %v3040_v36 = vsel %vm3021_vm2, %v3039_v1, %v3038_v37  ;;  %v634_v16 = vadd.f32 %v5989_v32, %v5694_v10  ;;  %v636_v22 = vadd.f32 %v6011_v21, %v5692_v9 }
 0x1b4   : > { %v3031_v46 = vsel %vm3030_vm5, %v3029_v48, %v3028_v28  ;;  %v3042_v27 = vsel %vm3024_vm3, %v3041_v45, %v3040_v36  ;;  %v1044_v30 = vcombine.low %v626_v34, %v628_v38  ;;  %v1045_v56 = vcombine.high %v626_v34, %v628_v38 }
 0x1b5   : > { %v3034_v14 = vsel %vm3033_vm6, %v3032_v0, %v3031_v46  ;;  %v3044_v12 = vsel %vm3027_vm4, %v3043_v42, %v3042_v27  ;;  %v1062_v2 = vcombine.low %v632_v26, %v634_v16  ;;  %v1063_v11 = vcombine.high %v632_v26, %v634_v16  ;;  %v647_v0 = vpop.f32.mrf.mxu0 }
 0x1b6   : > { %v3046_v3 = vsel %vm3030_vm5, %v3045_v52, %v3044_v12  ;;  %v638_v51 = vadd.f32 %v6025_v41, %v5694_v10  ;;  %v1052_v57 = vrot.slane %v1044_v30, %v5698_v15  ;;  %v1059_v18 = vrot.slane %v1045_v56, %v5698_v15 }
 0x1b7   : > { %v3048_v25 = vsel %vm3033_vm6, %v3047_v61, %v3046_v3  ;;  %v642_v32 = vadd.f32 %v641_v24, %v5692_v9  ;;  %v1070_v17 = vrot.slane %v1062_v2, %v5698_v15  ;;  %v1077_v59 = vrot.slane %v1063_v11, %v5698_v15  ;;  %v651_v27 = vpop.f32.mrf.mxu0 }
 0x1b8   : > { %v3133_v48 = vpack.c.b16 %v3048_v25, %v3034_v14  ;;  %v1080_v21 = vcombine.low %v636_v22, %v638_v51  ;;  %v1081_v1 = vcombine.high %v636_v22, %v638_v51  ;;  %v1060_v58 = vcombine.high %v1052_v57, %v1052_v57 }
 0x1b9   : > { %v1061_v54 = vcombine.high %v1059_v18, %v1059_v18  ;;  %v4619_v37 = vrot.slane %v1052_v57, 9  ;;  %v4621_v45 = vrot.slane %v1059_v18, 9  ;;  %v1078_v41 = vcombine.high %v1070_v17, %v1070_v17 }
 0x1ba   : > { %3141 = vxpose.xlu0.c.b16.start [1/4] (short) %v3133_v48, 128  ;;  %v1079_v42 = vcombine.high %v1077_v59, %v1077_v59  ;;  %v4559_v28 = vrot.slane %v1070_v17, 9  ;;  %v4561_v36 = vrot.slane %v1077_v59, 9  ;;  %v4620_v52 = vrot.slane %v1060_v58, 9 }
 0x1bb   : > { %v4622_v61 = vrot.slane %v1061_v54, 9  ;;  %v1954_v46 = vmax.f32 %v1052_v57, %v4619_v37  ;;  %v1956_v24 = vmax.f32 %v1059_v18, %v4621_v45  ;;  %v4560_v34 = vrot.slane %v1078_v41, 9 }
 0x1bc   : > { %v4562_v38 = vrot.slane %v1079_v42, 9  ;;  %v1702_v14 = vmax.f32 %v1070_v17, %v4559_v28  ;;  %v1704_v12 = vmax.f32 %v1077_v59, %v4561_v36  ;;  %v1955_v26 = vmax.f32 %v1060_v58, %v4620_v52 }
 0x1bd   : > { %v6097_v16 = vmax.f32 %v1061_v54, %v4622_v61  ;;  %v2018_v3 = vmax.f32 %v5965_v35, %v1954_v46  ;;  %v6101_v30 = vmax.f32 %v5967_v20, %v1956_v24  ;;  %v1703_v56 = vmax.f32 %v1078_v41, %v4560_v34  ;;  %v653_v35 = vpop.f32.mrf.mxu0 }
 0x1be   : > { %v1705_v22 = vmax.f32 %v1079_v42, %v4562_v38  ;;  %v1088_v25 = vrot.slane %v1080_v21, %v5698_v15  ;;  %v1095_v2 = vrot.slane %v1081_v1, %v5698_v15  ;;  %v6106_v11 = vmax.f32 %v5971_v19, %v1955_v26 }
 0x1bf   : > { %v2345_v51 = vrot.slane %v2018_v3, %v5686_v4  ;;  %v2349_v48 = vrot.slane %v2018_v3, %v5708_v39  ;;  %v6112_v57 = vrot.slane %v6101_v30, %v5708_v39  ;;  %v644_v58 = vadd.f32 %v6059_v53, %v5694_v10  ;;  %v655_v61 = vpop.f32.mrf.mxu0 }
 0x1c0   : > { %v1096_v20 = vcombine.high %v1088_v25, %v1088_v25  ;;  %v1097_v18 = vcombine.high %v1095_v2, %v1095_v2  ;;  %v4563_v17 = vrot.slane %v1088_v25, 9  ;;  %v4565_v59 = vrot.slane %v1095_v2, 9 }
 0x1c1   : > { %7167 = vst [vmem:[#allocation45_spill] sm:$0xff] %v6112_v57  ;;  %v6116_v21 = vrot.slane %v6106_v11, %v5708_v39  ;;  %v2814_v1 = vpack.c.bf16 %v2345_v51, %v2345_v51  ;;  %v2815_v19 = vpack.c.bf16 %v2349_v48, %v2349_v48  ;;  %v1098_v36 = vcombine.low %v642_v32, %v644_v58 }
 0x1c2   : > { %v4564_v54 = vrot.slane %v1096_v20, 9  ;;  %v4566_v37 = vrot.slane %v1097_v18, 9  ;;  %v6120_v45 = vmax.f32 %v1088_v25, %v4563_v17  ;;  %v6122_v41 = vmax.f32 %v1095_v2, %v4565_v59 }
 0x1c3   : > { %7168 = vst [vmem:[#allocation46_spill] sm:$0xff] %v6116_v21  ;;  %v6124_v42 = vunpack.c.l.b16 %v2814_v1  ;;  %v6126_v28 = vunpack.c.l.b16 %v2815_v19  ;;  %v1099_v52 = vcombine.high %v642_v32, %v644_v58  ;;  %v646_v53 = vadd.f32 %v6078_v5, %v5692_v9 }
 0x1c4   : > { %v6128_v46 = vmax.f32 %v1096_v20, %v4564_v54  ;;  %v6130_v24 = vmax.f32 %v1097_v18, %v4566_v37  ;;  %v648_v34 = vadd.f32 %v647_v0, %v5694_v10  ;;  %v1106_v26 = vrot.slane %v1098_v36, %v5698_v15 }
 0x1c5   : > { %7169 = vst [vmem:[#allocation47_spill] sm:$0xff] %v6126_v28  ;;  %v1113_v3 = vrot.slane %v1099_v52, %v5698_v15  ;;  %v6139_v25 = vadd.f32 %v651_v27, %v5692_v9  ;;  %v6142_v51 = vadd.f32 %v653_v35, %v5694_v10  ;;  %v6145_v48 = vadd.f32 %v655_v61, %v5692_v9 }
 0x1c6   : > { %v1116_v32 = vcombine.low %v646_v53, %v648_v34  ;;  %v1117_v2 = vcombine.high %v646_v53, %v648_v34  ;;  %v1114_v5 = vcombine.high %v1106_v26, %v1106_v26  ;;  %v4623_v0 = vrot.slane %v1106_v26, 9 }
 0x1c7   : > { %v1115_v20 = vcombine.high %v1113_v3, %v1113_v3  ;;  %v4625_v18 = vrot.slane %v1113_v3, 9  ;;  %v1134_v27 = vcombine.low %v6139_v25, %v6142_v51  ;;  %v1135_v1 = vcombine.high %v6139_v25, %v6142_v51 }
 0x1c8   : > { %v1124_v17 = vrot.slane %v1116_v32, %v5698_v15  ;;  %v1131_v59 = vrot.slane %v1117_v2, %v5698_v15  ;;  %v4624_v19 = vrot.slane %v1114_v5, 9  ;;  %v1958_v58 = vmax.f32 %v1106_v26, %v4623_v0  ;;  %v657_v26 = vpop.f32.mrf.mxu0 }
 0x1c9   : > { %v4626_v35 = vrot.slane %v1115_v20, 9  ;;  %v1960_v54 = vmax.f32 %v1113_v3, %v4625_v18 }
 0x1ca   : > { %v1132_v37 = vcombine.high %v1124_v17, %v1124_v17  ;;  %v1133_v36 = vcombine.high %v1131_v59, %v1131_v59  ;;  %v4627_v52 = vrot.slane %v1124_v17, 9  ;;  %v4629_v61 = vrot.slane %v1131_v59, 9 }
 0x1cb   : > { %v1959_v53 = vmax.f32 %v1114_v5, %v4624_v19  ;;  %v1961_v34 = vmax.f32 %v1115_v20, %v4626_v35  ;;  %v2022_v38 = vmax.f32 %v1702_v14, %v1958_v58  ;;  %v2024_v32 = vmax.f32 %v1704_v12, %v1960_v54 }
 0x1cc   : > { %v4628_v28 = vrot.slane %v1132_v37, 9  ;;  %v4630_v2 = vrot.slane %v1133_v36, 9  ;;  %v1962_v7 = vmax.f32 %v1124_v17, %v4627_v52  ;;  %v1964_v13 = vmax.f32 %v1131_v59, %v4629_v61  ;;  %v661_v52 = vpop.f32.mrf.mxu0 }
 0x1cd   : > { %v2023_v47 = vmax.f32 %v1703_v56, %v1959_v53  ;;  %v2025_v50 = vmax.f32 %v1705_v22, %v1961_v34  ;;  %v2377_v25 = vrot.slane %v2022_v38, %v5686_v4  ;;  %v2381_v51 = vrot.slane %v2022_v38, %v5708_v39 }
 0x1ce   : > { %v2393_v3 = vrot.slane %v2024_v32, %v5686_v4  ;;  %v2397_v0 = vrot.slane %v2024_v32, %v5708_v39  ;;  %v1963_v18 = vmax.f32 %v1132_v37, %v4628_v28  ;;  %v6157_v5 = vmax.f32 %v1133_v36, %v4630_v2 }
 0x1cf   : > { %v2385_v14 = vrot.slane %v2023_v47, %v5686_v4  ;;  %v2389_v12 = vrot.slane %v2023_v47, %v5708_v39  ;;  %v2401_v20 = vrot.slane %v2025_v50, %v5686_v4  ;;  %v2405_v56 = vrot.slane %v2025_v50, %v5708_v39 }
 0x1d0   : > { %v2822_v22 = vpack.c.bf16 %v2377_v25, %v2377_v25  ;;  %v2823_v17 = vpack.c.bf16 %v2381_v51, %v2381_v51  ;;  %v2826_v59 = vpack.c.bf16 %v2393_v3, %v2393_v3  ;;  %v2827_v38 = vpack.c.bf16 %v2397_v0, %v2397_v0 }
 0x1d1   : > { %v2824_v19 = vpack.c.bf16 %v2385_v14, %v2385_v14  ;;  %v2825_v35 = vpack.c.bf16 %v2389_v12, %v2389_v12  ;;  %v2828_v58 = vpack.c.bf16 %v2401_v20, %v2401_v20  ;;  %v2829_v54 = vpack.c.bf16 %v2405_v56, %v2405_v56  ;;  %v663_v20 = vpop.f32.mrf.mxu0 }
 0x1d2   : > { %v6163_v28 = vunpack.c.l.b16 %v2822_v22  ;;  %v6165_v37 = vunpack.c.l.b16 %v2826_v59  ;;  %v6167_v36 = vunpack.c.l.b16 %v2823_v17  ;;  %v6169_v47 = vunpack.c.l.b16 %v2827_v38 }
 0x1d3   : > { %v6171_v61 = vunpack.c.l.b16 %v2824_v19  ;;  %v6173_v50 = vunpack.c.l.b16 %v2828_v58  ;;  %v6175_v53 = vunpack.c.l.b16 %v2825_v35  ;;  %v6177_v34 = vunpack.c.l.b16 %v2829_v54 }
 0x1d4   : > { %7170 = vst [vmem:[#allocation48_spill] sm:$0xff] %v6167_v36  ;;  %7171 = vst [vmem:[#allocation49_spill] sm:$0xff] %v6169_v47  ;;  %v2026_v25 = vmax.f32 %v6120_v45, %v1962_v7  ;;  %v6183_v51 = vmax.f32 %v6128_v46, %v1963_v18  ;;  %v6189_v12 = vmax.f32 %v6122_v41, %v1964_v13 }
 0x1d5   : > { %7172 = vst [vmem:[#allocation50_spill] sm:$0xff] %v6173_v50  ;;  %7173 = vst [vmem:[#allocation51_spill] sm:$0xff] %v6175_v53  ;;  %v1142_v45 = vrot.slane %v1134_v27, %v5698_v15  ;;  %v1149_v18 = vrot.slane %v1135_v1, %v5698_v15  ;;  %v658_v13 = vadd.f32 %v657_v26, %v5694_v10 }
 0x1d6   : > { %7174 = vst [vmem:[#allocation52_spill] sm:$0xff] %v6177_v34  ;;  %v2409_v56 = vrot.slane %v2026_v25, %v5686_v4  ;;  %v2413_v22 = vrot.slane %v2026_v25, %v5708_v39  ;;  %v6195_v7 = vrot.slane %v6183_v51, %v5708_v39  ;;  %v6200_v46 = vrot.slane %v6189_v12, %v5708_v39  ;;  %v6207_v25 = vpop.f32.mrf.mxu0 }
 0x1d7   : > { %v662_v41 = vadd.f32 %v661_v52, %v5692_v9  ;;  %v1150_v38 = vcombine.high %v1142_v45, %v1142_v45  ;;  %v4567_v19 = vrot.slane %v1142_v45, 9  ;;  %v1151_v35 = vcombine.high %v1149_v18, %v1149_v18 }
 0x1d8   : > { %7175 = vst [vmem:[#allocation53_spill] sm:$0xff] %v6195_v7  ;;  %7176 = vst [vmem:[#allocation54_spill] sm:$0xff] %v6200_v46  ;;  %v2830_v17 = vpack.c.bf16 %v2409_v56, %v2409_v56  ;;  %v2831_v59 = vpack.c.bf16 %v2413_v22, %v2413_v22  ;;  %v4569_v58 = vrot.slane %v1149_v18, 9  ;;  %v1152_v54 = vcombine.low %v6145_v48, %v658_v13 }
 0x1d9   : > { %v1153_v27 = vcombine.high %v6145_v48, %v658_v13  ;;  %v4568_v1 = vrot.slane %v1150_v38, 9  ;;  %v1710_v26 = vmax.f32 %v1142_v45, %v4567_v19  ;;  %v4570_v0 = vrot.slane %v1151_v35, 9  ;;  %v7179_v48 = vld [vmem:[#allocation31_spill] sm:$0xff]  ;;  %v6221_v45 = vpop.f32.mrf.mxu0 }
 0x1da   : > { %v6209_v14 = vunpack.c.l.b16 %v2830_v17  ;;  %v6211_v2 = vunpack.c.l.b16 %v2831_v59  ;;  %v1712_v52 = vmax.f32 %v1149_v18, %v4569_v58  ;;  %v1160_v56 = vrot.slane %v1152_v54, %v5698_v15 }
 0x1db   : > { %v1167_v22 = vrot.slane %v1153_v27, %v5698_v15  ;;  %v1711_v3 = vmax.f32 %v1150_v38, %v4568_v1  ;;  %v664_v57 = vadd.f32 %v663_v20, %v5694_v10  ;;  %v6219_v13 = vmax.f32 %v7179_v48, %v5885_v8 }
 0x1dc   : > { %7177 = vst [vmem:[#allocation55_spill] sm:$0xff] %v6209_v14  ;;  %7178 = vst [vmem:[#allocation56_spill] sm:$0xff] %v6211_v2  ;;  %v1713_v17 = vmax.f32 %v1151_v35, %v4570_v0  ;;  %v1168_v59 = vcombine.high %v1160_v56, %v1160_v56  ;;  %v4571_v44 = vrot.slane %v1160_v56, 9  ;;  %v6225_v54 = vmax.f32 %v5973_v62, %v6097_v16 }
 0x1dd   : > { %7180 = vst [vmem:[#allocation31_spill] sm:$0xff] %v6219_v13  ;;  %v1169_v21 = vcombine.high %v1167_v22, %v1167_v22  ;;  %v4573_v18 = vrot.slane %v1167_v22, 9  ;;  %v1170_v19 = vcombine.low %v662_v41, %v664_v57  ;;  %v1171_v58 = vcombine.high %v662_v41, %v664_v57 }
 0x1de   : > { %7181 = vst [vmem:[#allocation57_spill] sm:$0xff] %v6225_v54  ;;  %v4572_v38 = vrot.slane %v1168_v59, 9  ;;  %v6227_v20 = vmax.f32 %v1160_v56, %v4571_v44  ;;  %v2289_v8 = vrot.slane %v5891_v6, %v5686_v4  ;;  %v2297_v57 = vrot.slane %v5893_v55, %v5686_v4  ;;  %v6245_v6 = vpop.f32.mrf.mxu0 }
 0x1df   : > { %v4574_v27 = vrot.slane %v1169_v21, 9  ;;  %v6231_v0 = vmax.f32 %v1167_v22, %v4573_v18  ;;  %v1178_v35 = vrot.slane %v1170_v19, %v5698_v15  ;;  %v1185_v1 = vrot.slane %v1171_v58, %v5698_v15 }
 0x1e0   : > { %v6237_v41 = vmax.f32 %v1168_v59, %v4572_v38  ;;  %v2305_v44 = vrot.slane %v6219_v13, %v5686_v4  ;;  %v2353_v16 = vrot.slane %v6106_v11, %v5686_v4  ;;  %v2361_v19 = vrot.slane %v6101_v30, %v5686_v4  ;;  %v6251_v47 = vpop.f32.mrf.mxu0 }
 0x1e1   : > { %v6239_v62 = vmax.f32 %v1169_v21, %v4574_v27  ;;  %v1186_v56 = vcombine.high %v1178_v35, %v1178_v35  ;;  %v1187_v22 = vcombine.high %v1185_v1, %v1185_v1  ;;  %v4631_v48 = vrot.slane %v1178_v35, 9 }
 0x1e2   : > { %v4633_v18 = vrot.slane %v1185_v1, 9  ;;  %v2369_v55 = vrot.slane %v6225_v54, %v5686_v4  ;;  %v2800_v21 = vpack.c.bf16 %v2289_v8, %v2289_v8  ;;  %v2802_v59 = vpack.c.bf16 %v2297_v57, %v2297_v57 }
 0x1e3   : > { %v4632_v58 = vrot.slane %v1186_v56, 9  ;;  %v4634_v38 = vrot.slane %v1187_v22, 9  ;;  %v1966_v27 = vmax.f32 %v1178_v35, %v4631_v48  ;;  %v2804_v13 = vpack.c.bf16 %v2305_v44, %v2305_v44 }
 0x1e4   : > { %v1968_v32 = vmax.f32 %v1185_v1, %v4633_v18  ;;  %v2816_v11 = vpack.c.bf16 %v2353_v16, %v2353_v16  ;;  %v2818_v2 = vpack.c.bf16 %v2361_v19, %v2361_v19  ;;  %v2820_v34 = vpack.c.bf16 %v2369_v55, %v2369_v55 }
 0x1e5   : > { %v1967_v53 = vmax.f32 %v1186_v56, %v4632_v58  ;;  %v1969_v36 = vmax.f32 %v1187_v22, %v4634_v38  ;;  %v2030_v46 = vmax.f32 %v1710_v26, %v1966_v27  ;;  %v2971_v30 = vunpack.c.l.b16 %v2800_v21 }
 0x1e6   : > { %v2032_v7 = vmax.f32 %v1712_v52, %v1968_v32  ;;  %v2972_v14 = vunpack.c.l.b16 %v2802_v59  ;;  %v6253_v50 = vunpack.c.l.b16 %v2804_v13  ;;  %v6255_v8 = vunpack.c.l.b16 %v2816_v11  ;;  %v675_v32 = vpop.f32.mrf.mxu0 }
 0x1e7   : > { %v2031_v57 = vmax.f32 %v1711_v3, %v1967_v53  ;;  %v2033_v54 = vmax.f32 %v1713_v17, %v1969_v36  ;;  %v2441_v35 = vrot.slane %v2030_v46, %v5686_v4  ;;  %v2445_v1 = vrot.slane %v2030_v46, %v5708_v39 }
 0x1e8   : > { %v2457_v44 = vrot.slane %v2032_v7, %v5686_v4  ;;  %v2461_v16 = vrot.slane %v2032_v7, %v5708_v39  ;;  %v2980_v56 = vunpack.c.l.b16 %v2818_v2  ;;  %v6261_v22 = vunpack.c.l.b16 %v2820_v34  ;;  %v677_v59 = vpop.f32.mrf.mxu0 }
 0x1e9   : > { %v2449_v26 = vrot.slane %v2031_v57, %v5686_v4  ;;  %v2453_v52 = vrot.slane %v2031_v57, %v5708_v39  ;;  %v2465_v13 = vrot.slane %v2033_v54, %v5686_v4  ;;  %v2469_v36 = vrot.slane %v2033_v54, %v5708_v39 }
 0x1ea   : > { %v2838_v53 = vpack.c.bf16 %v2441_v35, %v2441_v35  ;;  %v2839_v3 = vpack.c.bf16 %v2445_v1, %v2445_v1  ;;  %v2842_v17 = vpack.c.bf16 %v2457_v44, %v2457_v44  ;;  %v2843_v46 = vpack.c.bf16 %v2461_v16, %v2461_v16 }
 0x1eb   : > { %v2840_v48 = vpack.c.bf16 %v2449_v26, %v2449_v26  ;;  %v2841_v18 = vpack.c.bf16 %v2453_v52, %v2453_v52  ;;  %v2844_v19 = vpack.c.bf16 %v2465_v13, %v2465_v13  ;;  %v2845_v7 = vpack.c.bf16 %v2469_v36, %v2469_v36 }
 0x1ec   : > { %v6267_v2 = vunpack.c.l.b16 %v2838_v53  ;;  %v6269_v34 = vunpack.c.l.b16 %v2842_v17  ;;  %v6271_v55 = vunpack.c.l.b16 %v2839_v3  ;;  %v6273_v21 = vunpack.c.l.b16 %v2843_v46  ;;  %v681_v46 = vpop.f32.mrf.mxu0 }
 0x1ed   : > { %v6275_v58 = vunpack.c.l.b16 %v2840_v48  ;;  %v6277_v54 = vunpack.c.l.b16 %v2844_v19  ;;  %v6279_v38 = vunpack.c.l.b16 %v2841_v18  ;;  %v6281_v27 = vunpack.c.l.b16 %v2845_v7 }
 0x1ee   : > { %7182 = vst [vmem:[#allocation58_spill] sm:$0xff] %v6271_v55  ;;  %7183 = vst [vmem:[#allocation59_spill] sm:$0xff] %v6273_v21  ;;  %v7186_v35 = vrot.slane %v5907_v49, 7  ;;  %v3053_v44 = vrot.slane %v5909_v23, 5  ;;  %v7187_v13 = vrot.slane %v5901_v40, 6  ;;  %v3055_v3 = vrot.slane %v5937_v63, 4 }
 0x1ef   : > { %7184 = vst [vmem:[#allocation60_spill] sm:$0xff] %v6279_v38  ;;  %7185 = vst [vmem:[#allocation61_spill] sm:$0xff] %v6281_v27  ;;  %v3057_v17 = vrot.slane %v2971_v30, 3  ;;  %v3059_v49 = vrot.slane %v2972_v14, 2  ;;  %v7188_v23 = vrot.slane %v6027_v60, 7  ;;  %v3067_v18 = vrot.slane %v6029_v29, 5 }
 0x1f0   : > { %v3050_v1 = vsel %vm3015_vm0, %v7186_v35, %v5899_v43  ;;  %v3061_v43 = vrot.slane %v6253_v50, 1  ;;  %v3069_v40 = vrot.slane %v6124_v42, 4  ;;  %v7189_v7 = vrot.slane %v6019_v33, 6 }
 0x1f1   : > { %v3052_v36 = vsel %vm3018_vm1, %v7187_v13, %v3050_v1  ;;  %v3064_v48 = vsel %vm3015_vm0, %v7188_v23, %v6017_v31  ;;  %v3071_v14 = vrot.slane %v6255_v8, 3  ;;  %v3073_v30 = vrot.slane %v2980_v56, 2  ;;  %v683_v56 = vpop.f32.mrf.mxu0 }
 0x1f2   : > { %v3054_v53 = vsel %vm3021_vm2, %v3053_v44, %v3052_v36  ;;  %v3066_v63 = vsel %vm3018_vm1, %v7189_v7, %v3064_v48  ;;  %v3075_v60 = vrot.slane %v6261_v22, 1  ;;  %v666_v31 = vadd.f32 %v6207_v25, %v5692_v9 }
 0x1f3   : > { %v3056_v19 = vsel %vm3024_vm3, %v3055_v3, %v3054_v53  ;;  %v3068_v35 = vsel %vm3021_vm2, %v3067_v18, %v3066_v63  ;;  %v668_v33 = vadd.f32 %v6221_v45, %v5694_v10  ;;  %v672_v8 = vadd.f32 %v6245_v6, %v5692_v9 }
 0x1f4   : > { %v3058_v50 = vsel %vm3027_vm4, %v3057_v17, %v3056_v19  ;;  %v3070_v42 = vsel %vm3024_vm3, %v3069_v40, %v3068_v35  ;;  %v674_v22 = vadd.f32 %v6251_v47, %v5694_v10  ;;  %v676_v25 = vadd.f32 %v675_v32, %v5692_v9  ;;  %v685_v32 = vpop.f32.mrf.mxu0 }
 0x1f5   : > { %v3060_v29 = vsel %vm3030_vm5, %v3059_v49, %v3058_v50  ;;  %v3072_v44 = vsel %vm3027_vm4, %v3071_v14, %v3070_v42  ;;  %v1188_v36 = vcombine.low %v666_v31, %v668_v33  ;;  %v1189_v53 = vcombine.high %v666_v31, %v668_v33 }
 0x1f6   : > { %v3062_v1 = vsel %vm3033_vm6, %v3061_v43, %v3060_v29  ;;  %v3074_v13 = vsel %vm3030_vm5, %v3073_v30, %v3072_v44  ;;  %v678_v3 = vadd.f32 %v677_v59, %v5694_v10  ;;  %v1206_v17 = vcombine.low %v672_v8, %v674_v22 }
 0x1f7   : > { %v3076_v45 = vsel %vm3033_vm6, %v3075_v60, %v3074_v13  ;;  %v1207_v6 = vcombine.high %v672_v8, %v674_v22  ;;  %v6330_v49 = vadd.f32 %v681_v46, %v5692_v9  ;;  %v1196_v23 = vrot.slane %v1188_v36, %v5698_v15  ;;  %v687_v8 = vpop.f32.mrf.mxu0 }
 0x1f8   : > { %v3134_v43 = vpack.c.b16 %v3076_v45, %v3062_v1  ;;  %v1203_v47 = vrot.slane %v1189_v53, %v5698_v15  ;;  %v1224_v48 = vcombine.low %v676_v25, %v678_v3  ;;  %v1214_v18 = vrot.slane %v1206_v17, %v5698_v15 }
 0x1f9   : > { %v1221_v40 = vrot.slane %v1207_v6, %v5698_v15  ;;  %v1225_v19 = vcombine.high %v676_v25, %v678_v3  ;;  %v684_v59 = vadd.f32 %v683_v56, %v5694_v10  ;;  %v1204_v7 = vcombine.high %v1196_v23, %v1196_v23 }
 0x1fa   : > { %3142 = vxpose.xlu0.c.b16.cont [2/4] (short) %v3134_v43, 128  ;;  %v1205_v63 = vcombine.high %v1203_v47, %v1203_v47  ;;  %v4635_v14 = vrot.slane %v1196_v23, 9  ;;  %v4637_v46 = vrot.slane %v1203_v47, 9  ;;  %v1222_v30 = vcombine.high %v1214_v18, %v1214_v18 }
 0x1fb   : > { %v1223_v50 = vcombine.high %v1221_v40, %v1221_v40  ;;  %v4575_v35 = vrot.slane %v1214_v18, 9  ;;  %v4577_v60 = vrot.slane %v1221_v40, 9  ;;  %v4636_v31 = vrot.slane %v1204_v7, 9 }
 0x1fc   : > { %v4638_v29 = vrot.slane %v1205_v63, 9  ;;  %v1970_v42 = vmax.f32 %v1196_v23, %v4635_v14  ;;  %v1972_v33 = vmax.f32 %v1203_v47, %v4637_v46  ;;  %v4576_v1 = vrot.slane %v1222_v30, 9 }
 0x1fd   : > { %v4578_v44 = vrot.slane %v1223_v50, 9  ;;  %v1718_v22 = vmax.f32 %v1214_v18, %v4575_v35  ;;  %v1720_v25 = vmax.f32 %v1221_v40, %v4577_v60  ;;  %v1971_v13 = vmax.f32 %v1204_v7, %v4636_v31 }
 0x1fe   : > { %v6337_v56 = vmax.f32 %v1205_v63, %v4638_v29  ;;  %v2034_v36 = vmax.f32 %v6227_v20, %v1970_v42  ;;  %v6341_v53 = vmax.f32 %v6231_v0, %v1972_v33  ;;  %v1719_v3 = vmax.f32 %v1222_v30, %v4576_v1  ;;  %v691_v20 = vpop.f32.mrf.mxu0 }
 0x1ff   : > { %v1721_v45 = vmax.f32 %v1223_v50, %v4578_v44  ;;  %v1232_v17 = vrot.slane %v1224_v48, %v5698_v15  ;;  %v1239_v6 = vrot.slane %v1225_v19, %v5698_v15  ;;  %v6346_v43 = vmax.f32 %v6237_v41, %v1971_v13 }
 0x200   : > { %v2473_v23 = vrot.slane %v2034_v36, %v5686_v4  ;;  %v2477_v47 = vrot.slane %v2034_v36, %v5708_v39  ;;  %v6352_v18 = vrot.slane %v6341_v53, %v5708_v39  ;;  %v1242_v14 = vcombine.low %v6330_v49, %v684_v59  ;;  %v693_v33 = vpop.f32.mrf.mxu0 }
 0x201   : > { %v1240_v0 = vcombine.high %v1232_v17, %v1232_v17  ;;  %v1241_v40 = vcombine.high %v1239_v6, %v1239_v6  ;;  %v4579_v7 = vrot.slane %v1232_v17, 9  ;;  %v4581_v63 = vrot.slane %v1239_v6, 9 }
 0x202   : > { %7190 = vst [vmem:[#allocation62_spill] sm:$0xff] %v6352_v18  ;;  %v6356_v48 = vrot.slane %v6346_v43, %v5708_v39  ;;  %v2846_v19 = vpack.c.bf16 %v2473_v23, %v2473_v23  ;;  %v2847_v41 = vpack.c.bf16 %v2477_v47, %v2477_v47  ;;  %v1243_v29 = vcombine.high %v6330_v49, %v684_v59 }
 0x203   : > { %v4580_v46 = vrot.slane %v1240_v0, 9  ;;  %v4582_v30 = vrot.slane %v1241_v40, 9  ;;  %v6359_v50 = vmax.f32 %v1232_v17, %v4579_v7  ;;  %v6361_v35 = vmax.f32 %v1239_v6, %v4581_v63 }
 0x204   : > { %7191 = vst [vmem:[#allocation63_spill] sm:$0xff] %v6356_v48  ;;  %v6363_v60 = vunpack.c.l.b16 %v2846_v19  ;;  %v6365_v31 = vunpack.c.l.b16 %v2847_v41  ;;  %v1250_v42 = vrot.slane %v1242_v14, %v5698_v15  ;;  %v686_v13 = vadd.f32 %v685_v32, %v5692_v9 }
 0x205   : > { %v6369_v1 = vmax.f32 %v1240_v0, %v4580_v46  ;;  %v6371_v44 = vmax.f32 %v1241_v40, %v4582_v30  ;;  %v688_v36 = vadd.f32 %v687_v8, %v5694_v10  ;;  %v1257_v6 = vrot.slane %v1243_v29, %v5698_v15 }
 0x206   : > { %7192 = vst [vmem:[#allocation64_spill] sm:$0xff] %v6365_v31  ;;  %v1258_v23 = vcombine.high %v1250_v42, %v1250_v42  ;;  %v4639_v47 = vrot.slane %v1250_v42, 9  ;;  %v6378_v49 = vadd.f32 %v691_v20, %v5692_v9  ;;  %v6381_v59 = vadd.f32 %v693_v33, %v5694_v10 }
 0x207   : > { %v1260_v7 = vcombine.low %v686_v13, %v688_v36  ;;  %v1261_v63 = vcombine.high %v686_v13, %v688_v36  ;;  %v1259_v0 = vcombine.high %v1257_v6, %v1257_v6  ;;  %v4641_v19 = vrot.slane %v1257_v6, 9 }
 0x208   : > { %v4640_v40 = vrot.slane %v1258_v23, 9  ;;  %v1974_v32 = vmax.f32 %v1250_v42, %v4639_v47  ;;  %v1278_v14 = vcombine.low %v6378_v49, %v6381_v59  ;;  %v1279_v46 = vcombine.high %v6378_v49, %v6381_v59 }
 0x209   : > { %v1268_v8 = vrot.slane %v1260_v7, %v5698_v15  ;;  %v1275_v41 = vrot.slane %v1261_v63, %v5698_v15  ;;  %v4642_v30 = vrot.slane %v1259_v0, 9  ;;  %v1976_v29 = vmax.f32 %v1257_v6, %v4641_v19  ;;  %v695_v63 = vpop.f32.mrf.mxu0 }
 0x20a   : > { %v1975_v20 = vmax.f32 %v1258_v23, %v4640_v40  ;;  %v2038_v13 = vmax.f32 %v1718_v22, %v1974_v32 }
 0x20b   : > { %v1276_v33 = vcombine.high %v1268_v8, %v1268_v8  ;;  %v1277_v36 = vcombine.high %v1275_v41, %v1275_v41  ;;  %v4643_v17 = vrot.slane %v1268_v8, 9  ;;  %v4645_v52 = vrot.slane %v1275_v41, 9 }
 0x20c   : > { %v1977_v57 = vmax.f32 %v1259_v0, %v4642_v30  ;;  %v2039_v42 = vmax.f32 %v1719_v3, %v1975_v20  ;;  %v2040_v47 = vmax.f32 %v1720_v25, %v1976_v29  ;;  %v2505_v7 = vrot.slane %v2038_v13, %v5686_v4  ;;  %v697_v20 = vpop.f32.mrf.mxu0 }
 0x20d   : > { %v2509_v26 = vrot.slane %v2038_v13, %v5708_v39  ;;  %v4644_v11 = vrot.slane %v1276_v33, 9  ;;  %v4646_v16 = vrot.slane %v1277_v36, 9  ;;  %v1978_v31 = vmax.f32 %v1268_v8, %v4643_v17 }
 0x20e   : > { %v2041_v49 = vmax.f32 %v1721_v45, %v1977_v57  ;;  %v2513_v23 = vrot.slane %v2039_v42, %v5686_v4  ;;  %v2517_v22 = vrot.slane %v2039_v42, %v5708_v39  ;;  %v2521_v6 = vrot.slane %v2040_v47, %v5686_v4 }
 0x20f   : > { %v2525_v59 = vrot.slane %v2040_v47, %v5708_v39  ;;  %v2854_v0 = vpack.c.bf16 %v2505_v7, %v2505_v7  ;;  %v2855_v3 = vpack.c.bf16 %v2509_v26, %v2509_v26  ;;  %v1979_v25 = vmax.f32 %v1276_v33, %v4644_v11 }
 0x210   : > { %v2529_v40 = vrot.slane %v2041_v49, %v5686_v4  ;;  %v2533_v19 = vrot.slane %v2041_v49, %v5708_v39  ;;  %v2856_v32 = vpack.c.bf16 %v2513_v23, %v2513_v23  ;;  %v2857_v30 = vpack.c.bf16 %v2517_v22, %v2517_v22 }
 0x211   : > { %v2858_v17 = vpack.c.bf16 %v2521_v6, %v2521_v6  ;;  %v2859_v57 = vpack.c.bf16 %v2525_v59, %v2525_v59  ;;  %v6397_v45 = vunpack.c.l.b16 %v2854_v0  ;;  %v6399_v8 = vunpack.c.l.b16 %v2855_v3  ;;  %v701_v59 = vpop.f32.mrf.mxu0 }
 0x212   : > { %v2860_v29 = vpack.c.bf16 %v2529_v40, %v2529_v40  ;;  %v2861_v13 = vpack.c.bf16 %v2533_v19, %v2533_v19  ;;  %v6401_v42 = vunpack.c.l.b16 %v2856_v32  ;;  %v6403_v47 = vunpack.c.l.b16 %v2857_v30 }
 0x213   : > { %v6405_v11 = vunpack.c.l.b16 %v2858_v17  ;;  %v6407_v26 = vunpack.c.l.b16 %v2859_v57  ;;  %v1980_v33 = vmax.f32 %v1275_v41, %v4645_v52  ;;  %v6409_v7 = vmax.f32 %v1277_v36, %v4646_v16 }
 0x214   : > { %v6411_v49 = vunpack.c.l.b16 %v2860_v29  ;;  %v6414_v22 = vunpack.c.l.b16 %v2861_v13  ;;  %v2042_v40 = vmax.f32 %v6359_v50, %v1978_v31  ;;  %v6421_v19 = vmax.f32 %v6369_v1, %v1979_v25 }
 0x215   : > { %7193 = vst [vmem:[#allocation65_spill] sm:$0xff] %v6405_v11  ;;  %v6424_v16 = vmax.f32 %v6361_v35, %v1980_v33  ;;  %v1286_v52 = vrot.slane %v1278_v14, %v5698_v15  ;;  %v1293_v41 = vrot.slane %v1279_v46, %v5698_v15  ;;  %v696_v36 = vadd.f32 %v695_v63, %v5692_v9  ;;  %v703_v33 = vpop.f32.mrf.mxu0 }
 0x216   : > { %7194 = vst [vmem:[#allocation66_spill] sm:$0xff] %v6411_v49  ;;  %v2537_v32 = vrot.slane %v2042_v40, %v5686_v4  ;;  %v2541_v30 = vrot.slane %v2042_v40, %v5708_v39  ;;  %v698_v17 = vadd.f32 %v697_v20, %v5694_v10  ;;  %v702_v50 = vadd.f32 %v701_v59, %v5692_v9 }
 0x217   : > { %v1294_v31 = vcombine.high %v1286_v52, %v1286_v52  ;;  %v1295_v1 = vcombine.high %v1293_v41, %v1293_v41  ;;  %v4583_v25 = vrot.slane %v1286_v52, 9  ;;  %v4585_v57 = vrot.slane %v1293_v41, 9 }
 0x218   : > { %v2862_v35 = vpack.c.bf16 %v2537_v32, %v2537_v32  ;;  %v2863_v29 = vpack.c.bf16 %v2541_v30, %v2541_v30  ;;  %v1296_v13 = vcombine.low %v696_v36, %v698_v17  ;;  %v1297_v14 = vcombine.high %v696_v36, %v698_v17 }
 0x219   : > { %v4584_v46 = vrot.slane %v1294_v31, 9  ;;  %v4586_v0 = vrot.slane %v1295_v1, 9  ;;  %v1726_v63 = vmax.f32 %v1286_v52, %v4583_v25  ;;  %v1728_v23 = vmax.f32 %v1293_v41, %v4585_v57 }
 0x21a   : > { %v6433_v3 = vunpack.c.l.b16 %v2862_v35  ;;  %v6435_v40 = vunpack.c.l.b16 %v2863_v29  ;;  %v1304_v20 = vrot.slane %v1296_v13, %v5698_v15  ;;  %v1311_v59 = vrot.slane %v1297_v14, %v5698_v15 }
 0x21b   : > { %v1727_v6 = vmax.f32 %v1294_v31, %v4584_v46  ;;  %v1729_v27 = vmax.f32 %v1295_v1, %v4586_v0  ;;  %v704_v32 = vadd.f32 %v703_v33, %v5694_v10  ;;  %v6442_v36 = vmax.f32 %v6130_v24, %v6157_v5 }
 0x21c   : > { %7195 = vst [vmem:[#allocation67_spill] sm:$0xff] %v6433_v3  ;;  %v1312_v30 = vcombine.high %v1304_v20, %v1304_v20  ;;  %v1313_v17 = vcombine.high %v1311_v59, %v1311_v59  ;;  %v4587_v52 = vrot.slane %v1304_v20, 9  ;;  %v4589_v41 = vrot.slane %v1311_v59, 9 }
 0x21d   : > { %7196 = vst [vmem:[#allocation68_spill] sm:$0xff] %v6442_v36  ;;  %v1314_v25 = vcombine.low %v702_v50, %v704_v32  ;;  %v1315_v57 = vcombine.high %v702_v50, %v704_v32  ;;  %v6446_v35 = vmax.f32 %v6239_v62, %v6337_v56  ;;  %v2417_v31 = vrot.slane %v6183_v51, %v5686_v4 }
 0x21e   : > { %v4588_v0 = vrot.slane %v1312_v30, 9  ;;  %v4590_v1 = vrot.slane %v1313_v17, 9  ;;  %v6450_v29 = vmax.f32 %v1304_v20, %v4587_v52  ;;  %v6452_v13 = vmax.f32 %v1311_v59, %v4589_v41 }
 0x21f   : > { %v1322_v24 = vrot.slane %v1314_v25, %v5698_v15  ;;  %v1329_v5 = vrot.slane %v1315_v57, %v5698_v15  ;;  %v2425_v50 = vrot.slane %v6189_v12, %v5686_v4  ;;  %v2433_v62 = vrot.slane %v6442_v36, %v5686_v4 }
 0x220   : > { %v6460_v56 = vmax.f32 %v1312_v30, %v4588_v0  ;;  %v6462_v14 = vmax.f32 %v1313_v17, %v4590_v1  ;;  %v2481_v51 = vrot.slane %v6346_v43, %v5686_v4  ;;  %v2489_v33 = vrot.slane %v6341_v53, %v5686_v4 }
 0x221   : > { %v1330_v46 = vcombine.high %v1322_v24, %v1322_v24  ;;  %v1331_v20 = vcombine.high %v1329_v5, %v1329_v5  ;;  %v4647_v59 = vrot.slane %v1322_v24, 9  ;;  %v4649_v32 = vrot.slane %v1329_v5, 9 }
 0x222   : > { %v2497_v12 = vrot.slane %v6446_v35, %v5686_v4  ;;  %v2832_v52 = vpack.c.bf16 %v2417_v31, %v2417_v31  ;;  %v2834_v41 = vpack.c.bf16 %v2425_v50, %v2425_v50  ;;  %v2836_v25 = vpack.c.bf16 %v2433_v62, %v2433_v62 }
 0x223   : > { %v4648_v30 = vrot.slane %v1330_v46, 9  ;;  %v4650_v57 = vrot.slane %v1331_v20, 9  ;;  %v1982_v17 = vmax.f32 %v1322_v24, %v4647_v59  ;;  %v1984_v0 = vmax.f32 %v1329_v5, %v4649_v32 }
 0x224   : > { %v2848_v1 = vpack.c.bf16 %v2481_v51, %v2481_v51  ;;  %v2850_v21 = vpack.c.bf16 %v2489_v33, %v2489_v33  ;;  %v2852_v43 = vpack.c.bf16 %v2497_v12, %v2497_v12  ;;  %v2987_v38 = vunpack.c.l.b16 %v2832_v52 }
 0x225   : > { %v1983_v55 = vmax.f32 %v1330_v46, %v4648_v30  ;;  %v1985_v53 = vmax.f32 %v1331_v20, %v4650_v57  ;;  %v2046_v18 = vmax.f32 %v1726_v63, %v1982_v17  ;;  %v2048_v48 = vmax.f32 %v1728_v23, %v1984_v0  ;;  %v705_v30 = vpop.f32.mrf.mxu0 }
 0x226   : > { %v2988_v36 = vunpack.c.l.b16 %v2834_v41  ;;  %v2989_v3 = vunpack.c.l.b16 %v2836_v25  ;;  %v2995_v49 = vunpack.c.l.b16 %v2848_v1  ;;  %v6470_v11 = vunpack.c.l.b16 %v2850_v21 }
 0x227   : > { %v2047_v31 = vmax.f32 %v1727_v6, %v1983_v55  ;;  %v2049_v50 = vmax.f32 %v1729_v27, %v1985_v53  ;;  %v2569_v62 = vrot.slane %v2046_v18, %v5686_v4  ;;  %v2573_v24 = vrot.slane %v2046_v18, %v5708_v39 }
 0x228   : > { %v2585_v5 = vrot.slane %v2048_v48, %v5686_v4  ;;  %v2589_v51 = vrot.slane %v2048_v48, %v5708_v39  ;;  %v2997_v33 = vunpack.c.l.b16 %v2852_v43  ;;  %v7197_v63 = vrot.slane %v6171_v61, 7 }
 0x229   : > { %v2577_v46 = vrot.slane %v2047_v31, %v5686_v4  ;;  %v2581_v21 = vrot.slane %v2047_v31, %v5708_v39  ;;  %v2593_v55 = vrot.slane %v2049_v50, %v5686_v4  ;;  %v2597_v27 = vrot.slane %v2049_v50, %v5708_v39 }
 0x22a   : > { %v3078_v23 = vsel %vm3015_vm0, %v7197_v63, %v6163_v28  ;;  %v2870_v6 = vpack.c.bf16 %v2569_v62, %v2569_v62  ;;  %v2871_v18 = vpack.c.bf16 %v2573_v24, %v2573_v24  ;;  %v2874_v20 = vpack.c.bf16 %v2585_v5, %v2585_v5  ;;  %v7199_v62 = vld [vmem:[#allocation50_spill] sm:$0xff]  ;;  %v7200_v63 = vld [vmem:[#allocation55_spill] sm:$0xff] }
 0x22b   : > { %v2875_v59 = vpack.c.bf16 %v2589_v51, %v2589_v51  ;;  %v2872_v32 = vpack.c.bf16 %v2577_v46, %v2577_v46  ;;  %v2873_v48 = vpack.c.bf16 %v2581_v21, %v2581_v21  ;;  %v2876_v12 = vpack.c.bf16 %v2593_v55, %v2593_v55 }
 0x22c   : > { %v2877_v52 = vpack.c.bf16 %v2597_v27, %v2597_v27  ;;  %v6484_v41 = vunpack.c.l.b16 %v2870_v6  ;;  %v6486_v61 = vunpack.c.l.b16 %v2874_v20  ;;  %v6488_v28 = vunpack.c.l.b16 %v2871_v18  ;;  %v707_v20 = vpop.f32.mrf.mxu0 }
 0x22d   : > { %v6490_v25 = vunpack.c.l.b16 %v2875_v59  ;;  %v6492_v57 = vunpack.c.l.b16 %v2872_v32  ;;  %v6494_v17 = vunpack.c.l.b16 %v2876_v12  ;;  %v6496_v0 = vunpack.c.l.b16 %v2873_v48 }
 0x22e   : > { %v6498_v1 = vunpack.c.l.b16 %v2877_v52  ;;  %v3121_v43 = vrot.slane %v6486_v61, 6  ;;  %v7198_v31 = vrot.slane %v6165_v37, 6  ;;  %v3081_v24 = vrot.slane %v7199_v62, 5 }
 0x22f   : > { %v3385_v53 = vrot.slane %v6490_v25, 6  ;;  %v3119_v5 = vrot.slane %v6492_v57, 7  ;;  %v3383_v51 = vrot.slane %v6496_v0, 7  ;;  %v3083_v46 = vrot.slane %v7200_v63, 4 }
 0x230   : > { %v3080_v50 = vsel %vm3018_vm1, %v7198_v31, %v3078_v23  ;;  %v3085_v21 = vrot.slane %v2987_v38, 3  ;;  %v3087_v27 = vrot.slane %v2988_v36, 2  ;;  %v3089_v6 = vrot.slane %v2989_v3, 1 }
 0x231   : > { %v3082_v55 = vsel %vm3021_vm2, %v3081_v24, %v3080_v50  ;;  %v7201_v18 = vrot.slane %v6275_v58, 7  ;;  %v7202_v59 = vrot.slane %v6269_v34, 6  ;;  %v3095_v48 = vrot.slane %v6277_v54, 5 }
 0x232   : > { %v3084_v23 = vsel %vm3024_vm3, %v3083_v46, %v3082_v55  ;;  %v3097_v38 = vrot.slane %v6363_v60, 4  ;;  %v3099_v36 = vrot.slane %v2995_v49, 3  ;;  %v3101_v3 = vrot.slane %v6470_v11, 2 }
 0x233   : > { %v3092_v37 = vsel %vm3015_vm0, %v7201_v18, %v6267_v2  ;;  %v3086_v12 = vsel %vm3027_vm4, %v3085_v21, %v3084_v23  ;;  %v3103_v52 = vrot.slane %v2997_v33, 1  ;;  %v706_v31 = vadd.f32 %v705_v30, %v5692_v9 }
 0x234   : > { %v3094_v32 = vsel %vm3018_vm1, %v7202_v59, %v3092_v37  ;;  %v3088_v58 = vsel %vm3030_vm5, %v3087_v27, %v3086_v12  ;;  %v708_v34 = vadd.f32 %v707_v20, %v5694_v10  ;;  %v2045_v60 = vmax.f32 %v6371_v44, %v6409_v7 }
 0x235   : > { %v3096_v2 = vsel %vm3021_vm2, %v3095_v48, %v3094_v32  ;;  %v3090_v50 = vsel %vm3033_vm6, %v3089_v6, %v3088_v58  ;;  %v2549_v49 = vrot.slane %v6421_v19, %v5708_v39  ;;  %v2557_v24 = vrot.slane %v6424_v16, %v5708_v39 }
 0x236   : > { %v3098_v54 = vsel %vm3024_vm3, %v3097_v38, %v3096_v2  ;;  %v1332_v33 = vcombine.low %v706_v31, %v708_v34  ;;  %v1333_v62 = vcombine.high %v706_v31, %v708_v34  ;;  %v2565_v10 = vrot.slane %v2045_v60, %v5708_v39 }
 0x237   : > { %v3100_v11 = vsel %vm3027_vm4, %v3099_v36, %v3098_v54  ;;  %v2865_v30 = vpack.c.bf16 %v2549_v49, %v2549_v49  ;;  %v7203_v63 = vrot.slane %v6403_v47, 7  ;;  %v2867_v55 = vpack.c.bf16 %v2557_v24, %v2557_v24 }
 0x238   : > { %v3102_v9 = vsel %vm3030_vm5, %v3101_v3, %v3100_v11  ;;  %v1340_v46 = vrot.slane %v1332_v33, %v5698_v15  ;;  %v1347_v21 = vrot.slane %v1333_v62, %v5698_v15  ;;  %v2869_v6 = vpack.c.bf16 %v2565_v10, %v2565_v10 }
 0x239   : > { %v3370_v44 = vsel %vm3015_vm0, %v7203_v63, %v6399_v8  ;;  %v3104_v7 = vsel %vm3033_vm6, %v3103_v52, %v3102_v9  ;;  %v3274_v18 = vunpack.c.l.b16 %v2865_v30  ;;  %v7204_v37 = vrot.slane %v6407_v26, 6 }
 0x23a   : > { %v3135_v27 = vpack.c.b16 %v3104_v7, %v3090_v50  ;;  %v1348_v23 = vcombine.high %v1340_v46, %v1340_v46  ;;  %v1349_v59 = vcombine.high %v1347_v21, %v1347_v21  ;;  %v4651_v32 = vrot.slane %v1340_v46, 9 }
 0x23b   : > { %v3372_v20 = vsel %vm3018_vm1, %v7204_v37, %v3370_v44  ;;  %v4653_v47 = vrot.slane %v1347_v21, 9  ;;  %v3275_v8 = vunpack.c.l.b16 %v2867_v55  ;;  %v3276_v48 = vunpack.c.l.b16 %v2869_v6 }
 0x23c   : > { %3143 = vxpose.xlu0.c.b16.cont [3/4] (short) %v3135_v27, 128  ;;  %v3373_v38 = vrot.slane %v6414_v22, 5  ;;  %v3375_v12 = vrot.slane %v6435_v40, 4  ;;  %v4652_v15 = vrot.slane %v1348_v23, 9  ;;  %v4654_v36 = vrot.slane %v1349_v59, 9 }
 0x23d   : > { %v1986_v3 = vmax.f32 %v1340_v46, %v4651_v32  ;;  %v1988_v52 = vmax.f32 %v1347_v21, %v4653_v47  ;;  %v3377_v26 = vrot.slane %v3274_v18, 3  ;;  %v3379_v2 = vrot.slane %v3275_v8, 2 }
 0x23e   : > { %v3374_v58 = vsel %vm3021_vm2, %v3373_v38, %v3372_v20  ;;  %v3381_v31 = vrot.slane %v3276_v48, 1  ;;  %v1987_v34 = vmax.f32 %v1348_v23, %v4652_v15  ;;  %v1989_v50 = vmax.f32 %v1349_v59, %v4654_v36 }
 0x23f   : > { %v2050_v54 = vmax.f32 %v6450_v29, %v1986_v3  ;;  %v2052_v49 = vmax.f32 %v6452_v13, %v1988_v52  ;;  %v3376_v11 = vsel %vm3024_vm3, %v3375_v12, %v3374_v58  ;;  %v3384_v22 = vsel %vm3015_vm0, %v3383_v51, %v6488_v28 }
 0x240   : > { %v3387_v40 = vrot.slane %v6498_v1, 5  ;;  %v2545_v33 = vrot.slane %v6421_v19, %v5686_v4  ;;  %v2051_v62 = vmax.f32 %v6460_v56, %v1987_v34  ;;  %v2053_v13 = vmax.f32 %v6462_v14, %v1989_v50 }
 0x241   : > { %v2601_v24 = vrot.slane %v2050_v54, %v5686_v4  ;;  %v2605_v29 = vrot.slane %v2050_v54, %v5708_v39  ;;  %v2621_v9 = vrot.slane %v2052_v49, %v5708_v39  ;;  %v3378_v10 = vsel %vm3027_vm4, %v3377_v26, %v3376_v11  ;;  %v7206_v54 = vld [vmem:[#allocation65_spill] sm:$0xff] }
 0x242   : > { %v3386_v28 = vsel %vm3018_vm1, %v3385_v53, %v3384_v22  ;;  %v2553_v0 = vrot.slane %v6424_v16, %v5686_v4  ;;  %v2613_v56 = vrot.slane %v2051_v62, %v5708_v39  ;;  %v2629_v51 = vrot.slane %v2053_v13, %v5708_v39 }
 0x243   : > { %v2878_v19 = vpack.c.bf16 %v2601_v24, %v2601_v24  ;;  %v2879_v1 = vpack.c.bf16 %v2605_v29, %v2605_v29  ;;  %v2883_v30 = vpack.c.bf16 %v2621_v9, %v2621_v9  ;;  %v3380_v14 = vsel %vm3030_vm5, %v3379_v2, %v3378_v10 }
 0x244   : > { %v3388_v63 = vsel %vm3021_vm2, %v3387_v40, %v3386_v28  ;;  %v2561_v44 = vrot.slane %v2045_v60, %v5686_v4  ;;  %v2881_v46 = vpack.c.bf16 %v2613_v56, %v2613_v56  ;;  %v2885_v53 = vpack.c.bf16 %v2629_v51, %v2629_v51  ;;  %v7208_v40 = vld [vmem:[#allocation66_spill] sm:$0xff] }
 0x245   : > { %v3010_v7 = vunpack.c.l.b16 %v2878_v19  ;;  %v3281_v25 = vunpack.c.l.b16 %v2879_v1  ;;  %v3283_v21 = vunpack.c.l.b16 %v2883_v30  ;;  %v3382_v16 = vsel %vm3033_vm6, %v3381_v31, %v3380_v14 }
 0x246   : > { %v2609_v55 = vrot.slane %v2051_v62, %v5686_v4  ;;  %v2617_v27 = vrot.slane %v2052_v49, %v5686_v4  ;;  %v3282_v6 = vunpack.c.l.b16 %v2881_v46  ;;  %v3284_v18 = vunpack.c.l.b16 %v2885_v53  ;;  %v7209_v62 = vld [vmem:[#allocation67_spill] sm:$0xff] }
 0x247   : > { %v3389_v37 = vrot.slane %v3281_v25, 4  ;;  %v2625_v20 = vrot.slane %v2053_v13, %v5686_v4  ;;  %v3393_v23 = vrot.slane %v3283_v21, 2  ;;  %v2864_v59 = vpack.c.bf16 %v2545_v33, %v2545_v33 }
 0x248   : > { %v2866_v32 = vpack.c.bf16 %v2553_v0, %v2553_v0  ;;  %v2868_v60 = vpack.c.bf16 %v2561_v44, %v2561_v44  ;;  %v3391_v8 = vrot.slane %v3282_v6, 3  ;;  %v3395_v48 = vrot.slane %v3284_v18, 1 }
 0x249   : > { %v3390_v47 = vsel %vm3024_vm3, %v3389_v37, %v3388_v63  ;;  %v2880_v38 = vpack.c.bf16 %v2609_v55, %v2609_v55  ;;  %v2882_v12 = vpack.c.bf16 %v2617_v27, %v2617_v27  ;;  %v2884_v15 = vpack.c.bf16 %v2625_v20, %v2625_v20  ;;  %v7211_v63 = vld [vmem:[#allocation53_spill] sm:$0xff]  ;;  %v7214_v27 = vld [vmem:[#allocation62_spill] sm:$0xff] }
 0x24a   : > { %v3003_v36 = vunpack.c.l.b16 %v2864_v59  ;;  %v3004_v3 = vunpack.c.l.b16 %v2866_v32  ;;  %v3392_v52 = vsel %vm3027_vm4, %v3391_v8, %v3390_v47  ;;  %v3005_v58 = vunpack.c.l.b16 %v2868_v60 }
 0x24b   : > { %v3011_v26 = vunpack.c.l.b16 %v2880_v38  ;;  %v7205_v4 = vrot.slane %v6401_v42, 7  ;;  %v3394_v31 = vsel %vm3030_vm5, %v3393_v23, %v3392_v52  ;;  %v3012_v34 = vunpack.c.l.b16 %v2882_v12  ;;  %v7216_v38 = vld [vmem:[#allocation51_spill] sm:$0xff] }
 0x24c   : > { %v3013_v50 = vunpack.c.l.b16 %v2884_v15  ;;  %v7207_v49 = vrot.slane %v7206_v54, 6  ;;  %v3396_v22 = vsel %vm3033_vm6, %v3395_v48, %v3394_v31  ;;  %v3109_v33 = vrot.slane %v7208_v40, 5  ;;  %v7215_v48 = vld [vmem:[#allocation48_spill] sm:$0xff] }
 0x24d   : > { %v3106_v2 = vsel %vm3015_vm0, %v7205_v4, %v6397_v45  ;;  %v3111_v24 = vrot.slane %v7209_v62, 4  ;;  %v3113_v29 = vrot.slane %v3003_v36, 3  ;;  %v3400_v13 = vpack.c.b16 %v3396_v22, %v3382_v16  ;;  %v7213_v16 = vld [vmem:[#allocation63_spill] sm:$0xff]  ;;  %v7218_v36 = vld [vmem:[#allocation49_spill] sm:$0xff]  ;;  %v7223_v54 = vld [vmem:[#allocation60_spill] sm:$0xff] }
 0x24e   : > { %v3108_v11 = vsel %vm3018_vm1, %v7207_v49, %v3106_v2  ;;  %v3115_v9 = vrot.slane %v3004_v3, 2  ;;  %v3117_v42 = vrot.slane %v3005_v58, 1  ;;  %v3120_v45 = vsel %vm3015_vm0, %v3119_v5, %v6484_v41  ;;  %v7210_v41 = vld [vmem:[#allocation68_spill] sm:$0xff] }
 0x24f   : > { %v3110_v10 = vsel %vm3021_vm2, %v3109_v33, %v3108_v11  ;;  %v3122_v28 = vsel %vm3018_vm1, %v3121_v43, %v3120_v45  ;;  %v3123_v0 = vrot.slane %v6494_v17, 5  ;;  %v3125_v19 = vrot.slane %v3010_v7, 4  ;;  %4875 = vmatprep.subr.bf16.mxu1 %v3400_v13  ;;  %v7212_v7 = vld [vmem:[#allocation54_spill] sm:$0xff]  ;;  %v7220_v2 = vld [vmem:[#allocation52_spill] sm:$0xff]  ;;  %v7229_v45 = vld [vmem:[#allocation31_spill] sm:$0xff] }
 0x250   : > { %v3112_v1 = vsel %vm3024_vm3, %v3111_v24, %v3110_v10  ;;  %v3127_v56 = vrot.slane %v3011_v26, 3  ;;  %v3129_v51 = vrot.slane %v3012_v34, 2  ;;  %v3131_v30 = vrot.slane %v3013_v50, 1  ;;  %4876 = vmatpush3.bf16.msra.mxu1 %v3400_v13  ;;  %v7222_v50 = vld [vmem:[#allocation58_spill] sm:$0xff]  ;;  %v7225_v33 = vld [vmem:[#allocation56_spill] sm:$0xff] }
 0x251   : > { %v3114_v14 = vsel %vm3027_vm4, %v3113_v29, %v3112_v1  ;;  %v3124_v57 = vsel %vm3021_vm2, %v3123_v0, %v3122_v28  ;;  %v2437_v5 = vrot.slane %v7210_v41, %v5708_v39  ;;  %v2501_v61 = vrot.slane %v6446_v35, %v5708_v39  ;;  %v7227_v29 = vld [vmem:[#allocation59_spill] sm:$0xff]  ;;  %v7230_v0 = vld [vmem:[#allocation61_spill] sm:$0xff]  ;;  %v7234_v41 = vld [vmem:[#allocation64_spill] sm:$0xff] }
 0x252   : > { %v3116_v17 = vsel %vm3030_vm5, %v3115_v9, %v3114_v14  ;;  %v3126_v43 = vsel %vm3024_vm3, %v3125_v19, %v3124_v57  ;;  %v2833_v44 = vpack.c.bf16 %v7211_v63, %v7211_v63  ;;  %v2835_v25 = vpack.c.bf16 %v7212_v7, %v7212_v7 }
 0x253   : > { %v3118_v46 = vsel %vm3033_vm6, %v3117_v42, %v3116_v17  ;;  %v3128_v53 = vsel %vm3027_vm4, %v3127_v56, %v3126_v43  ;;  %v2837_v21 = vpack.c.bf16 %v2437_v5, %v2437_v5  ;;  %v2849_v55 = vpack.c.bf16 %v7213_v16, %v7213_v16  ;;  %v7232_v56 = vld [vmem:[#allocation57_spill] sm:$0xff] }
 0x254   : > { %v3130_v35 = vsel %vm3030_vm5, %v3129_v51, %v3128_v53  ;;  %v2851_v6 = vpack.c.bf16 %v7214_v27, %v7214_v27  ;;  %v2853_v18 = vpack.c.bf16 %v2501_v61, %v2501_v61  ;;  %v3258_v37 = vunpack.c.l.b16 %v2833_v44  ;;  %v7236_v17 = vld [vmem:[#allocation37_spill] sm:$0xff] }
 0x255   : > { %v3132_v20 = vsel %vm3033_vm6, %v3131_v30, %v3130_v35  ;;  %v3259_v23 = vunpack.c.l.b16 %v2835_v25  ;;  %v3260_v59 = vunpack.c.l.b16 %v2837_v21  ;;  %v3266_v32 = vunpack.c.l.b16 %v2849_v55  ;;  %v7233_v30 = vld [vmem:[#allocation36_spill] sm:$0xff]  ;;  %v7237_v25 = vld [vmem:[#allocation46_spill] sm:$0xff]  ;;  %v7238_v53 = vld [vmem:[#allocation45_spill] sm:$0xff] }
 0x256   : > { %v3136_v60 = vpack.c.b16 %v3132_v20, %v3118_v46  ;;  %v3267_v47 = vunpack.c.l.b16 %v2851_v6  ;;  %v3268_v8 = vunpack.c.l.b16 %v2853_v18  ;;  %v7217_v12 = vrot.slane %v7216_v38, 7  ;;  %v7242_v38 = vld [vmem:[#allocation33_spill] sm:$0xff] }
 0x257   : > { %v7219_v3 = vrot.slane %v7218_v36, 6  ;;  %v3349_v58 = vrot.slane %v3258_v37, 3  ;;  %v3351_v26 = vrot.slane %v3259_v23, 2  ;;  %v3353_v4 = vrot.slane %v3260_v59, 1 }
 0x258   : > { %v3342_v15 = vsel %vm3015_vm0, %v7217_v12, %v7215_v48  ;;  %3144 = vxpose.xlu0.c.b16.end [4/4] (short) %v3136_v60, 128  ;;  %v7221_v31 = vrot.slane %v7220_v2, 5  ;;  %v7224_v49 = vrot.slane %v7223_v54, 7  ;;  %v3363_v22 = vrot.slane %v3266_v32, 3  ;;  %v7239_v32 = vld [vmem:[#allocation32_spill] sm:$0xff]  ;;  %v7240_v60 = vld [vmem:[#allocation34_spill] sm:$0xff]  ;;  %v7247_v2 = vld [vmem:[#allocation35_spill] sm:$0xff] }
 0x259   : > { %v3344_v52 = vsel %vm3018_vm1, %v7219_v3, %v3342_v15  ;;  %v3365_v40 = vrot.slane %v3267_v47, 2  ;;  %v7226_v62 = vrot.slane %v7225_v33, 4  ;;  %v7228_v13 = vrot.slane %v7227_v29, 6 }
 0x25a   : > { %v3346_v34 = vsel %vm3021_vm2, %v7221_v31, %v3344_v52  ;;  %v3356_v11 = vsel %vm3015_vm0, %v7224_v49, %v7222_v50  ;;  %v3367_v42 = vrot.slane %v3268_v8, 1  ;;  %v2309_v10 = vrot.slane %v7229_v45, %v5708_v39  ;;  %v7244_v52 = vld [vmem:[#allocation41_spill] sm:$0xff]  ;;  %v7249_v50 = vld [vmem:[#allocation42_spill] sm:$0xff] }
 0x25b   : > { %v3348_v24 = vsel %vm3024_vm3, %v7226_v62, %v3346_v34  ;;  %v3358_v9 = vsel %vm3018_vm1, %v7228_v13, %v3356_v11  ;;  %v7231_v19 = vrot.slane %v7230_v0, 5  ;;  %v2373_v51 = vrot.slane %v7232_v56, %v5708_v39 }
 0x25c   : > { %v3350_v28 = vsel %vm3027_vm4, %v3349_v58, %v3348_v24  ;;  %v2801_v14 = vpack.c.bf16 %v7233_v30, %v7233_v30  ;;  %v7235_v5 = vrot.slane %v7234_v41, 4  ;;  %v2803_v43 = vpack.c.bf16 %v7236_v17, %v7236_v17  ;;  %v7245_v58 = vld [vmem:[#allocation43_spill] sm:$0xff]  ;;  %v7253_v24 = vld [vmem:[#allocation44_spill] sm:$0xff] }
 0x25d   : > { %v3360_v1 = vsel %vm3021_vm2, %v7231_v19, %v3358_v9  ;;  %v3352_v57 = vsel %vm3030_vm5, %v3351_v26, %v3350_v28  ;;  %v2805_v63 = vpack.c.bf16 %v2309_v10, %v2309_v10  ;;  %v2817_v46 = vpack.c.bf16 %v7237_v25, %v7237_v25  ;;  %v7256_v28 = vld [vmem:[#allocation47_spill] sm:$0xff]  ;;  %v7263_v25 = vld [vmem:[#allocation29_spill] sm:$0xff] }
 0x25e   : > { %v3362_v61 = vsel %vm3024_vm3, %v7235_v5, %v3360_v1  ;;  %v3354_v44 = vsel %vm3033_vm6, %v3353_v4, %v3352_v57  ;;  %v2819_v21 = vpack.c.bf16 %v7238_v53, %v7238_v53  ;;  %v2821_v55 = vpack.c.bf16 %v2373_v51, %v2373_v51  ;;  %v7258_v1 = vld [vmem:[#allocation40_spill] sm:$0xff]  ;;  %v7259_v51 = vld [vmem:[#allocation21_spill] sm:$0xff]  ;;  %v7260_v41 = vld [vmem:[#allocation23_spill] sm:$0xff] }
 0x25f   : > { %v3364_v7 = vsel %vm3027_vm4, %v3363_v22, %v3362_v61  ;;  %v3242_v35 = vunpack.c.l.b16 %v2801_v14  ;;  %v3243_v27 = vunpack.c.l.b16 %v2803_v43  ;;  %v3244_v18 = vunpack.c.l.b16 %v2805_v63  ;;  %v7261_v17 = vld [vmem:[#allocation27_spill] sm:$0xff] }
 0x260   : > { %v3366_v16 = vsel %vm3030_vm5, %v3365_v40, %v3364_v7  ;;  %v3250_v37 = vunpack.c.l.b16 %v2817_v46  ;;  %v3251_v20 = vunpack.c.l.b16 %v2819_v21  ;;  %v3252_v59 = vunpack.c.l.b16 %v2821_v55  ;;  %v7251_v40 = vld [vmem:[#allocation38_spill] sm:$0xff] }
 0x261   : > { %v3368_v6 = vsel %vm3033_vm6, %v3367_v42, %v3366_v16  ;;  %v7241_v47 = vrot.slane %v7240_v60, 7  ;;  %v3321_v48 = vrot.slane %v3242_v35, 3  ;;  %v7243_v12 = vrot.slane %v7242_v38, 6  ;;  %v7255_v42 = vld [vmem:[#allocation39_spill] sm:$0xff]  ;;  %v7264_v55 = vld [vmem:[#allocation30_spill] sm:$0xff] }
 0x262   : > { %v3399_v23 = vpack.c.b16 %v3368_v6, %v3354_v44  ;;  %v3323_v36 = vrot.slane %v3243_v27, 2  ;;  %v3325_v3 = vrot.slane %v3244_v18, 1  ;;  %v7246_v26 = vrot.slane %v7245_v58, 7  ;;  %v7262_v44 = vld [vmem:[#allocation28_spill] sm:$0xff] }
 0x263   : > { %v3314_v8 = vsel %vm3015_vm0, %v7241_v47, %v7239_v32  ;;  %v7248_v31 = vrot.slane %v7247_v2, 5  ;;  %v7250_v54 = vrot.slane %v7249_v50, 6  ;;  %v3335_v11 = vrot.slane %v3250_v37, 3 }
 0x264   : > { %v3316_v15 = vsel %vm3018_vm1, %v7243_v12, %v3314_v8  ;;  %v3328_v4 = vsel %vm3015_vm0, %v7246_v26, %v7244_v52  ;;  %4877 = vmatprep.subr.bf16.mxu1 %v3399_v23  ;;  %v3337_v22 = vrot.slane %v3251_v20, 2  ;;  %v7252_v33 = vrot.slane %v7251_v40, 4  ;;  %v7273_v26 = vld [vmem:[#allocation19_spill] sm:$0xff] }
 0x265   : > { %v3318_v34 = vsel %vm3021_vm2, %v7248_v31, %v3316_v15  ;;  %v3330_v49 = vsel %vm3018_vm1, %v7250_v54, %v3328_v4  ;;  %4878 = vmatpush3.bf16.msra.mxu1 %v3399_v23  ;;  %v7254_v29 = vrot.slane %v7253_v24, 5  ;;  %v3339_v9 = vrot.slane %v3252_v59, 1  ;;  %v7265_v23 = vld [vmem:[#allocation20_spill] sm:$0xff]  ;;  %v7266_v59 = vld [vmem:[#allocation18_spill] sm:$0xff]  ;;  %v7275_v31 = vld [vmem:[#allocation25_spill] sm:$0xff] }
 0x266   : > { %v3320_v62 = vsel %vm3024_vm3, %v7252_v33, %v3318_v34  ;;  %v2181_v45 = vrot.slane %v7255_v42, %v5708_v39  ;;  %v7257_v0 = vrot.slane %v7256_v28, 4  ;;  %v2245_v56 = vrot.slane %v7258_v1, %v5708_v39  ;;  %v7270_v15 = vld [vmem:[#allocation26_spill] sm:$0xff] }
 0x267   : > { %v3332_v13 = vsel %vm3021_vm2, %v7254_v29, %v3330_v49  ;;  %v3322_v10 = vsel %vm3027_vm4, %v3321_v48, %v3320_v62  ;;  %v2769_v30 = vpack.c.bf16 %v7259_v51, %v7259_v51  ;;  %v2771_v5 = vpack.c.bf16 %v7260_v41, %v7260_v41  ;;  %v7268_v48 = vld [vmem:[#allocation17_spill] sm:$0xff]  ;;  %v7277_v54 = vld [vmem:[#allocation22_spill] sm:$0xff]  ;;  %v3557_v51 = vld [vmem:[#allocation10 + $0x70] sm:$0xff] }
 0x268   : > { %v3334_v19 = vsel %vm3024_vm3, %v7257_v0, %v3332_v13  ;;  %v3324_v14 = vsel %vm3030_vm5, %v3323_v36, %v3322_v10  ;;  %v2773_v61 = vpack.c.bf16 %v2181_v45, %v2181_v45  ;;  %v3303_v43 = vrot.slane %v7261_v17, 5  ;;  %v7271_v36 = vld [vmem:[#allocation24_spill] sm:$0xff]  ;;  %v3552_v17 = vld [vmem:[#allocation10 + $0x48] sm:$0xff] }
 0x269   : > { %v3336_v57 = vsel %vm3027_vm4, %v3335_v11, %v3334_v19  ;;  %v2785_v7 = vpack.c.bf16 %v7262_v44, %v7262_v44  ;;  %v2787_v39 = vpack.c.bf16 %v7263_v25, %v7263_v25  ;;  %v3326_v46 = vsel %vm3033_vm6, %v3325_v3, %v3324_v14  ;;  %v3558_v19 = vld [vmem:[#allocation10 + $0x78] sm:$0xff]  ;;  %v3549_v25 = vld [vmem:[#allocation10 + $0x30] sm:$0xff] }
 0x26a   : > { %v3338_v63 = vsel %vm3030_vm5, %v3337_v22, %v3336_v57  ;;  %v2789_v21 = vpack.c.bf16 %v2245_v56, %v2245_v56  ;;  %v3226_v16 = vunpack.c.l.b16 %v2769_v30  ;;  %v3305_v35 = vrot.slane %v7264_v55, 4  ;;  %v3556_v30 = vld [vmem:[#allocation10 + $0x68] sm:$0xff]  ;;  %v3555_v57 = vld [vmem:[#allocation10 + $0x60] sm:$0xff]  ;;  %v3554_v41 = vld [vmem:[#allocation10 + $0x58] sm:$0xff] }
 0x26b   : > { %v3340_v53 = vsel %vm3033_vm6, %v3339_v9, %v3338_v63  ;;  %v3227_v6 = vunpack.c.l.b16 %v2771_v5  ;;  %v3234_v18 = vunpack.c.l.b16 %v2785_v7  ;;  %v3228_v37 = vunpack.c.l.b16 %v2773_v61  ;;  %v3553_v61 = vld [vmem:[#allocation10 + $0x50] sm:$0xff]  ;;  %v3551_v63 = vld [vmem:[#allocation10 + $0x40] sm:$0xff]  ;;  %v3550_v44 = vld [vmem:[#allocation10 + $0x38] sm:$0xff] }
 0x26c   : > { %v3398_v27 = vpack.c.b16 %v3340_v53, %v3326_v46  ;;  %v3235_v20 = vunpack.c.l.b16 %v2787_v39  ;;  %v7267_v32 = vrot.slane %v7266_v59, 7  ;;  %v3293_v47 = vrot.slane %v3226_v16, 3  ;;  %v3548_v39 = vld [vmem:[#allocation10 + $0x28] sm:$0xff]  ;;  %v3547_v53 = vld [vmem:[#allocation10 + $0x20] sm:$0xff]  ;;  %v3546_v16 = vld [vmem:[#allocation10 + $0x18] sm:$0xff] }
 0x26d   : > { %v3236_v8 = vunpack.c.l.b16 %v2789_v21  ;;  %v7269_v38 = vrot.slane %v7268_v48, 6  ;;  %v7272_v3 = vrot.slane %v7271_v36, 7  ;;  %v3307_v58 = vrot.slane %v3234_v18, 3  ;;  %v3545_v55 = vld [vmem:[#allocation10 + $0x10] sm:$0xff] }
 0x26e   : > { %v3286_v60 = vsel %vm3015_vm0, %v7267_v32, %v7265_v23  ;;  %4879 = vmatprep.subr.bf16.mxu1 %v3398_v27  ;;  %v7274_v4 = vrot.slane %v7273_v26, 5  ;;  %v7276_v34 = vrot.slane %v7275_v31, 6  ;;  %v7278_v49 = vrot.slane %v7277_v54, 4 }
 0x26f   : > { %v3288_v12 = vsel %vm3018_vm1, %v7269_v38, %v3286_v60  ;;  %v3300_v52 = vsel %vm3015_vm0, %v7272_v3, %v7270_v15  ;;  %4880 = vmatpush3.bf16.msra.mxu1 %v3398_v27  ;;  %v3295_v22 = vrot.slane %v3227_v6, 2  ;;  %v3309_v24 = vrot.slane %v3235_v20, 2  ;;  %v3543_v27 = vld [vmem:[#allocation10] sm:$0xff] }
 0x270   : > { %v3290_v2 = vsel %vm3021_vm2, %v7274_v4, %v3288_v12  ;;  %v3302_v50 = vsel %vm3018_vm1, %v7276_v34, %v3300_v52  ;;  %v3297_v13 = vrot.slane %v3228_v37, 1  ;;  %v3311_v42 = vrot.slane %v3236_v8, 1 }
 0x271   : > { %v3292_v11 = vsel %vm3024_vm3, %v7278_v49, %v3290_v2  ;;  %v3304_v40 = vsel %vm3021_vm2, %v3303_v43, %v3302_v50 }
 0x272   : > { %v3294_v33 = vsel %vm3027_vm4, %v3293_v47, %v3292_v11  ;;  %v3306_v62 = vsel %vm3024_vm3, %v3305_v35, %v3304_v40  ;;  %v3544_v35 = vld [vmem:[#allocation10 + $0x8] sm:$0xff] }
 0x273   : > { %v3296_v29 = vsel %vm3030_vm5, %v3295_v22, %v3294_v33  ;;  %v3308_v9 = vsel %vm3027_vm4, %v3307_v58, %v3306_v62 }
 0x274   : > { %v3310_v45 = vsel %vm3030_vm5, %v3309_v24, %v3308_v9  ;;  %v3298_v10 = vsel %vm3033_vm6, %v3297_v13, %v3296_v29  ;;  %v5431_v29 = vmov 0.0   ;;  %v3704_v13 = vld [vmem:[#allocation9] sm:$0xff] }
 0x275   : > { %v3312_v28 = vsel %vm3033_vm6, %v3311_v42, %v3310_v45  ;;  %5011 = vmatprep.subr.mxu0 %v5431_v29  ;;  %5043 = vmatprep.mubr.msk.f32.mxu0 %vm5432_vm8, %v5431_v29 }
 0x276   : > { %v3397_v0 = vpack.c.b16 %v3312_v28, %v3298_v10 }
 0x278   : > { %4881 = vmatprep.subr.bf16.mxu1 %v3397_v0 }
 0x279   : > { %4882 = vmatpush3.bf16.msra.mxu1 %v3397_v0 }
 0x27a   : > { %4899 = vmatprep.subr.mxu1 %v3558_v19 }
 0x2ae   : > { %v3149_v1 = vpop.trf.xlu0 }
 0x2af   : > { %4883 = vmatprep.mubr.msk.bf16.mxu1 %vm3405_vm7, %v3149_v1 }
 0x2b2   : > { %v3150_v56 = vpop.trf.xlu0 }
 0x2b3   : > { %4884 = vmatmul.mubr.msk.bf16.vlgmr.msra.gmra.mxu1 %vm3405_vm7, %v3150_v56 }
 0x2b4   : > { %4900 = vmatpush3.msra.mxu1 %v3558_v19 }
 0x2b5   : > { %4901 = vmatprep.subr.mxu1 %v3557_v51 }
 0x2b6   : > { %v3151_v14 = vpop.trf.xlu0  ;;  %4902 = vmatpush3.msra.mxu1 %v3557_v51 }
 0x2b7   : > { %4887 = vmatprep.mubr.msk.bf16.mxu1 %vm3405_vm7, %v3151_v14  ;;  %4903 = vmatprep.subr.mxu1 %v3556_v30 }
 0x2b8   : > { %4904 = vmatpush3.msra.mxu1 %v3556_v30 }
 0x2b9   : > { %4905 = vmatprep.subr.mxu1 %v3555_v57 }
 0x2ba   : > { %v3152_v5 = vpop.trf.xlu0  ;;  %4906 = vmatpush3.msra.mxu1 %v3555_v57 }
 0x2bb   : > { %4888 = vmatmul.mubr.msk.bf16.gmra.mxu1 %vm3405_vm7, %v3152_v5  ;;  %4907 = vmatprep.subr.mxu1 %v3554_v41 }
 0x2bc   : > { %4908 = vmatpush3.msra.mxu1 %v3554_v41 }
 0x2bd   : > { %4909 = vmatprep.subr.mxu1 %v3553_v61 }
 0x2be   : > { %v3153_v43 = vpop.trf.xlu0  ;;  %4910 = vmatpush3.msra.mxu1 %v3553_v61 }
 0x2bf   : > { %4891 = vmatprep.mubr.msk.bf16.mxu1 %vm3405_vm7, %v3153_v43  ;;  %4911 = vmatprep.subr.mxu1 %v3552_v17  ;;  %v3706_v43 = vld [vmem:[#allocation9 + $0x10] sm:$0xff] }
 0x2c0   : > { %4912 = vmatpush3.msra.mxu1 %v3552_v17  ;;  %v3705_v17 = vld [vmem:[#allocation9 + $0x8] sm:$0xff] }
 0x2c1   : > { %4913 = vmatprep.subr.mxu1 %v3551_v63 }
 0x2c2   : > { %v3154_v7 = vpop.trf.xlu0  ;;  %4914 = vmatpush3.msra.mxu1 %v3551_v63  ;;  %v3707_v63 = vld [vmem:[#allocation9 + $0x18] sm:$0xff] }
 0x2c3   : > { %4892 = vmatmul.mubr.msk.bf16.gmra.mxu1 %vm3405_vm7, %v3154_v7  ;;  %4915 = vmatprep.subr.mxu1 %v3550_v44  ;;  %v3709_v7 = vld [vmem:[#allocation9 + $0x28] sm:$0xff] }
 0x2c4   : > { %4916 = vmatpush3.msra.mxu1 %v3550_v44  ;;  %v3708_v44 = vld [vmem:[#allocation9 + $0x20] sm:$0xff] }
 0x2c5   : > { %4917 = vmatprep.subr.mxu1 %v3549_v25 }
 0x2c6   : > { %v3155_v46 = vpop.trf.xlu0  ;;  %4918 = vmatpush3.msra.mxu1 %v3549_v25  ;;  %v3710_v25 = vld [vmem:[#allocation9 + $0x30] sm:$0xff] }
 0x2c7   : > { %4895 = vmatprep.mubr.msk.bf16.mxu1 %vm3405_vm7, %v3155_v46  ;;  %4919 = vmatprep.subr.mxu1 %v3548_v39  ;;  %v3712_v46 = vld [vmem:[#allocation9 + $0x40] sm:$0xff] }
 0x2c8   : > { %4920 = vmatpush3.msra.mxu1 %v3548_v39  ;;  %v3711_v39 = vld [vmem:[#allocation9 + $0x38] sm:$0xff] }
 0x2c9   : > { %4921 = vmatprep.subr.mxu1 %v3547_v53 }
 0x2ca   : > { %v3156_v21 = vpop.trf.xlu0  ;;  %4922 = vmatpush3.msra.mxu1 %v3547_v53  ;;  %v3713_v53 = vld [vmem:[#allocation9 + $0x48] sm:$0xff] }
 0x2cb   : > { %4896 = vmatmul.mubr.msk.bf16.gmra.mxu1 %vm3405_vm7, %v3156_v21  ;;  %4923 = vmatprep.subr.mxu1 %v3546_v16  ;;  %v3714_v21 = vld [vmem:[#allocation9 + $0x50] sm:$0xff] }
 0x2cc   : > { %4924 = vmatpush3.msra.mxu1 %v3546_v16  ;;  %v3715_v16 = vld [vmem:[#allocation9 + $0x58] sm:$0xff] }
 0x2cd   : > { %4925 = vmatprep.subr.mxu1 %v3545_v55 }
 0x2ce   : > { %4926 = vmatpush3.msra.mxu1 %v3545_v55  ;;  %v3716_v55 = vld [vmem:[#allocation9 + $0x60] sm:$0xff] }
 0x2cf   : > { %4927 = vmatprep.subr.mxu1 %v3544_v35 }
 0x2d0   : > { %4928 = vmatpush3.msra.mxu1 %v3544_v35  ;;  %v3717_v35 = vld [vmem:[#allocation9 + $0x68] sm:$0xff] }
 0x2d1   : > { %4929 = vmatprep.subr.mxu1 %v3543_v27 }
 0x2d2   : > { %4930 = vmatpush3.msra.mxu1 %v3543_v27  ;;  %v3718_v27 = vld [vmem:[#allocation9 + $0x70] sm:$0xff] }
 0x373   : > { %v4885_v6 = vpop.f32.mrf.mxu1 }
 0x374   : > { %v3529_v32 = vmul.f32 0.015625, %v4885_v6  ;;  %v3719_v6 = vld [vmem:[#allocation9 + $0x78] sm:$0xff] }
 0x375   : > { %v3464_v18 = vpop.f32.mrf.mxu1 }
 0x376   : > { %v3527_v37 = vmul.f32 0.015625, %v3464_v18  ;;  %v3945_v18 = vld [vmem:[%s7081_s4] sm:$0x1] }
 0x377   : > { %v4886_v20 = vpop.f32.mrf.mxu1 }
 0x378   : > { %4931 = vmatprep.mubr.f32.mxu1 %v3527_v37  ;;  %v3530_v8 = vmul.f32 0.015625, %v4886_v20  ;;  %v6790_v37 = vld [vmem:[%s5624_s30] sm:$0xff]  ;;  %v6793_v20 = vld [vmem:[%s5624_s30 + $0x8] sm:$0xff] }
 0x379   : > { %v3467_v23 = vpop.f32.mrf.mxu1 }
 0x37a   : > { %v3528_v59 = vmul.f32 0.015625, %v3467_v23  ;;  %v4052_v23 = vpack.c.bf16 %v6793_v20, %v6790_v37 }
 0x37b   : > { %v4889_v60 = vpop.f32.mrf.mxu1 }
 0x37c   : > { %4932 = vmatmul.mubr.f32.vlgmr.msra.gmra.mxu1 %v3528_v59  ;;  %v3533_v36 = vmul.f32 0.015625, %v4889_v60 }
 0x37d   : > { %v3480_v47 = vpop.f32.mrf.mxu1  ;;  %4934 = vmatprep.mubr.f32.mxu1 %v3529_v32 }
 0x37e   : > { %v3531_v48 = vmul.f32 0.015625, %v3480_v47 }
 0x37f   : > { %v4890_v38 = vpop.f32.mrf.mxu1 }
 0x380   : > { %4935 = vmatmul.mubr.f32.gmra.mxu1 %v3530_v8  ;;  %v3534_v58 = vmul.f32 0.015625, %v4890_v38 }
 0x381   : > { %v3483_v12 = vpop.f32.mrf.mxu1  ;;  %4937 = vmatprep.mubr.f32.mxu1 %v3531_v48 }
 0x382   : > { %v3532_v15 = vmul.f32 0.015625, %v3483_v12 }
 0x383   : > { %v4893_v3 = vpop.f32.mrf.mxu1 }
 0x384   : > { %4938 = vmatmul.mubr.f32.gmra.mxu1 %v3532_v15  ;;  %v3537_v34 = vmul.f32 0.015625, %v4893_v3 }
 0x385   : > { %v3496_v52 = vpop.f32.mrf.mxu1  ;;  %4940 = vmatprep.mubr.f32.mxu1 %v3533_v36 }
 0x386   : > { %v3535_v26 = vmul.f32 0.015625, %v3496_v52 }
 0x387   : > { %v4894_v4 = vpop.f32.mrf.mxu1 }
 0x388   : > { %4941 = vmatmul.mubr.f32.gmra.mxu1 %v3534_v58  ;;  %v3538_v49 = vmul.f32 0.015625, %v4894_v4 }
 0x389   : > { %v3499_v2 = vpop.f32.mrf.mxu1  ;;  %4943 = vmatprep.mubr.f32.mxu1 %v3535_v26 }
 0x38a   : > { %v3536_v31 = vmul.f32 0.015625, %v3499_v2 }
 0x38b   : > { %v4897_v50 = vpop.f32.mrf.mxu1 }
 0x38c   : > { %4944 = vmatmul.mubr.f32.gmra.mxu1 %v3536_v31  ;;  %v3541_v62 = vmul.f32 0.015625, %v4897_v50 }
 0x38d   : > { %v3512_v54 = vpop.f32.mrf.mxu1  ;;  %4946 = vmatprep.mubr.f32.mxu1 %v3537_v34 }
 0x38e   : > { %v3539_v11 = vmul.f32 0.015625, %v3512_v54 }
 0x38f   : > { %v4898_v22 = vpop.f32.mrf.mxu1 }
 0x390   : > { %4947 = vmatmul.mubr.f32.gmra.mxu1 %v3538_v49  ;;  %v3542_v24 = vmul.f32 0.015625, %v4898_v22 }
 0x391   : > { %v3515_v40 = vpop.f32.mrf.mxu1  ;;  %4949 = vmatprep.mubr.f32.mxu1 %v3539_v11 }
 0x392   : > { %v3540_v33 = vmul.f32 0.015625, %v3515_v40 }
 0x394   : > { %4950 = vmatmul.mubr.f32.gmra.mxu1 %v3540_v33 }
 0x395   : > { %4952 = vmatprep.mubr.f32.mxu1 %v3541_v62 }
 0x398   : > { %4953 = vmatmul.mubr.f32.gmra.mxu1 %v3542_v24 }
 0x399   : > { %4987 = vmatprep.mubr.f32.mxu1 %v3704_v13 }
 0x43c   : > { %v6750_v9 = vpop.f32.mrf.mxu1 }
 0x43e   : > { %v6752_v42 = vpop.f32.mrf.mxu1 }
 0x440   : > { %v6754_v45 = vpop.f32.mrf.mxu1 }
 0x442   : > { %v6756_v10 = vpop.f32.mrf.mxu1 }
 0x444   : > { %v4939_v28 = vpop.f32.mrf.mxu1 }
 0x446   : > { %v3645_v0 = vpop.f32.mrf.mxu1 }
 0x448   : > { %v4942_v19 = vpop.f32.mrf.mxu1 }
 0x44a   : > { %v3655_v1 = vpop.f32.mrf.mxu1 }
 0x44c   : > { %v4945_v56 = vpop.f32.mrf.mxu1 }
 0x44e   : > { %v3665_v51 = vpop.f32.mrf.mxu1 }
 0x450   : > { %v4948_v30 = vpop.f32.mrf.mxu1 }
 0x452   : > { %v3675_v14 = vpop.f32.mrf.mxu1 }
 0x454   : > { %v4951_v57 = vpop.f32.mrf.mxu1 }
 0x456   : > { %v3685_v41 = vpop.f32.mrf.mxu1 }
 0x458   : > { %v4954_v5 = vpop.f32.mrf.mxu1 }
 0x459   : > { %4955 = vmatprep.subr.mxu1 %v4954_v5  ;;  %5012 = vmatpush3.msra.mxu0 %v4954_v5 }
 0x45a   : > { %v3695_v61 = vpop.f32.mrf.mxu1  ;;  %4956 = vmatpush3.msra.mxu1 %v4954_v5  ;;  %5013 = vmatprep.subr.mxu0 %v5431_v29 }
 0x45b   : > { %4957 = vmatprep.subr.mxu1 %v3695_v61  ;;  %5014 = vmatpush3.msra.mxu0 %v3695_v61 }
 0x45c   : > { %4958 = vmatpush3.msra.mxu1 %v3695_v61  ;;  %5015 = vmatprep.subr.mxu0 %v5431_v29  ;;  %v6830_v61 = vld [vmem:[%s5624_s30 + $0x50] sm:$0xff] }
 0x45d   : > { %4959 = vmatprep.subr.mxu1 %v4951_v57  ;;  %5016 = vmatpush3.msra.mxu0 %v4951_v57 }
 0x45e   : > { %4960 = vmatpush3.msra.mxu1 %v4951_v57  ;;  %5017 = vmatprep.subr.mxu0 %v5431_v29  ;;  %v6823_v57 = vld [vmem:[%s5624_s30 + $0x48] sm:$0xff] }
 0x45f   : > { %4961 = vmatprep.subr.mxu1 %v3685_v41  ;;  %5018 = vmatpush3.msra.mxu0 %v3685_v41 }
 0x460   : > { %4962 = vmatpush3.msra.mxu1 %v3685_v41  ;;  %5019 = vmatprep.subr.mxu0 %v5431_v29 }
 0x461   : > { %4963 = vmatprep.subr.mxu1 %v4948_v30  ;;  %5020 = vmatpush3.msra.mxu0 %v4948_v30 }
 0x462   : > { %4964 = vmatpush3.msra.mxu1 %v4948_v30  ;;  %5021 = vmatprep.subr.mxu0 %v5431_v29  ;;  %v6817_v30 = vld [vmem:[%s5624_s30 + $0x38] sm:$0xff] }
 0x463   : > { %4965 = vmatprep.subr.mxu1 %v3675_v14  ;;  %5022 = vmatpush3.msra.mxu0 %v3675_v14 }
 0x464   : > { %4966 = vmatpush3.msra.mxu1 %v3675_v14  ;;  %5023 = vmatprep.subr.mxu0 %v5431_v29  ;;  %v6820_v14 = vld [vmem:[%s5624_s30 + $0x40] sm:$0xff] }
 0x465   : > { %4967 = vmatprep.subr.mxu1 %v4945_v56  ;;  %5024 = vmatpush3.msra.mxu0 %v4945_v56  ;;  %v4056_v5 = vpack.c.bf16 %v6823_v57, %v6820_v14 }
 0x466   : > { %4968 = vmatpush3.msra.mxu1 %v4945_v56  ;;  %5025 = vmatprep.subr.mxu0 %v5431_v29 }
 0x467   : > { %4969 = vmatprep.subr.mxu1 %v3665_v51  ;;  %5026 = vmatpush3.msra.mxu0 %v3665_v51 }
 0x468   : > { %4970 = vmatpush3.msra.mxu1 %v3665_v51  ;;  %5027 = vmatprep.subr.mxu0 %v5431_v29  ;;  %v6814_v51 = vld [vmem:[%s5624_s30 + $0x30] sm:$0xff] }
 0x469   : > { %4971 = vmatprep.subr.mxu1 %v4942_v19  ;;  %5028 = vmatpush3.msra.mxu0 %v4942_v19  ;;  %v4055_v41 = vpack.c.bf16 %v6817_v30, %v6814_v51 }
 0x46a   : > { %4972 = vmatpush3.msra.mxu1 %v4942_v19  ;;  %5029 = vmatprep.subr.mxu0 %v5431_v29  ;;  %v6807_v19 = vld [vmem:[%s5624_s30 + $0x28] sm:$0xff] }
 0x46b   : > { %4973 = vmatprep.subr.mxu1 %v3655_v1  ;;  %5030 = vmatpush3.msra.mxu0 %v3655_v1 }
 0x46c   : > { %4974 = vmatpush3.msra.mxu1 %v3655_v1  ;;  %5031 = vmatprep.subr.mxu0 %v5431_v29 }
 0x46d   : > { %4975 = vmatprep.subr.mxu1 %v4939_v28  ;;  %5032 = vmatpush3.msra.mxu0 %v4939_v28 }
 0x46e   : > { %4976 = vmatpush3.msra.mxu1 %v4939_v28  ;;  %5033 = vmatprep.subr.mxu0 %v5431_v29  ;;  %v6801_v28 = vld [vmem:[%s5624_s30 + $0x18] sm:$0xff] }
 0x46f   : > { %4977 = vmatprep.subr.mxu1 %v3645_v0  ;;  %5034 = vmatpush3.msra.mxu0 %v3645_v0 }
 0x470   : > { %4978 = vmatpush3.msra.mxu1 %v3645_v0  ;;  %5035 = vmatprep.subr.mxu0 %v5431_v29  ;;  %v6804_v0 = vld [vmem:[%s5624_s30 + $0x20] sm:$0xff] }
 0x471   : > { %4979 = vmatprep.subr.mxu1 %v6754_v45  ;;  %5036 = vmatpush3.msra.mxu0 %v6754_v45  ;;  %v4054_v56 = vpack.c.bf16 %v6807_v19, %v6804_v0 }
 0x472   : > { %4980 = vmatpush3.msra.mxu1 %v6754_v45  ;;  %5037 = vmatprep.subr.mxu0 %v5431_v29 }
 0x473   : > { %4981 = vmatprep.subr.mxu1 %v6756_v10  ;;  %5038 = vmatpush3.msra.mxu0 %v6756_v10 }
 0x474   : > { %4982 = vmatpush3.msra.mxu1 %v6756_v10  ;;  %5039 = vmatprep.subr.mxu0 %v5431_v29  ;;  %v6798_v10 = vld [vmem:[%s5624_s30 + $0x10] sm:$0xff] }
 0x475   : > { %4983 = vmatprep.subr.mxu1 %v6750_v9  ;;  %5040 = vmatpush3.msra.mxu0 %v6750_v9  ;;  %v4053_v1 = vpack.c.bf16 %v6801_v28, %v6798_v10 }
 0x476   : > { %4984 = vmatpush3.msra.mxu1 %v6750_v9  ;;  %5041 = vmatprep.subr.mxu0 %v5431_v29 }
 0x477   : > { %4985 = vmatprep.subr.mxu1 %v6752_v42  ;;  %5042 = vmatpush3.msra.mxu0 %v6752_v42 }
 0x478   : > { %4986 = vmatpush3.msra.mxu1 %v6752_v42  ;;  %5044 = vmatmul.mubr.f32.vlgmr.msra.gmra.mxu0 %v3945_v18 }
 0x479   : > { %4988 = vmatmul.mubr.f32.vlgmr.msra.gmra.mxu1 %v3705_v17  ;;  %v6833_v17 = vld [vmem:[%s5624_s30 + $0x58] sm:$0xff] }
 0x47a   : > { %4990 = vmatprep.mubr.f32.mxu1 %v3706_v43  ;;  %v6836_v43 = vld [vmem:[%s5624_s30 + $0x60] sm:$0xff] }
 0x47d   : > { %4991 = vmatmul.mubr.f32.gmra.mxu1 %v3707_v63  ;;  %v6839_v63 = vld [vmem:[%s5624_s30 + $0x68] sm:$0xff] }
 0x47e   : > { %4993 = vmatprep.mubr.f32.mxu1 %v3708_v44  ;;  %v4057_v44 = vpack.c.bf16 %v6833_v17, %v6830_v61 }
 0x481   : > { %4994 = vmatmul.mubr.f32.gmra.mxu1 %v3709_v7  ;;  %v4058_v7 = vpack.c.bf16 %v6839_v63, %v6836_v43 }
 0x482   : > { %4996 = vmatprep.mubr.f32.mxu1 %v3710_v25  ;;  %v6846_v25 = vld [vmem:[%s5624_s30 + $0x70] sm:$0xff] }
 0x485   : > { %4997 = vmatmul.mubr.f32.gmra.mxu1 %v3711_v39  ;;  %v6849_v39 = vld [vmem:[%s5624_s30 + $0x78] sm:$0xff] }
 0x486   : > { %4999 = vmatprep.mubr.f32.mxu1 %v3712_v46  ;;  %v6852_v46 = vld [vmem:[%s5624_s30 + $0x80] sm:$0xff] }
 0x489   : > { %5000 = vmatmul.mubr.f32.gmra.mxu1 %v3713_v53  ;;  %v6855_v53 = vld [vmem:[%s5624_s30 + $0x88] sm:$0xff] }
 0x48a   : > { %5002 = vmatprep.mubr.f32.mxu1 %v3714_v21  ;;  %v4059_v21 = vpack.c.bf16 %v6849_v39, %v6846_v25 }
 0x48d   : > { %5003 = vmatmul.mubr.f32.gmra.mxu1 %v3715_v16  ;;  %v4060_v16 = vpack.c.bf16 %v6855_v53, %v6852_v46 }
 0x48e   : > { %5005 = vmatprep.mubr.f32.mxu1 %v3716_v55  ;;  %v6862_v55 = vld [vmem:[%s5624_s30 + $0x90] sm:$0xff] }
 0x491   : > { %5006 = vmatmul.mubr.f32.gmra.mxu1 %v3717_v35  ;;  %v6865_v35 = vld [vmem:[%s5624_s30 + $0x98] sm:$0xff] }
 0x492   : > { %5008 = vmatprep.mubr.f32.mxu1 %v3718_v27  ;;  %v6868_v27 = vld [vmem:[%s5624_s30 + $0xa0] sm:$0xff]  ;;  %v4061_v18 = vpack.c.bf16 %v6865_v35, %v6862_v55 }
 0x495   : > { %5009 = vmatmul.mubr.f32.gmra.mxu1 %v3719_v6  ;;  %v6871_v6 = vld [vmem:[%s5624_s30 + $0xa8] sm:$0xff] }
 0x496   : > { %5062 = vmatprep.mubr.bf16.mxu1 %v4052_v23  ;;  %v4062_v23 = vpack.c.bf16 %v6871_v6, %v6868_v27 }
 0x539   : > { %v4989_v59 = vpop.f32.mrf.mxu1 }
 0x53b   : > { %v3786_v32 = vpop.f32.mrf.mxu1 }
 0x53c   : > { %v4714_v60 = vpack.c.bf16 %v4989_v59, %v3786_v32  ;;  %v6878_v59 = vld [vmem:[%s5624_s30 + $0xb0] sm:$0xff]  ;;  %v6881_v32 = vld [vmem:[%s5624_s30 + $0xb8] sm:$0xff] }
 0x53d   : > { %v4992_v47 = vpop.f32.mrf.mxu1 }
 0x53e   : > { %4715 = vst [vmem:[#allocation2] sm:$0xff] %v4714_v60   ;;  %v6884_v60 = vld [vmem:[%s5624_s30 + $0xc0] sm:$0xff] }
 0x53f   : > { %v3796_v8 = vpop.f32.mrf.mxu1 }
 0x540   : > { %v4719_v48 = vpack.c.bf16 %v4992_v47, %v3796_v8  ;;  %v6887_v47 = vld [vmem:[%s5624_s30 + $0xc8] sm:$0xff]  ;;  %v4063_v8 = vpack.c.bf16 %v6881_v32, %v6878_v59 }
 0x541   : > { %v4995_v38 = vpop.f32.mrf.mxu1 }
 0x542   : > { %4751 = vst [vmem:[#allocation2 + $0x8] sm:$0xff] %v4719_v48   ;;  %v4064_v48 = vpack.c.bf16 %v6887_v47, %v6884_v60 }
 0x543   : > { %v3806_v12 = vpop.f32.mrf.mxu1 }
 0x544   : > { %v4724_v15 = vpack.c.bf16 %v4995_v38, %v3806_v12  ;;  %v6894_v38 = vld [vmem:[%s5624_s30 + $0xd0] sm:$0xff]  ;;  %v6897_v12 = vld [vmem:[%s5624_s30 + $0xd8] sm:$0xff] }
 0x545   : > { %v4998_v36 = vpop.f32.mrf.mxu1  ;;  %v5226_v45 = vld [vmem:[#allocation2] sm:$0xff]  }
 0x546   : > { %4752 = vst [vmem:[#allocation2 + $0x10] sm:$0xff] %v4724_v15   ;;  %v6900_v15 = vld [vmem:[%s5624_s30 + $0xe0] sm:$0xff] }
 0x547   : > { %v3816_v3 = vpop.f32.mrf.mxu1 }
 0x548   : > { %v4729_v52 = vpack.c.bf16 %v4998_v36, %v3816_v3  ;;  %v6903_v36 = vld [vmem:[%s5624_s30 + $0xe8] sm:$0xff]  ;;  %v4065_v3 = vpack.c.bf16 %v6897_v12, %v6894_v38 }
 0x549   : > { %v5001_v58 = vpop.f32.mrf.mxu1  ;;  %v5225_v42 = vld [vmem:[#allocation2 + $0x8] sm:$0xff]  }
 0x54a   : > { %4753 = vst [vmem:[#allocation2 + $0x18] sm:$0xff] %v4729_v52   ;;  %v4066_v52 = vpack.c.bf16 %v6903_v36, %v6900_v15 }
 0x54b   : > { %v3826_v26 = vpop.f32.mrf.mxu1 }
 0x54c   : > { %v4734_v4 = vpack.c.bf16 %v5001_v58, %v3826_v26  ;;  %v6910_v58 = vld [vmem:[%s5624_s30 + $0xf0] sm:$0xff]  ;;  %v6913_v26 = vld [vmem:[%s5624_s30 + $0xf8] sm:$0xff]  ;;  %s5337_s30 = sshll.u32 %s5433_s21, 4  ;;  %s5338_s30 = int_to_ptr.vmem [resolvable:$false] %s5337_s30 }
 0x54d   : > { %v5004_v2 = vpop.f32.mrf.mxu1  ;;  %v5224_v9 = vld [vmem:[#allocation2 + $0x10] sm:$0xff]   ;;  %s5339_s1 = scalar_lea.vmem %s5338_s30, 8192  ;;  %p5340_p0 = scmp.lt.s32.totalorder %s7026_s18, %s5338_s30 }
 0x54e   : > { %4754 = vst [vmem:[#allocation2 + $0x20] sm:$0xff] %v4734_v4   ;;  %v4067_v4 = vpack.c.bf16 %v6913_v26, %v6910_v58  ;;  %p5341_p3 = scmp.lt.s32.totalorder %s5339_s1, %s5333_s5 }
 0x54f   : > { %v3836_v31 = vpop.f32.mrf.mxu1 }
 0x550   : > { %v4739_v34 = vpack.c.bf16 %v5004_v2, %v3836_v31  ;;  %v3946_v2 = vld [vmem:[%s7083_s6] sm:$0x1]  ;;  %v4013_v31 = vpop.f32.mrf.mxu0  ;;  %p5342_p2 = por %p5341_p3, %p5340_p0 }
 0x551   : > { %v5007_v50 = vpop.f32.mrf.mxu1  ;;  %v5223_v13 = vld [vmem:[#allocation2 + $0x18] sm:$0xff]  }
 0x552   : > { %4755 = vst [vmem:[#allocation2 + $0x28] sm:$0xff] %v4739_v34   ;;  %v4014_v34 = vadd.f32 %v4013_v31, %v3946_v2  ;;  %p5343_p11 = pnand %p5342_p2, %p5336_p13 }
 0x553   : > { %v3846_v54 = vpop.f32.mrf.mxu1 }
 0x554   : > { %v4744_v49 = vpack.c.bf16 %v5007_v50, %v3846_v54  ;;  %v5045_v50 = vpop.f32.mrf.mxu0  ;;  %4017 = vst [vmem:[#allocation3] sm:$0x1] %v4014_v34 }
 0x555   : > { %v5010_v11 = vpop.f32.mrf.mxu1  ;;  %v5222_v29 = vld [vmem:[#allocation2 + $0x20] sm:$0xff]  }
 0x556   : > { %4756 = vst [vmem:[#allocation2 + $0x30] sm:$0xff] %v4744_v49  }
 0x557   : > { %v3856_v22 = vpop.f32.mrf.mxu1 }
 0x558   : > { %v4749_v40 = vpack.c.bf16 %v5010_v11, %v3856_v22 }
 0x559   : > { %v5221_v24 = vld [vmem:[#allocation2 + $0x28] sm:$0xff]  }
 0x55a   : > { %4757 = vst [vmem:[#allocation2 + $0x38] sm:$0xff] %v4749_v40  }
 0x55b   : > { %v6920_v54 = vld [vmem:[#allocation3] ss:$0 sm:$0xff] }
 0x55d   : > { %v5220_v62 = vld [vmem:[#allocation2 + $0x30] sm:$0xff]  }
 0x561   : > { %v5219_v33 = vld [vmem:[#allocation2 + $0x38] sm:$0xff]  }
 0x562   : > { %5046 = vmatprep.subr.bf16.mxu1 %v5219_v33 }
 0x563   : > { %5047 = vmatpush3.bf16.msra.mxu1 %v5219_v33 }
 0x564   : > { %5048 = vmatprep.subr.bf16.mxu1 %v5220_v62 }
 0x567   : > { %5049 = vmatpush3.bf16.msra.mxu1 %v5220_v62 }
 0x568   : > { %5050 = vmatprep.subr.bf16.mxu1 %v5221_v24 }
 0x56b   : > { %5051 = vmatpush3.bf16.msra.mxu1 %v5221_v24 }
 0x56c   : > { %5052 = vmatprep.subr.bf16.mxu1 %v5222_v29 }
 0x56f   : > { %5053 = vmatpush3.bf16.msra.mxu1 %v5222_v29 }
 0x570   : > { %5054 = vmatprep.subr.bf16.mxu1 %v5223_v13 }
 0x573   : > { %5055 = vmatpush3.bf16.msra.mxu1 %v5223_v13 }
 0x574   : > { %5056 = vmatprep.subr.bf16.mxu1 %v5224_v9 }
 0x577   : > { %5057 = vmatpush3.bf16.msra.mxu1 %v5224_v9 }
 0x578   : > { %5058 = vmatprep.subr.bf16.mxu1 %v5225_v42 }
 0x57b   : > { %5059 = vmatpush3.bf16.msra.mxu1 %v5225_v42 }
 0x57c   : > { %5060 = vmatprep.subr.bf16.mxu1 %v5226_v45 }
 0x57f   : > { %5061 = vmatpush3.bf16.msra.mxu1 %v5226_v45 }
 0x582   : > { %5063 = vmatmul.mubr.bf16.vlgmr.msra.gmra.mxu1 %v4053_v1 }
 0x583   : > { %5066 = vmatprep.mubr.bf16.mxu1 %v4054_v56 }
 0x58a   : > { %5067 = vmatmul.mubr.bf16.gmra.mxu1 %v4055_v41 }
 0x58b   : > { %5070 = vmatprep.mubr.bf16.mxu1 %v4056_v5 }
 0x592   : > { %5071 = vmatmul.mubr.bf16.gmra.mxu1 %v4057_v44 }
 0x593   : > { %5074 = vmatprep.mubr.bf16.mxu1 %v4058_v7 }
 0x59a   : > { %5075 = vmatmul.mubr.bf16.gmra.mxu1 %v4059_v21 }
 0x59b   : > { %5078 = vmatprep.mubr.bf16.mxu1 %v4060_v16 }
 0x5a2   : > { %5079 = vmatmul.mubr.bf16.gmra.mxu1 %v4061_v18 }
 0x5a3   : > { %5082 = vmatprep.mubr.bf16.mxu1 %v4062_v23 }
 0x5aa   : > { %5083 = vmatmul.mubr.bf16.gmra.mxu1 %v4063_v8 }
 0x5ab   : > { %5086 = vmatprep.mubr.bf16.mxu1 %v4064_v48 }
 0x5b2   : > { %5087 = vmatmul.mubr.bf16.gmra.mxu1 %v4065_v3 }
 0x5b3   : > { %5090 = vmatprep.mubr.bf16.mxu1 %v4066_v52 }
 0x5ba   : > { %5091 = vmatmul.mubr.bf16.gmra.mxu1 %v4067_v4 }
 0x642   : > { %v5064_v49 = vpop.f32.mrf.mxu1 }
 0x643   : > { %v4182_v11 = vadd.f32 %v5064_v49, %v6920_v54 }
 0x644   : > { %v4173_v22 = vpop.f32.mrf.mxu1 }
 0x645   : > { %v4302_v40 = vadd.f32 %v4182_v11, %v6798_v10  ;;  %v4174_v33 = vadd.f32 %v6920_v54, %v4173_v22 }
 0x646   : > { %v5065_v62 = vpop.f32.mrf.mxu1 }
 0x647   : > { %4334 = vst [vmem:[%s6927_s10 + $0x10] sm:$0xff] %v4302_v40  ;;  %v4300_v24 = vadd.f32 %v4174_v33, %v6790_v37  ;;  %v4185_v29 = vadd.f32 %v5065_v62, %v6920_v54 }
 0x648   : > { %v4176_v13 = vpop.f32.mrf.mxu1 }
 0x649   : > { %4332 = vst [vmem:[%s6927_s10] sm:$0xff] %v4300_v24  ;;  %v4303_v9 = vadd.f32 %v4185_v29, %v6801_v28  ;;  %v4177_v42 = vadd.f32 %v6920_v54, %v4176_v13 }
 0x64a   : > { %v5068_v45 = vpop.f32.mrf.mxu1 }
 0x64b   : > { %4335 = vst [vmem:[%s6927_s10 + $0x18] sm:$0xff] %v4303_v9  ;;  %v4301_v10 = vadd.f32 %v4177_v42, %v6793_v20  ;;  %v4198_v1 = vadd.f32 %v5068_v45, %v6920_v54 }
 0x64c   : > { %v4189_v56 = vpop.f32.mrf.mxu1 }
 0x64d   : > { %4333 = vst [vmem:[%s6927_s10 + $0x8] sm:$0xff] %v4301_v10  ;;  %v4306_v37 = vadd.f32 %v4198_v1, %v6814_v51  ;;  %v4190_v41 = vadd.f32 %v6920_v54, %v4189_v56 }
 0x64e   : > { %v5069_v5 = vpop.f32.mrf.mxu1 }
 0x64f   : > { %4338 = vst [vmem:[%s6927_s10 + $0x30] sm:$0xff] %v4306_v37  ;;  %v4304_v28 = vadd.f32 %v4190_v41, %v6804_v0  ;;  %v4201_v44 = vadd.f32 %v5069_v5, %v6920_v54 }
 0x650   : > { %v4192_v7 = vpop.f32.mrf.mxu1 }
 0x651   : > { %4336 = vst [vmem:[%s6927_s10 + $0x20] sm:$0xff] %v4304_v28  ;;  %v4307_v20 = vadd.f32 %v4201_v44, %v6817_v30  ;;  %v4193_v21 = vadd.f32 %v6920_v54, %v4192_v7 }
 0x652   : > { %v5072_v16 = vpop.f32.mrf.mxu1 }
 0x653   : > { %4339 = vst [vmem:[%s6927_s10 + $0x38] sm:$0xff] %v4307_v20  ;;  %v4305_v51 = vadd.f32 %v4193_v21, %v6807_v19  ;;  %v4214_v18 = vadd.f32 %v5072_v16, %v6920_v54 }
 0x654   : > { %v4205_v23 = vpop.f32.mrf.mxu1 }
 0x655   : > { %4337 = vst [vmem:[%s6927_s10 + $0x28] sm:$0xff] %v4305_v51  ;;  %v4310_v0 = vadd.f32 %v4214_v18, %v6830_v61  ;;  %v4206_v8 = vadd.f32 %v6920_v54, %v4205_v23 }
 0x656   : > { %v5073_v48 = vpop.f32.mrf.mxu1 }
 0x657   : > { %4342 = vst [vmem:[%s6927_s10 + $0x50] sm:$0xff] %v4310_v0  ;;  %v4308_v30 = vadd.f32 %v4206_v8, %v6820_v14  ;;  %v4217_v3 = vadd.f32 %v5073_v48, %v6920_v54 }
 0x658   : > { %v4208_v52 = vpop.f32.mrf.mxu1 }
 0x659   : > { %4340 = vst [vmem:[%s6927_s10 + $0x40] sm:$0xff] %v4308_v30  ;;  %v4311_v19 = vadd.f32 %v4217_v3, %v6833_v17  ;;  %v4209_v4 = vadd.f32 %v6920_v54, %v4208_v52 }
 0x65a   : > { %v5076_v2 = vpop.f32.mrf.mxu1 }
 0x65b   : > { %4343 = vst [vmem:[%s6927_s10 + $0x58] sm:$0xff] %v4311_v19  ;;  %v4309_v61 = vadd.f32 %v4209_v4, %v6823_v57  ;;  %v4230_v31 = vadd.f32 %v5076_v2, %v6920_v54 }
 0x65c   : > { %v4221_v34 = vpop.f32.mrf.mxu1 }
 0x65d   : > { %4341 = vst [vmem:[%s6927_s10 + $0x48] sm:$0xff] %v4309_v61  ;;  %v4314_v14 = vadd.f32 %v4230_v31, %v6846_v25  ;;  %v4222_v50 = vadd.f32 %v6920_v54, %v4221_v34 }
 0x65e   : > { %v5077_v49 = vpop.f32.mrf.mxu1 }
 0x65f   : > { %4346 = vst [vmem:[%s6927_s10 + $0x70] sm:$0xff] %v4314_v14  ;;  %v4312_v17 = vadd.f32 %v4222_v50, %v6836_v43  ;;  %v4233_v11 = vadd.f32 %v5077_v49, %v6920_v54 }
 0x660   : > { %v4224_v22 = vpop.f32.mrf.mxu1 }
 0x661   : > { %4344 = vst [vmem:[%s6927_s10 + $0x60] sm:$0xff] %v4312_v17  ;;  %v4315_v57 = vadd.f32 %v4233_v11, %v6849_v39  ;;  %v4225_v40 = vadd.f32 %v6920_v54, %v4224_v22 }
 0x662   : > { %v5080_v33 = vpop.f32.mrf.mxu1 }
 0x663   : > { %4347 = vst [vmem:[%s6927_s10 + $0x78] sm:$0xff] %v4315_v57  ;;  %v4313_v25 = vadd.f32 %v4225_v40, %v6839_v63  ;;  %v4246_v62 = vadd.f32 %v5080_v33, %v6920_v54 }
 0x664   : > { %v4237_v24 = vpop.f32.mrf.mxu1 }
 0x665   : > { %4345 = vst [vmem:[%s6927_s10 + $0x68] sm:$0xff] %v4313_v25  ;;  %v4318_v43 = vadd.f32 %v4246_v62, %v6862_v55  ;;  %v4238_v29 = vadd.f32 %v6920_v54, %v4237_v24 }
 0x666   : > { %v5081_v13 = vpop.f32.mrf.mxu1 }
 0x667   : > { %4350 = vst [vmem:[%s6927_s10 + $0x90] sm:$0xff] %v4318_v43  ;;  %v4316_v39 = vadd.f32 %v4238_v29, %v6852_v46  ;;  %v4249_v9 = vadd.f32 %v5081_v13, %v6920_v54 }
 0x668   : > { %v4240_v42 = vpop.f32.mrf.mxu1 }
 0x669   : > { %4348 = vst [vmem:[%s6927_s10 + $0x80] sm:$0xff] %v4316_v39  ;;  %v4319_v63 = vadd.f32 %v4249_v9, %v6865_v35  ;;  %v4241_v45 = vadd.f32 %v6920_v54, %v4240_v42 }
 0x66a   : > { %v5084_v10 = vpop.f32.mrf.mxu1 }
 0x66b   : > { %4351 = vst [vmem:[%s6927_s10 + $0x98] sm:$0xff] %v4319_v63  ;;  %v4317_v55 = vadd.f32 %v4241_v45, %v6855_v53  ;;  %v4262_v1 = vadd.f32 %v5084_v10, %v6920_v54 }
 0x66c   : > { %v4253_v56 = vpop.f32.mrf.mxu1 }
 0x66d   : > { %4349 = vst [vmem:[%s6927_s10 + $0x88] sm:$0xff] %v4317_v55  ;;  %v4322_v46 = vadd.f32 %v4262_v1, %v6878_v59  ;;  %v4254_v37 = vadd.f32 %v6920_v54, %v4253_v56 }
 0x66e   : > { %v5085_v41 = vpop.f32.mrf.mxu1 }
 0x66f   : > { %4354 = vst [vmem:[%s6927_s10 + $0xb0] sm:$0xff] %v4322_v46  ;;  %v4320_v35 = vadd.f32 %v4254_v37, %v6868_v27  ;;  %v4265_v5 = vadd.f32 %v5085_v41, %v6920_v54 }
 0x670   : > { %v4256_v28 = vpop.f32.mrf.mxu1 }
 0x671   : > { %4352 = vst [vmem:[%s6927_s10 + $0xa0] sm:$0xff] %v4320_v35  ;;  %v4323_v53 = vadd.f32 %v4265_v5, %v6881_v32  ;;  %v4257_v44 = vadd.f32 %v6920_v54, %v4256_v28 }
 0x672   : > { %v5088_v7 = vpop.f32.mrf.mxu1 }
 0x673   : > { %4355 = vst [vmem:[%s6927_s10 + $0xb8] sm:$0xff] %v4323_v53  ;;  %v4321_v59 = vadd.f32 %v4257_v44, %v6871_v6  ;;  %v4278_v20 = vadd.f32 %v5088_v7, %v6920_v54 }
 0x674   : > { %v4269_v21 = vpop.f32.mrf.mxu1 }
 0x675   : > { %4353 = vst [vmem:[%s6927_s10 + $0xa8] sm:$0xff] %v4321_v59  ;;  %v4326_v27 = vadd.f32 %v4278_v20, %v6894_v38  ;;  %v4270_v16 = vadd.f32 %v6920_v54, %v4269_v21 }
 0x676   : > { %v5089_v51 = vpop.f32.mrf.mxu1 }
 0x677   : > { %4358 = vst [vmem:[%s6927_s10 + $0xd0] sm:$0xff] %v4326_v27  ;;  %v4324_v32 = vadd.f32 %v4270_v16, %v6884_v60  ;;  %v4281_v18 = vadd.f32 %v5089_v51, %v6920_v54 }
 0x678   : > { %v4272_v23 = vpop.f32.mrf.mxu1 }
 0x679   : > { %4356 = vst [vmem:[%s6927_s10 + $0xc0] sm:$0xff] %v4324_v32  ;;  %v4327_v6 = vadd.f32 %v4281_v18, %v6897_v12  ;;  %v4273_v0 = vadd.f32 %v6920_v54, %v4272_v23 }
 0x67a   : > { %v5092_v8 = vpop.f32.mrf.mxu1 }
 0x67b   : > { %4359 = vst [vmem:[%s6927_s10 + $0xd8] sm:$0xff] %v4327_v6  ;;  %v4325_v38 = vadd.f32 %v4273_v0, %v6887_v47  ;;  %v4294_v48 = vadd.f32 %v5092_v8, %v6920_v54 }
 0x67c   : > { %v4285_v30 = vpop.f32.mrf.mxu1 }
 0x67d   : > { %4357 = vst [vmem:[%s6927_s10 + $0xc8] sm:$0xff] %v4325_v38  ;;  %v4330_v60 = vadd.f32 %v4294_v48, %v6910_v58  ;;  %v4286_v3 = vadd.f32 %v6920_v54, %v4285_v30 }
 0x67e   : > { %v5093_v52 = vpop.f32.mrf.mxu1 }
 0x67f   : > { %4362 = vst [vmem:[%s6927_s10 + $0xf0] sm:$0xff] %v4330_v60  ;;  %v4328_v12 = vadd.f32 %v4286_v3, %v6900_v15  ;;  %v4297_v19 = vadd.f32 %v5093_v52, %v6920_v54 }
 0x680   : > { %v4288_v47 = vpop.f32.mrf.mxu1 }
 0x681   : > { %4360 = vst [vmem:[%s6927_s10 + $0xe0] sm:$0xff] %v4328_v12  ;;  %v4331_v4 = vadd.f32 %v4297_v19, %v6913_v26  ;;  %v4289_v2 = vadd.f32 %v6920_v54, %v4288_v47 }
 0x683   : > { %4363 = vst [vmem:[%s6927_s10 + $0xf8] sm:$0xff] %v4331_v4  ;;  %v4329_v15 = vadd.f32 %v4289_v2, %v6903_v36 }
 0x685   : > { %4361 = vst [vmem:[%s6927_s10 + $0xe8] sm:$0xff] %v4329_v15 }
 0x686   : > { %5346 = shalt.err (!%p5343_p11)
}
 0x687   : > { %s5347_s3 = scalar_lea.hbm %s7024_s20, 4096  ;;  %s5351_s13 = scalar_lea.hbm %s7084_s7, 8192 }
 0x688   : > { %p5348_p10 = scmp.ne.s32.totalorder %s7024_s20, %s5347_s3  ;;  %p5352_p12 = scmp.lt.s32.totalorder %s7024_s20, %s7084_s7 }
 0x689   : > { %p5353_p9 = scmp.lt.s32.totalorder %s5351_s13, %s5347_s3 }
 0x68a   : > { %p5349_p7 = pnand %p5348_p10, %p7279_p4 }
 0x68b   : > { %p5354_p5 = por %p5353_p9, %p5352_p12 }
 0x68c   : > { %p5350_p6 = pneg %p5349_p7 }
 0x68e   : > { %p5355_p1 = pnand %p5354_p5, %p5350_p6 }
 0x690   : > { %5358 = shalt.err (!%p5355_p1)
}
 0x691   : > { %s5434_s17 = smov 128   ;;  %s5435_s19 = smov 8  }
 0x692   : > { %5108 = dma.vmem_to_hbm [thread:$0]  (%p7279_p4), %s7026_s18, 4096, %s7024_s20, %s4365_s27, %s5434_s17, %s5434_s17, %s5435_s19  }
 0x693 PF: > { %s4395_s22 = sand.u32 1, %s5401_s24   ;;  %p7280_p8 = scmp.ne.s32.totalorder %s7122_s12, 0 }
 0x694   : > { %p7281_p13 = scmp.ge.s32.totalorder %s5421_s29, 2  ;;  %s4396_s5 = scalar_lea.sflag [#allocation6], %s4395_s22 }
 0x696   : > { %p5125_p0 = pnand %p7281_p13, %p7280_p8 }
 0x698   : > { %p5126_p3 = pneg %p5125_p0 }
 0x69a   : > { %5396 = dma.done.wait (%p5126_p3), %s4396_s5, 4096  }
 0x69b   : > { %5398 = vsyncadd (%p5126_p3), %s4396_s5, 4294963200  ;;  %s25_s29 = sadd.s32 1, %s5421_s29   ;;  %s7282_s24 = smov %s5405_s25 }
 0x69c   : > { %p22_p2 = scmp.ge.s32.totalorder %s25_s29, 4   ;;  %s7283_s25 = smov %s5409_s26 }
 0x69d   : > { %s7284_s26 = smov %s5597_s15  ;;  %s7285_s27 = smov %s5417_s28 }
 0x69e   : > { %s7286_s28 = smov %s7288_s16  ;;  %24 = sbr.rel (!%p22_p2) target bundleno = 12 (0xc), region = 110 }
 0x6a3   :  { %4401 = vsyncpa [#allocation5], 1 }
 0x6a4   :  { %4403 = vsyncpa [#allocation5 + $0x1], 1 }
 0x6a5   :  { %4404 = vsyncpa [#allocation8], 1 }
 0x6a6   :  { %4405 = vsyncpa [#allocation11], 1 }
 0x6a7   :  { %4406 = vsyncpa [#allocation6], 1 }
 0x6a8   :  { %4408 = vsyncpa [#allocation6 + $0x1], 1 }

</bundles_post_ra>
